<compile_context>
chip_gen: v7x
topology: tpu7x:2x2x1
jax: 0.10.0
libtpu: 0.0.40
codegen_flags: <defaults>
</compile_context>

<pallas_src>
import functools

import jax
import jax.numpy as jnp
from jax import lax
from jax.experimental import pallas as pl
from jax.experimental.pallas import tpu as pltpu

LEAKY_SLOPE = 0.2
BN_EPS = 1e-5
LANE = 128
SUBLANE_BF16 = 16  # bf16 packs (16, 128) tiles -> slice offsets multiple of 16


def _round_up(x, m):
    return (x + m - 1) // m * m


def _pad_ch(c):
    # Items 1 & 10: keep small channel counts natural (sublane multiple of 8),
    # only lane-align channels that are already >= 128.
    return _round_up(c, 8) if c < LANE else _round_up(c, LANE)


_VMEM_LIMIT = None


def _vmem_limit_bytes():
    """Generation-aware VMEM budget: ~70% of the physical per-core VMEM."""
    global _VMEM_LIMIT
    if _VMEM_LIMIT is None:
        cap = None
        try:
            info = pltpu.get_tpu_info()
            for name in ("vmem_capacity_bytes", "vmem_size_bytes", "vmem_bytes"):
                cap = getattr(info, name, None)
                if cap:
                    break
        except Exception:
            cap = None
        if not cap:
            cap = 64 * 1024 * 1024  # conservative fallback (v7x per-TC size)
        _VMEM_LIMIT = int(cap) * 7 // 10
    return _VMEM_LIMIT


# ---------------------------------------------------------------------------
# Pallas kernels
# ---------------------------------------------------------------------------
def _accumulate_taps(x_ref, w_ref, taps, np_rows):
    """sum_t  x[plane_t, off_t : off_t + np_rows, :] @ w[t]  (f32 accumulation).

    All `off_t` are multiples of 16 (bf16 sublane tile) by construction, so the
    slices are tile-aligned views (no re-tiling copies) and each tap is a
    single bf16 MXU matmul with K = 3*Cin.  Dots are kept back-to-back with
    only the accumulate between them (item 6).
    """
    cout = w_ref.shape[2]
    acc = jnp.zeros((np_rows, cout), jnp.float32)
    for t, (plane, off) in enumerate(taps):
        lhs = x_ref[plane, pl.ds(off, np_rows), :]          # [np_rows, 3*Cin] bf16
        acc = acc + jnp.dot(lhs, w_ref[t],                  # bf16 x bf16 -> f32 MXU
                            preferred_element_type=jnp.float32)
    return acc


def _conv_block_kernel(x_ref, w_ref, b_ref, o_ref, *, taps, np_rows, slope):
    # Fused 3x3 conv (3 row-tap matmuls) + folded-BN bias + LeakyReLU.
    acc = _accumulate_taps(x_ref, w_ref, taps, np_rows)
    y = acc + b_ref[...]
    y = jnp.maximum(y, slope * y)                           # LeakyReLU, 2 VALU ops
    o_ref[...] = y.astype(o_ref.dtype)


def _conv_head_kernel(x_ref, w_ref, b_ref, m_ref, hw_ref, hb_ref, o_ref, *,
                      taps, np_rows, slope):
    # Last conv block fused with AdaptiveAvgPool2d(1) + 1x1 conv (the head).
    acc = _accumulate_taps(x_ref, w_ref, taps, np_rows)
    y = acc + b_ref[...]
    y = jnp.maximum(y, slope * y)
    # Match the precision the unfused path would have (features stored bf16).
    y = y.astype(jnp.bfloat16).astype(jnp.float32)
    # Pooling reduction on the MXU (item 9): m_ref is [1, np_rows] holding
    # 1/(Ho*Wo) at valid spatial rows and 0 at the dense pad columns.
    pooled = jnp.dot(m_ref[...], y, preferred_element_type=jnp.float32)  # [1, Cout]
    score = jnp.sum(pooled * hw_ref[...], axis=1, keepdims=True) + hb_ref[...]
    o_ref[...] = score                                       # [1, 1]


# ---------------------------------------------------------------------------
# pallas_call wrappers
# ---------------------------------------------------------------------------
def fused_conv_block(planes, w, b, *, taps, np_rows):
    B, P, L, K = planes.shape
    Cout = w.shape[2]
    kern = functools.partial(_conv_block_kernel, taps=tuple(taps),
                             np_rows=np_rows, slope=LEAKY_SLOPE)
    return pl.pallas_call(
        kern,
        out_shape=jax.ShapeDtypeStruct((B, np_rows, Cout), jnp.bfloat16),
        grid_spec=pltpu.PrefetchScalarGridSpec(
            num_scalar_prefetch=0,
            grid=(B,),
            in_specs=[
                pl.BlockSpec((None, P, L, K), lambda bb: (bb, 0, 0, 0)),
                pl.BlockSpec((3, K, Cout), lambda bb: (0, 0, 0)),
                pl.BlockSpec((1, Cout), lambda bb: (0, 0)),
            ],
            out_specs=pl.BlockSpec((None, np_rows, Cout), lambda bb: (bb, 0, 0)),
        ),
        compiler_params=pltpu.CompilerParams(
            dimension_semantics=("parallel",),
            vmem_limit_bytes=_vmem_limit_bytes(),
        ),
    )(planes, w, b)


def fused_conv_head_block(planes, w, b, pool_mask, head_w, head_b, *, taps, np_rows):
    B, P, L, K = planes.shape
    Cout = w.shape[2]
    kern = functools.partial(_conv_head_kernel, taps=tuple(taps),
                             np_rows=np_rows, slope=LEAKY_SLOPE)
    out = pl.pallas_call(
        kern,
        out_shape=jax.ShapeDtypeStruct((B, 1, 1), jnp.float32),
        grid_spec=pltpu.PrefetchScalarGridSpec(
            num_scalar_prefetch=0,
            grid=(B,),
            in_specs=[
                pl.BlockSpec((None, P, L, K), lambda bb: (bb, 0, 0, 0)),
                pl.BlockSpec((3, K, Cout), lambda bb: (0, 0, 0)),
                pl.BlockSpec((1, Cout), lambda bb: (0, 0)),
                pl.BlockSpec((1, np_rows), lambda bb: (0, 0)),
                pl.BlockSpec((1, Cout), lambda bb: (0, 0)),
                pl.BlockSpec((1, 1), lambda bb: (0, 0)),
            ],
            out_specs=pl.BlockSpec((None, 1, 1), lambda bb: (bb, 0, 0)),
        ),
        compiler_params=pltpu.CompilerParams(
            dimension_semantics=("parallel",),
            vmem_limit_bytes=_vmem_limit_bytes(),
        ),
    )(planes, w, b, pool_mask, head_w, head_b)
    return out.reshape(B, 1)


# ---------------------------------------------------------------------------
# Plain-JAX glue: width-only im2col slab construction (item 2).
# The slab lanes hold the 3 column taps (K = 3*Cin); the padded output width
# `wd` is a multiple of 16 so every row-tap offset is bf16 tile aligned.
# ---------------------------------------------------------------------------
def _prep_planes(x, stride):
    """x: [B, H, W, C] bf16 -> (planes [B,P,L,3C], taps, np_rows, (Ho, Wo, wd))."""
    B, H, W, C = x.shape
    if stride == 2:
        assert H % 2 == 0 and W % 2 == 0, "stride-2 block requires even H, W"
    Ho, Wo = H // stride, W // stride
    xp = jnp.pad(x, ((0, 0), (1, 1), (1, 1), (0, 0)))         # [B, H+2, W+2, C]
    # Fold the three width taps into the channel (lane) dimension.
    cols = [xp[:, :, dw:dw + stride * (Wo - 1) + 1:stride, :] for dw in range(3)]
    slab = jnp.concatenate(cols, axis=-1)                      # [B, H+2, Wo, 3C]
    wd = _round_up(Wo, SUBLANE_BF16)
    if wd > Wo:
        slab = jnp.pad(slab, ((0, 0), (0, 0), (0, wd - Wo), (0, 0)))
    if stride == 1:
        planes = slab.reshape(B, 1, (H + 2) * wd, 3 * C)
        taps = ((0, 0), (0, wd), (0, 2 * wd))                  # dh = 0, 1, 2
    else:
        even = slab[:, 0::2]                                   # [B, Ho+1, wd, 3C]
        odd = slab[:, 1::2]                                    # [B, Ho+1, wd, 3C]
        planes = jnp.stack([even, odd], axis=1).reshape(B, 2, (Ho + 1) * wd, 3 * C)
        taps = ((0, 0), (1, 0), (0, wd))                       # dh = 0, 1, 2
    np_rows = Ho * wd
    L = planes.shape[2]
    for _, off in taps:                                        # guard against OOB reads
        assert off + np_rows <= L, (off, np_rows, L)
    return planes, taps, np_rows, (Ho, Wo, wd)


# ---------------------------------------------------------------------------
# Deterministic parameter init (level-0 critic of ProgressiveCritic)
# ---------------------------------------------------------------------------
def init_critic_params(key, hc):
    # (Cin, Cout, stride, use_bn) for the 7 feature blocks (Critic.features).
    cfgs = [
        (3, hc, 1, False),        # ConvBlock(3, hc, use_bn=False)
        (hc, 2 * hc, 2, True),    # DownsampleBlock(hc, 2hc)
        (2 * hc, 2 * hc, 1, True),
        (2 * hc, 4 * hc, 2, True),
        (4 * hc, 4 * hc, 1, True),
        (4 * hc, 8 * hc, 2, True),
        (8 * hc, 8 * hc, 1, True),
    ]
    params = []
    for cin, cout, stride, use_bn in cfgs:
        key, k1, k2 = jax.random.split(key, 3)
        w = jax.random.normal(k1, (3, 3, cin, cout), jnp.float32) / jnp.sqrt(9.0 * cin)
        if use_bn:
            # Eval-mode BN (mean=0, var=1, gamma=1, beta=0) folded into the conv.
            w = w * (1.0 / jnp.sqrt(1.0 + BN_EPS))
            b = jnp.zeros((cout,), jnp.float32)
        else:
            b = 0.01 * jax.random.normal(k2, (cout,), jnp.float32)
        cin_p, cout_p = _pad_ch(cin), _pad_ch(cout)
        wp = jnp.zeros((3, 3, cin_p, cout_p), jnp.float32).at[:, :, :cin, :cout].set(w)
        bp = jnp.zeros((1, cout_p), jnp.float32).at[0, :cout].set(b)
        # Kernel weight layout: [row tap dh, K = 3*Cin (dw-major, c-minor), Cout]
        params.append(dict(w=wp.reshape(3, 3 * cin_p, cout_p).astype(jnp.bfloat16),
                           b=bp, stride=stride))
    key, k1, k2 = jax.random.split(key, 3)
    c_last = 8 * hc
    c_last_p = _pad_ch(c_last)
    hw = jax.random.normal(k1, (c_last,), jnp.float32) / jnp.sqrt(float(c_last))
    head_w = jnp.zeros((1, c_last_p), jnp.float32).at[0, :c_last].set(hw)
    head_b = 0.01 * jax.random.normal(k2, (1, 1), jnp.float32)
    return params, (head_w, head_b)


# ---------------------------------------------------------------------------
# Forward (== ProgressiveCritic.forward with current_level = 0)
# ---------------------------------------------------------------------------
def progressive_critic_forward(image_nchw, params, head_params):
    x = jnp.transpose(image_nchw, (0, 2, 3, 1)).astype(jnp.float32)  # NCHW -> NHWC
    B, H, W, C = x.shape
    cin_p = params[0]["w"].shape[1] // 3        # natural/8-padded, NOT 128 (item 1)
    if cin_p > C:
        x = jnp.pad(x, ((0, 0), (0, 0), (0, 0), (0, cin_p - C)))
    x = x.astype(jnp.bfloat16)
    n = len(params)
    score = None
    for i, p in enumerate(params):
        planes, taps, np_rows, (Ho, Wo, wd) = _prep_planes(x, p["stride"])
        if i + 1 < n:
            y = fused_conv_block(planes, p["w"], p["b"], taps=taps, np_rows=np_rows)
            cout_p = p["w"].shape[2]
            x = y.reshape(B, Ho, wd, cout_p)[:, :, :Wo, :]
        else:
            # 1/(Ho*Wo) at valid dense rows, 0 at the width-pad columns.
            col = jnp.arange(np_rows, dtype=jnp.int32) % wd
            pool_mask = ((col < Wo).astype(jnp.float32) / float(Ho * Wo)).reshape(1, np_rows)
            score = fused_conv_head_block(planes, p["w"], p["b"], pool_mask,
                                          head_params[0], head_params[1],
                                          taps=taps, np_rows=np_rows)
    return score  # [B, 1]  (== score.view(B, -1) in the PyTorch module)


# ---------------------------------------------------------------------------
# Plain-XLA reference (same bf16 quantization points) for a self-check
# ---------------------------------------------------------------------------
def reference_forward(image_nchw, params, head_params):
    x = jnp.transpose(image_nchw, (0, 2, 3, 1)).astype(jnp.float32)
    B, H, W, C = x.shape
    cin_p = params[0]["w"].shape[1] // 3
    if cin_p > C:
        x = jnp.pad(x, ((0, 0), (0, 0), (0, 0), (0, cin_p - C)))
    x = x.astype(jnp.bfloat16)
    for p in params:
        k3, K3, cout_p = p["w"].shape
        wk = p["w"].reshape(3, 3, K3 // 3, cout_p)
        y = lax.conv_general_dilated(
            x, wk, window_strides=(p["stride"], p["stride"]),
            padding=((1, 1), (1, 1)),
            dimension_numbers=("NHWC", "HWIO", "NHWC"),
            preferred_element_type=jnp.float32)
        y = y + p["b"].reshape(1, 1, 1, -1)
        y = jnp.maximum(y, LEAKY_SLOPE * y)
        x = y.astype(jnp.bfloat16)
    pooled = jnp.mean(x.astype(jnp.float32), axis=(1, 2))     # [B, Cpad]
    head_w, head_b = head_params
    return jnp.sum(pooled * head_w, axis=1, keepdims=True) + head_b


if __name__ == "__main__":
    key = jax.random.PRNGKey(0)
    k_img, k_par = jax.random.split(key)

    hidden_channels = 16  # small synthetic config (module default is 64)
    image = jax.random.normal(k_img, (2, 3, 16, 16), jnp.float32)  # [B, 3, H, W]

    params, head_params = init_critic_params(k_par, hidden_channels)

    fwd = jax.jit(lambda img: progressive_critic_forward(img, params, head_params))
    score = fwd(image)
    jax.block_until_ready(score)

    assert score.shape == (2, 1), score.shape
    assert bool(jnp.all(jnp.isfinite(score)))

    ref = jax.jit(lambda img: reference_forward(img, params, head_params))(image)
    jax.block_until_ready(ref)
    err = float(jnp.max(jnp.abs(score - ref)))
    assert err < 5e-2, f"mismatch vs XLA reference: max abs err = {err}"

    print("KERNEL_OK")
</pallas_src>

<mosaic_0001>
module attributes {stable_mosaic.version = 11 : i64} {
  func.func @_conv_block_kernel(%arg0: i32, %arg1: memref<1x1x288x24xbf16, #tpu.memory_space<vmem>>, %arg2: memref<3x24x16xbf16, #tpu.memory_space<vmem>>, %arg3: memref<1x16xf32, #tpu.memory_space<vmem>>, %arg4: memref<1x256x16xbf16, #tpu.memory_space<vmem>>) attributes {dimension_semantics = [#tpu.dimension_semantics<parallel>], iteration_bounds = array<i64: 2>, scalar_prefetch = 0 : i64, scratch_operands = 0 : i64, tpu.core_type = #tpu.core_type<tc>, window_params = [{transform_indices = @transform_0, window_bounds = array<i64: 1, 1, 288, 24>}, {pipeline_mode = #tpu.pipeline_mode<synchronous>, transform_indices = @transform_1, window_bounds = array<i64: 3, 24, 16>}, {pipeline_mode = #tpu.pipeline_mode<synchronous>, transform_indices = @transform_2, window_bounds = array<i64: 1, 16>}, {transform_indices = @transform_3, window_bounds = array<i64: 1, 256, 16>}]} {
    %cst = arith.constant 0.000000e+00 : f32
    %0 = vector.broadcast %cst : f32 to vector<256x16xf32>
    %c0 = arith.constant 0 : index
    %c0_0 = arith.constant 0 : index
    %c0_1 = arith.constant 0 : index
    %c0_2 = arith.constant 0 : index
    %1 = vector.load %arg1[%c0, %c0_0, %c0_1, %c0_2] : memref<1x1x288x24xbf16, #tpu.memory_space<vmem>>, vector<1x1x256x24xbf16>
    %2 = vector.shape_cast %1 : vector<1x1x256x24xbf16> to vector<256x24xbf16>
    %c0_3 = arith.constant 0 : index
    %c0_4 = arith.constant 0 : index
    %c0_5 = arith.constant 0 : index
    %3 = vector.load %arg2[%c0_3, %c0_4, %c0_5] : memref<3x24x16xbf16, #tpu.memory_space<vmem>>, vector<1x24x16xbf16>
    %4 = vector.shape_cast %3 : vector<1x24x16xbf16> to vector<24x16xbf16>
    %cst_6 = arith.constant dense<0.000000e+00> : vector<256x16xf32>
    %5 = tpu.matmul %2, %4, %cst_6 {dimension_numbers = #tpu.dot_dimension_numbers<[1], [0], [0], [1], [0, 0, 1, 1], [], []>} : vector<256x24xbf16>, vector<24x16xbf16>, vector<256x16xf32> -> vector<256x16xf32>
    %6 = arith.addf %0, %5 : vector<256x16xf32>
    %c0_7 = arith.constant 0 : index
    %c0_8 = arith.constant 0 : index
    %c16 = arith.constant 16 : index
    %c0_9 = arith.constant 0 : index
    %7 = vector.load %arg1[%c0_7, %c0_8, %c16, %c0_9] : memref<1x1x288x24xbf16, #tpu.memory_space<vmem>>, vector<1x1x256x24xbf16>
    %8 = vector.shape_cast %7 : vector<1x1x256x24xbf16> to vector<256x24xbf16>
    %c1 = arith.constant 1 : index
    %c0_10 = arith.constant 0 : index
    %c0_11 = arith.constant 0 : index
    %9 = vector.load %arg2[%c1, %c0_10, %c0_11] : memref<3x24x16xbf16, #tpu.memory_space<vmem>>, vector<1x24x16xbf16>
    %10 = vector.shape_cast %9 : vector<1x24x16xbf16> to vector<24x16xbf16>
    %cst_12 = arith.constant dense<0.000000e+00> : vector<256x16xf32>
    %11 = tpu.matmul %8, %10, %cst_12 {dimension_numbers = #tpu.dot_dimension_numbers<[1], [0], [0], [1], [0, 0, 1, 1], [], []>} : vector<256x24xbf16>, vector<24x16xbf16>, vector<256x16xf32> -> vector<256x16xf32>
    %12 = arith.addf %6, %11 : vector<256x16xf32>
    %c0_13 = arith.constant 0 : index
    %c0_14 = arith.constant 0 : index
    %c32 = arith.constant 32 : index
    %c0_15 = arith.constant 0 : index
    %13 = vector.load %arg1[%c0_13, %c0_14, %c32, %c0_15] : memref<1x1x288x24xbf16, #tpu.memory_space<vmem>>, vector<1x1x256x24xbf16>
    %14 = vector.shape_cast %13 : vector<1x1x256x24xbf16> to vector<256x24xbf16>
    %c2 = arith.constant 2 : index
    %c0_16 = arith.constant 0 : index
    %c0_17 = arith.constant 0 : index
    %15 = vector.load %arg2[%c2, %c0_16, %c0_17] : memref<3x24x16xbf16, #tpu.memory_space<vmem>>, vector<1x24x16xbf16>
    %16 = vector.shape_cast %15 : vector<1x24x16xbf16> to vector<24x16xbf16>
    %cst_18 = arith.constant dense<0.000000e+00> : vector<256x16xf32>
    %17 = tpu.matmul %14, %16, %cst_18 {dimension_numbers = #tpu.dot_dimension_numbers<[1], [0], [0], [1], [0, 0, 1, 1], [], []>} : vector<256x24xbf16>, vector<24x16xbf16>, vector<256x16xf32> -> vector<256x16xf32>
    %18 = arith.addf %12, %17 : vector<256x16xf32>
    %c0_19 = arith.constant 0 : index
    %c0_20 = arith.constant 0 : index
    %19 = vector.load %arg3[%c0_19, %c0_20] : memref<1x16xf32, #tpu.memory_space<vmem>>, vector<1x16xf32>
    %20 = vector.broadcast %19 : vector<1x16xf32> to vector<256x16xf32>
    %21 = arith.addf %18, %20 : vector<256x16xf32>
    %cst_21 = arith.constant 2.000000e-01 : f32
    %22 = vector.broadcast %cst_21 : f32 to vector<256x16xf32>
    %23 = arith.mulf %22, %21 : vector<256x16xf32>
    %24 = arith.maximumf %21, %23 : vector<256x16xf32>
    %25 = arith.truncf %24 : vector<256x16xf32> to vector<256x16xbf16>
    %c0_22 = arith.constant 0 : index
    %c0_23 = arith.constant 0 : index
    %c0_24 = arith.constant 0 : index
    %26 = vector.load %arg4[%c0_22, %c0_23, %c0_24] : memref<1x256x16xbf16, #tpu.memory_space<vmem>>, vector<1x256x16xbf16>
    %27 = vector.shape_cast %26 : vector<1x256x16xbf16> to vector<256x16xbf16>
    %28 = vector.shape_cast %25 : vector<256x16xbf16> to vector<1x256x16xbf16>
    tpu.vector_store %arg4[%c0_22, %c0_23, %c0_24], %28 {strides = array<i32>} : memref<1x256x16xbf16, #tpu.memory_space<vmem>>, vector<1x256x16xbf16>,
    return
  }
  func.func @transform_0(%arg0: i32) -> (i32, i32, i32, i32) {
    %c0_i32 = arith.constant 0 : i32
    %c0_i32_0 = arith.constant 0 : i32
    %c0_i32_1 = arith.constant 0 : i32
    %c0_i32_2 = arith.constant 0 : i32
    return %arg0, %c0_i32, %c0_i32_0, %c0_i32_1 : i32, i32, i32, i32
  }
  func.func @transform_1(%arg0: i32) -> (i32, i32, i32) {
    %c0_i32 = arith.constant 0 : i32
    %c0_i32_0 = arith.constant 0 : i32
    %c0_i32_1 = arith.constant 0 : i32
    %c0_i32_2 = arith.constant 0 : i32
    return %c0_i32, %c0_i32_0, %c0_i32_1 : i32, i32, i32
  }
  func.func @transform_2(%arg0: i32) -> (i32, i32) {
    %c0_i32 = arith.constant 0 : i32
    %c0_i32_0 = arith.constant 0 : i32
    %c0_i32_1 = arith.constant 0 : i32
    return %c0_i32, %c0_i32_0 : i32, i32
  }
  func.func @transform_3(%arg0: i32) -> (i32, i32, i32) {
    %c0_i32 = arith.constant 0 : i32
    %c0_i32_0 = arith.constant 0 : i32
    %c0_i32_1 = arith.constant 0 : i32
    return %arg0, %c0_i32, %c0_i32_0 : i32, i32, i32
  }
}

module attributes {stable_mosaic.version = 11 : i64} {
  func.func @_conv_block_kernel(%arg0: i32, %arg1: memref<1x2x144x48xbf16, #tpu.memory_space<vmem>>, %arg2: memref<3x48x32xbf16, #tpu.memory_space<vmem>>, %arg3: memref<1x32xf32, #tpu.memory_space<vmem>>, %arg4: memref<1x128x32xbf16, #tpu.memory_space<vmem>>) attributes {dimension_semantics = [#tpu.dimension_semantics<parallel>], iteration_bounds = array<i64: 2>, scalar_prefetch = 0 : i64, scratch_operands = 0 : i64, tpu.core_type = #tpu.core_type<tc>, window_params = [{transform_indices = @transform_0, window_bounds = array<i64: 1, 2, 144, 48>}, {pipeline_mode = #tpu.pipeline_mode<synchronous>, transform_indices = @transform_1, window_bounds = array<i64: 3, 48, 32>}, {pipeline_mode = #tpu.pipeline_mode<synchronous>, transform_indices = @transform_2, window_bounds = array<i64: 1, 32>}, {transform_indices = @transform_3, window_bounds = array<i64: 1, 128, 32>}]} {
    %cst = arith.constant 0.000000e+00 : f32
    %0 = vector.broadcast %cst : f32 to vector<128x32xf32>
    %c0 = arith.constant 0 : index
    %c0_0 = arith.constant 0 : index
    %c0_1 = arith.constant 0 : index
    %c0_2 = arith.constant 0 : index
    %1 = vector.load %arg1[%c0, %c0_0, %c0_1, %c0_2] : memref<1x2x144x48xbf16, #tpu.memory_space<vmem>>, vector<1x1x128x48xbf16>
    %2 = vector.shape_cast %1 : vector<1x1x128x48xbf16> to vector<128x48xbf16>
    %c0_3 = arith.constant 0 : index
    %c0_4 = arith.constant 0 : index
    %c0_5 = arith.constant 0 : index
    %3 = vector.load %arg2[%c0_3, %c0_4, %c0_5] : memref<3x48x32xbf16, #tpu.memory_space<vmem>>, vector<1x48x32xbf16>
    %4 = vector.shape_cast %3 : vector<1x48x32xbf16> to vector<48x32xbf16>
    %cst_6 = arith.constant dense<0.000000e+00> : vector<128x32xf32>
    %5 = tpu.matmul %2, %4, %cst_6 {dimension_numbers = #tpu.dot_dimension_numbers<[1], [0], [0], [1], [0, 0, 1, 1], [], []>} : vector<128x48xbf16>, vector<48x32xbf16>, vector<128x32xf32> -> vector<128x32xf32>
    %6 = arith.addf %0, %5 : vector<128x32xf32>
    %c0_7 = arith.constant 0 : index
    %c1 = arith.constant 1 : index
    %c0_8 = arith.constant 0 : index
    %c0_9 = arith.constant 0 : index
    %7 = vector.load %arg1[%c0_7, %c1, %c0_8, %c0_9] : memref<1x2x144x48xbf16, #tpu.memory_space<vmem>>, vector<1x1x128x48xbf16>
    %8 = vector.shape_cast %7 : vector<1x1x128x48xbf16> to vector<128x48xbf16>
    %c1_10 = arith.constant 1 : index
    %c0_11 = arith.constant 0 : index
    %c0_12 = arith.constant 0 : index
    %9 = vector.load %arg2[%c1_10, %c0_11, %c0_12] : memref<3x48x32xbf16, #tpu.memory_space<vmem>>, vector<1x48x32xbf16>
    %10 = vector.shape_cast %9 : vector<1x48x32xbf16> to vector<48x32xbf16>
    %cst_13 = arith.constant dense<0.000000e+00> : vector<128x32xf32>
    %11 = tpu.matmul %8, %10, %cst_13 {dimension_numbers = #tpu.dot_dimension_numbers<[1], [0], [0], [1], [0, 0, 1, 1], [], []>} : vector<128x48xbf16>, vector<48x32xbf16>, vector<128x32xf32> -> vector<128x32xf32>
    %12 = arith.addf %6, %11 : vector<128x32xf32>
    %c0_14 = arith.constant 0 : index
    %c0_15 = arith.constant 0 : index
    %c16 = arith.constant 16 : index
    %c0_16 = arith.constant 0 : index
    %13 = vector.load %arg1[%c0_14, %c0_15, %c16, %c0_16] : memref<1x2x144x48xbf16, #tpu.memory_space<vmem>>, vector<1x1x128x48xbf16>
    %14 = vector.shape_cast %13 : vector<1x1x128x48xbf16> to vector<128x48xbf16>
    %c2 = arith.constant 2 : index
    %c0_17 = arith.constant 0 : index
    %c0_18 = arith.constant 0 : index
    %15 = vector.load %arg2[%c2, %c0_17, %c0_18] : memref<3x48x32xbf16, #tpu.memory_space<vmem>>, vector<1x48x32xbf16>
    %16 = vector.shape_cast %15 : vector<1x48x32xbf16> to vector<48x32xbf16>
    %cst_19 = arith.constant dense<0.000000e+00> : vector<128x32xf32>
    %17 = tpu.matmul %14, %16, %cst_19 {dimension_numbers = #tpu.dot_dimension_numbers<[1], [0], [0], [1], [0, 0, 1, 1], [], []>} : vector<128x48xbf16>, vector<48x32xbf16>, vector<128x32xf32> -> vector<128x32xf32>
    %18 = arith.addf %12, %17 : vector<128x32xf32>
    %c0_20 = arith.constant 0 : index
    %c0_21 = arith.constant 0 : index
    %19 = vector.load %arg3[%c0_20, %c0_21] : memref<1x32xf32, #tpu.memory_space<vmem>>, vector<1x32xf32>
    %20 = vector.broadcast %19 : vector<1x32xf32> to vector<128x32xf32>
    %21 = arith.addf %18, %20 : vector<128x32xf32>
    %cst_22 = arith.constant 2.000000e-01 : f32
    %22 = vector.broadcast %cst_22 : f32 to vector<128x32xf32>
    %23 = arith.mulf %22, %21 : vector<128x32xf32>
    %24 = arith.maximumf %21, %23 : vector<128x32xf32>
    %25 = arith.truncf %24 : vector<128x32xf32> to vector<128x32xbf16>
    %c0_23 = arith.constant 0 : index
    %c0_24 = arith.constant 0 : index
    %c0_25 = arith.constant 0 : index
    %26 = vector.load %arg4[%c0_23, %c0_24, %c0_25] : memref<1x128x32xbf16, #tpu.memory_space<vmem>>, vector<1x128x32xbf16>
    %27 = vector.shape_cast %26 : vector<1x128x32xbf16> to vector<128x32xbf16>
    %28 = vector.shape_cast %25 : vector<128x32xbf16> to vector<1x128x32xbf16>
    tpu.vector_store %arg4[%c0_23, %c0_24, %c0_25], %28 {strides = array<i32>} : memref<1x128x32xbf16, #tpu.memory_space<vmem>>, vector<1x128x32xbf16>,
    return
  }
  func.func @transform_0(%arg0: i32) -> (i32, i32, i32, i32) {
    %c0_i32 = arith.constant 0 : i32
    %c0_i32_0 = arith.constant 0 : i32
    %c0_i32_1 = arith.constant 0 : i32
    %c0_i32_2 = arith.constant 0 : i32
    return %arg0, %c0_i32, %c0_i32_0, %c0_i32_1 : i32, i32, i32, i32
  }
  func.func @transform_1(%arg0: i32) -> (i32, i32, i32) {
    %c0_i32 = arith.constant 0 : i32
    %c0_i32_0 = arith.constant 0 : i32
    %c0_i32_1 = arith.constant 0 : i32
    %c0_i32_2 = arith.constant 0 : i32
    return %c0_i32, %c0_i32_0, %c0_i32_1 : i32, i32, i32
  }
  func.func @transform_2(%arg0: i32) -> (i32, i32) {
    %c0_i32 = arith.constant 0 : i32
    %c0_i32_0 = arith.constant 0 : i32
    %c0_i32_1 = arith.constant 0 : i32
    return %c0_i32, %c0_i32_0 : i32, i32
  }
  func.func @transform_3(%arg0: i32) -> (i32, i32, i32) {
    %c0_i32 = arith.constant 0 : i32
    %c0_i32_0 = arith.constant 0 : i32
    %c0_i32_1 = arith.constant 0 : i32
    return %arg0, %c0_i32, %c0_i32_0 : i32, i32, i32
  }
}

module attributes {stable_mosaic.version = 11 : i64} {
  func.func @_conv_block_kernel(%arg0: i32, %arg1: memref<1x1x160x96xbf16, #tpu.memory_space<vmem>>, %arg2: memref<3x96x32xbf16, #tpu.memory_space<vmem>>, %arg3: memref<1x32xf32, #tpu.memory_space<vmem>>, %arg4: memref<1x128x32xbf16, #tpu.memory_space<vmem>>) attributes {dimension_semantics = [#tpu.dimension_semantics<parallel>], iteration_bounds = array<i64: 2>, scalar_prefetch = 0 : i64, scratch_operands = 0 : i64, tpu.core_type = #tpu.core_type<tc>, window_params = [{transform_indices = @transform_0, window_bounds = array<i64: 1, 1, 160, 96>}, {pipeline_mode = #tpu.pipeline_mode<synchronous>, transform_indices = @transform_1, window_bounds = array<i64: 3, 96, 32>}, {pipeline_mode = #tpu.pipeline_mode<synchronous>, transform_indices = @transform_2, window_bounds = array<i64: 1, 32>}, {transform_indices = @transform_3, window_bounds = array<i64: 1, 128, 32>}]} {
    %cst = arith.constant 0.000000e+00 : f32
    %0 = vector.broadcast %cst : f32 to vector<128x32xf32>
    %c0 = arith.constant 0 : index
    %c0_0 = arith.constant 0 : index
    %c0_1 = arith.constant 0 : index
    %c0_2 = arith.constant 0 : index
    %1 = vector.load %arg1[%c0, %c0_0, %c0_1, %c0_2] : memref<1x1x160x96xbf16, #tpu.memory_space<vmem>>, vector<1x1x128x96xbf16>
    %2 = vector.shape_cast %1 : vector<1x1x128x96xbf16> to vector<128x96xbf16>
    %c0_3 = arith.constant 0 : index
    %c0_4 = arith.constant 0 : index
    %c0_5 = arith.constant 0 : index
    %3 = vector.load %arg2[%c0_3, %c0_4, %c0_5] : memref<3x96x32xbf16, #tpu.memory_space<vmem>>, vector<1x96x32xbf16>
    %4 = vector.shape_cast %3 : vector<1x96x32xbf16> to vector<96x32xbf16>
    %cst_6 = arith.constant dense<0.000000e+00> : vector<128x32xf32>
    %5 = tpu.matmul %2, %4, %cst_6 {dimension_numbers = #tpu.dot_dimension_numbers<[1], [0], [0], [1], [0, 0, 1, 1], [], []>} : vector<128x96xbf16>, vector<96x32xbf16>, vector<128x32xf32> -> vector<128x32xf32>
    %6 = arith.addf %0, %5 : vector<128x32xf32>
    %c0_7 = arith.constant 0 : index
    %c0_8 = arith.constant 0 : index
    %c16 = arith.constant 16 : index
    %c0_9 = arith.constant 0 : index
    %7 = vector.load %arg1[%c0_7, %c0_8, %c16, %c0_9] : memref<1x1x160x96xbf16, #tpu.memory_space<vmem>>, vector<1x1x128x96xbf16>
    %8 = vector.shape_cast %7 : vector<1x1x128x96xbf16> to vector<128x96xbf16>
    %c1 = arith.constant 1 : index
    %c0_10 = arith.constant 0 : index
    %c0_11 = arith.constant 0 : index
    %9 = vector.load %arg2[%c1, %c0_10, %c0_11] : memref<3x96x32xbf16, #tpu.memory_space<vmem>>, vector<1x96x32xbf16>
    %10 = vector.shape_cast %9 : vector<1x96x32xbf16> to vector<96x32xbf16>
    %cst_12 = arith.constant dense<0.000000e+00> : vector<128x32xf32>
    %11 = tpu.matmul %8, %10, %cst_12 {dimension_numbers = #tpu.dot_dimension_numbers<[1], [0], [0], [1], [0, 0, 1, 1], [], []>} : vector<128x96xbf16>, vector<96x32xbf16>, vector<128x32xf32> -> vector<128x32xf32>
    %12 = arith.addf %6, %11 : vector<128x32xf32>
    %c0_13 = arith.constant 0 : index
    %c0_14 = arith.constant 0 : index
    %c32 = arith.constant 32 : index
    %c0_15 = arith.constant 0 : index
    %13 = vector.load %arg1[%c0_13, %c0_14, %c32, %c0_15] : memref<1x1x160x96xbf16, #tpu.memory_space<vmem>>, vector<1x1x128x96xbf16>
    %14 = vector.shape_cast %13 : vector<1x1x128x96xbf16> to vector<128x96xbf16>
    %c2 = arith.constant 2 : index
    %c0_16 = arith.constant 0 : index
    %c0_17 = arith.constant 0 : index
    %15 = vector.load %arg2[%c2, %c0_16, %c0_17] : memref<3x96x32xbf16, #tpu.memory_space<vmem>>, vector<1x96x32xbf16>
    %16 = vector.shape_cast %15 : vector<1x96x32xbf16> to vector<96x32xbf16>
    %cst_18 = arith.constant dense<0.000000e+00> : vector<128x32xf32>
    %17 = tpu.matmul %14, %16, %cst_18 {dimension_numbers = #tpu.dot_dimension_numbers<[1], [0], [0], [1], [0, 0, 1, 1], [], []>} : vector<128x96xbf16>, vector<96x32xbf16>, vector<128x32xf32> -> vector<128x32xf32>
    %18 = arith.addf %12, %17 : vector<128x32xf32>
    %c0_19 = arith.constant 0 : index
    %c0_20 = arith.constant 0 : index
    %19 = vector.load %arg3[%c0_19, %c0_20] : memref<1x32xf32, #tpu.memory_space<vmem>>, vector<1x32xf32>
    %20 = vector.broadcast %19 : vector<1x32xf32> to vector<128x32xf32>
    %21 = arith.addf %18, %20 : vector<128x32xf32>
    %cst_21 = arith.constant 2.000000e-01 : f32
    %22 = vector.broadcast %cst_21 : f32 to vector<128x32xf32>
    %23 = arith.mulf %22, %21 : vector<128x32xf32>
    %24 = arith.maximumf %21, %23 : vector<128x32xf32>
    %25 = arith.truncf %24 : vector<128x32xf32> to vector<128x32xbf16>
    %c0_22 = arith.constant 0 : index
    %c0_23 = arith.constant 0 : index
    %c0_24 = arith.constant 0 : index
    %26 = vector.load %arg4[%c0_22, %c0_23, %c0_24] : memref<1x128x32xbf16, #tpu.memory_space<vmem>>, vector<1x128x32xbf16>
    %27 = vector.shape_cast %26 : vector<1x128x32xbf16> to vector<128x32xbf16>
    %28 = vector.shape_cast %25 : vector<128x32xbf16> to vector<1x128x32xbf16>
    tpu.vector_store %arg4[%c0_22, %c0_23, %c0_24], %28 {strides = array<i32>} : memref<1x128x32xbf16, #tpu.memory_space<vmem>>, vector<1x128x32xbf16>,
    return
  }
  func.func @transform_0(%arg0: i32) -> (i32, i32, i32, i32) {
    %c0_i32 = arith.constant 0 : i32
    %c0_i32_0 = arith.constant 0 : i32
    %c0_i32_1 = arith.constant 0 : i32
    %c0_i32_2 = arith.constant 0 : i32
    return %arg0, %c0_i32, %c0_i32_0, %c0_i32_1 : i32, i32, i32, i32
  }
  func.func @transform_1(%arg0: i32) -> (i32, i32, i32) {
    %c0_i32 = arith.constant 0 : i32
    %c0_i32_0 = arith.constant 0 : i32
    %c0_i32_1 = arith.constant 0 : i32
    %c0_i32_2 = arith.constant 0 : i32
    return %c0_i32, %c0_i32_0, %c0_i32_1 : i32, i32, i32
  }
  func.func @transform_2(%arg0: i32) -> (i32, i32) {
    %c0_i32 = arith.constant 0 : i32
    %c0_i32_0 = arith.constant 0 : i32
    %c0_i32_1 = arith.constant 0 : i32
    return %c0_i32, %c0_i32_0 : i32, i32
  }
  func.func @transform_3(%arg0: i32) -> (i32, i32, i32) {
    %c0_i32 = arith.constant 0 : i32
    %c0_i32_0 = arith.constant 0 : i32
    %c0_i32_1 = arith.constant 0 : i32
    return %arg0, %c0_i32, %c0_i32_0 : i32, i32, i32
  }
}

module attributes {stable_mosaic.version = 11 : i64} {
  func.func @_conv_block_kernel(%arg0: i32, %arg1: memref<1x2x80x96xbf16, #tpu.memory_space<vmem>>, %arg2: memref<3x96x64xbf16, #tpu.memory_space<vmem>>, %arg3: memref<1x64xf32, #tpu.memory_space<vmem>>, %arg4: memref<1x64x64xbf16, #tpu.memory_space<vmem>>) attributes {dimension_semantics = [#tpu.dimension_semantics<parallel>], iteration_bounds = array<i64: 2>, scalar_prefetch = 0 : i64, scratch_operands = 0 : i64, tpu.core_type = #tpu.core_type<tc>, window_params = [{transform_indices = @transform_0, window_bounds = array<i64: 1, 2, 80, 96>}, {pipeline_mode = #tpu.pipeline_mode<synchronous>, transform_indices = @transform_1, window_bounds = array<i64: 3, 96, 64>}, {pipeline_mode = #tpu.pipeline_mode<synchronous>, transform_indices = @transform_2, window_bounds = array<i64: 1, 64>}, {transform_indices = @transform_3, window_bounds = array<i64: 1, 64, 64>}]} {
    %cst = arith.constant 0.000000e+00 : f32
    %0 = vector.broadcast %cst : f32 to vector<64x64xf32>
    %c0 = arith.constant 0 : index
    %c0_0 = arith.constant 0 : index
    %c0_1 = arith.constant 0 : index
    %c0_2 = arith.constant 0 : index
    %1 = vector.load %arg1[%c0, %c0_0, %c0_1, %c0_2] : memref<1x2x80x96xbf16, #tpu.memory_space<vmem>>, vector<1x1x64x96xbf16>
    %2 = vector.shape_cast %1 : vector<1x1x64x96xbf16> to vector<64x96xbf16>
    %c0_3 = arith.constant 0 : index
    %c0_4 = arith.constant 0 : index
    %c0_5 = arith.constant 0 : index
    %3 = vector.load %arg2[%c0_3, %c0_4, %c0_5] : memref<3x96x64xbf16, #tpu.memory_space<vmem>>, vector<1x96x64xbf16>
    %4 = vector.shape_cast %3 : vector<1x96x64xbf16> to vector<96x64xbf16>
    %cst_6 = arith.constant dense<0.000000e+00> : vector<64x64xf32>
    %5 = tpu.matmul %2, %4, %cst_6 {dimension_numbers = #tpu.dot_dimension_numbers<[1], [0], [0], [1], [0, 0, 1, 1], [], []>} : vector<64x96xbf16>, vector<96x64xbf16>, vector<64x64xf32> -> vector<64x64xf32>
    %6 = arith.addf %0, %5 : vector<64x64xf32>
    %c0_7 = arith.constant 0 : index
    %c1 = arith.constant 1 : index
    %c0_8 = arith.constant 0 : index
    %c0_9 = arith.constant 0 : index
    %7 = vector.load %arg1[%c0_7, %c1, %c0_8, %c0_9] : memref<1x2x80x96xbf16, #tpu.memory_space<vmem>>, vector<1x1x64x96xbf16>
    %8 = vector.shape_cast %7 : vector<1x1x64x96xbf16> to vector<64x96xbf16>
    %c1_10 = arith.constant 1 : index
    %c0_11 = arith.constant 0 : index
    %c0_12 = arith.constant 0 : index
    %9 = vector.load %arg2[%c1_10, %c0_11, %c0_12] : memref<3x96x64xbf16, #tpu.memory_space<vmem>>, vector<1x96x64xbf16>
    %10 = vector.shape_cast %9 : vector<1x96x64xbf16> to vector<96x64xbf16>
    %cst_13 = arith.constant dense<0.000000e+00> : vector<64x64xf32>
    %11 = tpu.matmul %8, %10, %cst_13 {dimension_numbers = #tpu.dot_dimension_numbers<[1], [0], [0], [1], [0, 0, 1, 1], [], []>} : vector<64x96xbf16>, vector<96x64xbf16>, vector<64x64xf32> -> vector<64x64xf32>
    %12 = arith.addf %6, %11 : vector<64x64xf32>
    %c0_14 = arith.constant 0 : index
    %c0_15 = arith.constant 0 : index
    %c16 = arith.constant 16 : index
    %c0_16 = arith.constant 0 : index
    %13 = vector.load %arg1[%c0_14, %c0_15, %c16, %c0_16] : memref<1x2x80x96xbf16, #tpu.memory_space<vmem>>, vector<1x1x64x96xbf16>
    %14 = vector.shape_cast %13 : vector<1x1x64x96xbf16> to vector<64x96xbf16>
    %c2 = arith.constant 2 : index
    %c0_17 = arith.constant 0 : index
    %c0_18 = arith.constant 0 : index
    %15 = vector.load %arg2[%c2, %c0_17, %c0_18] : memref<3x96x64xbf16, #tpu.memory_space<vmem>>, vector<1x96x64xbf16>
    %16 = vector.shape_cast %15 : vector<1x96x64xbf16> to vector<96x64xbf16>
    %cst_19 = arith.constant dense<0.000000e+00> : vector<64x64xf32>
    %17 = tpu.matmul %14, %16, %cst_19 {dimension_numbers = #tpu.dot_dimension_numbers<[1], [0], [0], [1], [0, 0, 1, 1], [], []>} : vector<64x96xbf16>, vector<96x64xbf16>, vector<64x64xf32> -> vector<64x64xf32>
    %18 = arith.addf %12, %17 : vector<64x64xf32>
    %c0_20 = arith.constant 0 : index
    %c0_21 = arith.constant 0 : index
    %19 = vector.load %arg3[%c0_20, %c0_21] : memref<1x64xf32, #tpu.memory_space<vmem>>, vector<1x64xf32>
    %20 = vector.broadcast %19 : vector<1x64xf32> to vector<64x64xf32>
    %21 = arith.addf %18, %20 : vector<64x64xf32>
    %cst_22 = arith.constant 2.000000e-01 : f32
    %22 = vector.broadcast %cst_22 : f32 to vector<64x64xf32>
    %23 = arith.mulf %22, %21 : vector<64x64xf32>
    %24 = arith.maximumf %21, %23 : vector<64x64xf32>
    %25 = arith.truncf %24 : vector<64x64xf32> to vector<64x64xbf16>
    %c0_23 = arith.constant 0 : index
    %c0_24 = arith.constant 0 : index
    %c0_25 = arith.constant 0 : index
    %26 = vector.load %arg4[%c0_23, %c0_24, %c0_25] : memref<1x64x64xbf16, #tpu.memory_space<vmem>>, vector<1x64x64xbf16>
    %27 = vector.shape_cast %26 : vector<1x64x64xbf16> to vector<64x64xbf16>
    %28 = vector.shape_cast %25 : vector<64x64xbf16> to vector<1x64x64xbf16>
    tpu.vector_store %arg4[%c0_23, %c0_24, %c0_25], %28 {strides = array<i32>} : memref<1x64x64xbf16, #tpu.memory_space<vmem>>, vector<1x64x64xbf16>,
    return
  }
  func.func @transform_0(%arg0: i32) -> (i32, i32, i32, i32) {
    %c0_i32 = arith.constant 0 : i32
    %c0_i32_0 = arith.constant 0 : i32
    %c0_i32_1 = arith.constant 0 : i32
    %c0_i32_2 = arith.constant 0 : i32
    return %arg0, %c0_i32, %c0_i32_0, %c0_i32_1 : i32, i32, i32, i32
  }
  func.func @transform_1(%arg0: i32) -> (i32, i32, i32) {
    %c0_i32 = arith.constant 0 : i32
    %c0_i32_0 = arith.constant 0 : i32
    %c0_i32_1 = arith.constant 0 : i32
    %c0_i32_2 = arith.constant 0 : i32
    return %c0_i32, %c0_i32_0, %c0_i32_1 : i32, i32, i32
  }
  func.func @transform_2(%arg0: i32) -> (i32, i32) {
    %c0_i32 = arith.constant 0 : i32
    %c0_i32_0 = arith.constant 0 : i32
    %c0_i32_1 = arith.constant 0 : i32
    return %c0_i32, %c0_i32_0 : i32, i32
  }
  func.func @transform_3(%arg0: i32) -> (i32, i32, i32) {
    %c0_i32 = arith.constant 0 : i32
    %c0_i32_0 = arith.constant 0 : i32
    %c0_i32_1 = arith.constant 0 : i32
    return %arg0, %c0_i32, %c0_i32_0 : i32, i32, i32
  }
}

module attributes {stable_mosaic.version = 11 : i64} {
  func.func @_conv_block_kernel(%arg0: i32, %arg1: memref<1x1x96x192xbf16, #tpu.memory_space<vmem>>, %arg2: memref<3x192x64xbf16, #tpu.memory_space<vmem>>, %arg3: memref<1x64xf32, #tpu.memory_space<vmem>>, %arg4: memref<1x64x64xbf16, #tpu.memory_space<vmem>>) attributes {dimension_semantics = [#tpu.dimension_semantics<parallel>], iteration_bounds = array<i64: 2>, scalar_prefetch = 0 : i64, scratch_operands = 0 : i64, tpu.core_type = #tpu.core_type<tc>, window_params = [{transform_indices = @transform_0, window_bounds = array<i64: 1, 1, 96, 192>}, {pipeline_mode = #tpu.pipeline_mode<synchronous>, transform_indices = @transform_1, window_bounds = array<i64: 3, 192, 64>}, {pipeline_mode = #tpu.pipeline_mode<synchronous>, transform_indices = @transform_2, window_bounds = array<i64: 1, 64>}, {transform_indices = @transform_3, window_bounds = array<i64: 1, 64, 64>}]} {
    %cst = arith.constant 0.000000e+00 : f32
    %0 = vector.broadcast %cst : f32 to vector<64x64xf32>
    %c0 = arith.constant 0 : index
    %c0_0 = arith.constant 0 : index
    %c0_1 = arith.constant 0 : index
    %c0_2 = arith.constant 0 : index
    %1 = vector.load %arg1[%c0, %c0_0, %c0_1, %c0_2] : memref<1x1x96x192xbf16, #tpu.memory_space<vmem>>, vector<1x1x64x192xbf16>
    %2 = vector.shape_cast %1 : vector<1x1x64x192xbf16> to vector<64x192xbf16>
    %c0_3 = arith.constant 0 : index
    %c0_4 = arith.constant 0 : index
    %c0_5 = arith.constant 0 : index
    %3 = vector.load %arg2[%c0_3, %c0_4, %c0_5] : memref<3x192x64xbf16, #tpu.memory_space<vmem>>, vector<1x192x64xbf16>
    %4 = vector.shape_cast %3 : vector<1x192x64xbf16> to vector<192x64xbf16>
    %cst_6 = arith.constant dense<0.000000e+00> : vector<64x64xf32>
    %5 = tpu.matmul %2, %4, %cst_6 {dimension_numbers = #tpu.dot_dimension_numbers<[1], [0], [0], [1], [0, 0, 1, 1], [], []>} : vector<64x192xbf16>, vector<192x64xbf16>, vector<64x64xf32> -> vector<64x64xf32>
    %6 = arith.addf %0, %5 : vector<64x64xf32>
    %c0_7 = arith.constant 0 : index
    %c0_8 = arith.constant 0 : index
    %c16 = arith.constant 16 : index
    %c0_9 = arith.constant 0 : index
    %7 = vector.load %arg1[%c0_7, %c0_8, %c16, %c0_9] : memref<1x1x96x192xbf16, #tpu.memory_space<vmem>>, vector<1x1x64x192xbf16>
    %8 = vector.shape_cast %7 : vector<1x1x64x192xbf16> to vector<64x192xbf16>
    %c1 = arith.constant 1 : index
    %c0_10 = arith.constant 0 : index
    %c0_11 = arith.constant 0 : index
    %9 = vector.load %arg2[%c1, %c0_10, %c0_11] : memref<3x192x64xbf16, #tpu.memory_space<vmem>>, vector<1x192x64xbf16>
    %10 = vector.shape_cast %9 : vector<1x192x64xbf16> to vector<192x64xbf16>
    %cst_12 = arith.constant dense<0.000000e+00> : vector<64x64xf32>
    %11 = tpu.matmul %8, %10, %cst_12 {dimension_numbers = #tpu.dot_dimension_numbers<[1], [0], [0], [1], [0, 0, 1, 1], [], []>} : vector<64x192xbf16>, vector<192x64xbf16>, vector<64x64xf32> -> vector<64x64xf32>
    %12 = arith.addf %6, %11 : vector<64x64xf32>
    %c0_13 = arith.constant 0 : index
    %c0_14 = arith.constant 0 : index
    %c32 = arith.constant 32 : index
    %c0_15 = arith.constant 0 : index
    %13 = vector.load %arg1[%c0_13, %c0_14, %c32, %c0_15] : memref<1x1x96x192xbf16, #tpu.memory_space<vmem>>, vector<1x1x64x192xbf16>
    %14 = vector.shape_cast %13 : vector<1x1x64x192xbf16> to vector<64x192xbf16>
    %c2 = arith.constant 2 : index
    %c0_16 = arith.constant 0 : index
    %c0_17 = arith.constant 0 : index
    %15 = vector.load %arg2[%c2, %c0_16, %c0_17] : memref<3x192x64xbf16, #tpu.memory_space<vmem>>, vector<1x192x64xbf16>
    %16 = vector.shape_cast %15 : vector<1x192x64xbf16> to vector<192x64xbf16>
    %cst_18 = arith.constant dense<0.000000e+00> : vector<64x64xf32>
    %17 = tpu.matmul %14, %16, %cst_18 {dimension_numbers = #tpu.dot_dimension_numbers<[1], [0], [0], [1], [0, 0, 1, 1], [], []>} : vector<64x192xbf16>, vector<192x64xbf16>, vector<64x64xf32> -> vector<64x64xf32>
    %18 = arith.addf %12, %17 : vector<64x64xf32>
    %c0_19 = arith.constant 0 : index
    %c0_20 = arith.constant 0 : index
    %19 = vector.load %arg3[%c0_19, %c0_20] : memref<1x64xf32, #tpu.memory_space<vmem>>, vector<1x64xf32>
    %20 = vector.broadcast %19 : vector<1x64xf32> to vector<64x64xf32>
    %21 = arith.addf %18, %20 : vector<64x64xf32>
    %cst_21 = arith.constant 2.000000e-01 : f32
    %22 = vector.broadcast %cst_21 : f32 to vector<64x64xf32>
    %23 = arith.mulf %22, %21 : vector<64x64xf32>
    %24 = arith.maximumf %21, %23 : vector<64x64xf32>
    %25 = arith.truncf %24 : vector<64x64xf32> to vector<64x64xbf16>
    %c0_22 = arith.constant 0 : index
    %c0_23 = arith.constant 0 : index
    %c0_24 = arith.constant 0 : index
    %26 = vector.load %arg4[%c0_22, %c0_23, %c0_24] : memref<1x64x64xbf16, #tpu.memory_space<vmem>>, vector<1x64x64xbf16>
    %27 = vector.shape_cast %26 : vector<1x64x64xbf16> to vector<64x64xbf16>
    %28 = vector.shape_cast %25 : vector<64x64xbf16> to vector<1x64x64xbf16>
    tpu.vector_store %arg4[%c0_22, %c0_23, %c0_24], %28 {strides = array<i32>} : memref<1x64x64xbf16, #tpu.memory_space<vmem>>, vector<1x64x64xbf16>,
    return
  }
  func.func @transform_0(%arg0: i32) -> (i32, i32, i32, i32) {
    %c0_i32 = arith.constant 0 : i32
    %c0_i32_0 = arith.constant 0 : i32
    %c0_i32_1 = arith.constant 0 : i32
    %c0_i32_2 = arith.constant 0 : i32
    return %arg0, %c0_i32, %c0_i32_0, %c0_i32_1 : i32, i32, i32, i32
  }
  func.func @transform_1(%arg0: i32) -> (i32, i32, i32) {
    %c0_i32 = arith.constant 0 : i32
    %c0_i32_0 = arith.constant 0 : i32
    %c0_i32_1 = arith.constant 0 : i32
    %c0_i32_2 = arith.constant 0 : i32
    return %c0_i32, %c0_i32_0, %c0_i32_1 : i32, i32, i32
  }
  func.func @transform_2(%arg0: i32) -> (i32, i32) {
    %c0_i32 = arith.constant 0 : i32
    %c0_i32_0 = arith.constant 0 : i32
    %c0_i32_1 = arith.constant 0 : i32
    return %c0_i32, %c0_i32_0 : i32, i32
  }
  func.func @transform_3(%arg0: i32) -> (i32, i32, i32) {
    %c0_i32 = arith.constant 0 : i32
    %c0_i32_0 = arith.constant 0 : i32
    %c0_i32_1 = arith.constant 0 : i32
    return %arg0, %c0_i32, %c0_i32_0 : i32, i32, i32
  }
}

module attributes {stable_mosaic.version = 11 : i64} {
  func.func @_conv_block_kernel(%arg0: i32, %arg1: memref<1x2x48x192xbf16, #tpu.memory_space<vmem>>, %arg2: memref<3x192x128xbf16, #tpu.memory_space<vmem>>, %arg3: memref<1x128xf32, #tpu.memory_space<vmem>>, %arg4: memref<1x32x128xbf16, #tpu.memory_space<vmem>>) attributes {dimension_semantics = [#tpu.dimension_semantics<parallel>], iteration_bounds = array<i64: 2>, scalar_prefetch = 0 : i64, scratch_operands = 0 : i64, tpu.core_type = #tpu.core_type<tc>, window_params = [{transform_indices = @transform_0, window_bounds = array<i64: 1, 2, 48, 192>}, {pipeline_mode = #tpu.pipeline_mode<synchronous>, transform_indices = @transform_1, window_bounds = array<i64: 3, 192, 128>}, {pipeline_mode = #tpu.pipeline_mode<synchronous>, transform_indices = @transform_2, window_bounds = array<i64: 1, 128>}, {transform_indices = @transform_3, window_bounds = array<i64: 1, 32, 128>}]} {
    %cst = arith.constant 0.000000e+00 : f32
    %0 = vector.broadcast %cst : f32 to vector<32x128xf32>
    %c0 = arith.constant 0 : index
    %c0_0 = arith.constant 0 : index
    %c0_1 = arith.constant 0 : index
    %c0_2 = arith.constant 0 : index
    %1 = vector.load %arg1[%c0, %c0_0, %c0_1, %c0_2] : memref<1x2x48x192xbf16, #tpu.memory_space<vmem>>, vector<1x1x32x192xbf16>
    %2 = vector.shape_cast %1 : vector<1x1x32x192xbf16> to vector<32x192xbf16>
    %c0_3 = arith.constant 0 : index
    %c0_4 = arith.constant 0 : index
    %c0_5 = arith.constant 0 : index
    %3 = vector.load %arg2[%c0_3, %c0_4, %c0_5] : memref<3x192x128xbf16, #tpu.memory_space<vmem>>, vector<1x192x128xbf16>
    %4 = vector.shape_cast %3 : vector<1x192x128xbf16> to vector<192x128xbf16>
    %cst_6 = arith.constant dense<0.000000e+00> : vector<32x128xf32>
    %5 = tpu.matmul %2, %4, %cst_6 {dimension_numbers = #tpu.dot_dimension_numbers<[1], [0], [0], [1], [0, 0, 1, 1], [], []>} : vector<32x192xbf16>, vector<192x128xbf16>, vector<32x128xf32> -> vector<32x128xf32>
    %6 = arith.addf %0, %5 : vector<32x128xf32>
    %c0_7 = arith.constant 0 : index
    %c1 = arith.constant 1 : index
    %c0_8 = arith.constant 0 : index
    %c0_9 = arith.constant 0 : index
    %7 = vector.load %arg1[%c0_7, %c1, %c0_8, %c0_9] : memref<1x2x48x192xbf16, #tpu.memory_space<vmem>>, vector<1x1x32x192xbf16>
    %8 = vector.shape_cast %7 : vector<1x1x32x192xbf16> to vector<32x192xbf16>
    %c1_10 = arith.constant 1 : index
    %c0_11 = arith.constant 0 : index
    %c0_12 = arith.constant 0 : index
    %9 = vector.load %arg2[%c1_10, %c0_11, %c0_12] : memref<3x192x128xbf16, #tpu.memory_space<vmem>>, vector<1x192x128xbf16>
    %10 = vector.shape_cast %9 : vector<1x192x128xbf16> to vector<192x128xbf16>
    %cst_13 = arith.constant dense<0.000000e+00> : vector<32x128xf32>
    %11 = tpu.matmul %8, %10, %cst_13 {dimension_numbers = #tpu.dot_dimension_numbers<[1], [0], [0], [1], [0, 0, 1, 1], [], []>} : vector<32x192xbf16>, vector<192x128xbf16>, vector<32x128xf32> -> vector<32x128xf32>
    %12 = arith.addf %6, %11 : vector<32x128xf32>
    %c0_14 = arith.constant 0 : index
    %c0_15 = arith.constant 0 : index
    %c16 = arith.constant 16 : index
    %c0_16 = arith.constant 0 : index
    %13 = vector.load %arg1[%c0_14, %c0_15, %c16, %c0_16] : memref<1x2x48x192xbf16, #tpu.memory_space<vmem>>, vector<1x1x32x192xbf16>
    %14 = vector.shape_cast %13 : vector<1x1x32x192xbf16> to vector<32x192xbf16>
    %c2 = arith.constant 2 : index
    %c0_17 = arith.constant 0 : index
    %c0_18 = arith.constant 0 : index
    %15 = vector.load %arg2[%c2, %c0_17, %c0_18] : memref<3x192x128xbf16, #tpu.memory_space<vmem>>, vector<1x192x128xbf16>
    %16 = vector.shape_cast %15 : vector<1x192x128xbf16> to vector<192x128xbf16>
    %cst_19 = arith.constant dense<0.000000e+00> : vector<32x128xf32>
    %17 = tpu.matmul %14, %16, %cst_19 {dimension_numbers = #tpu.dot_dimension_numbers<[1], [0], [0], [1], [0, 0, 1, 1], [], []>} : vector<32x192xbf16>, vector<192x128xbf16>, vector<32x128xf32> -> vector<32x128xf32>
    %18 = arith.addf %12, %17 : vector<32x128xf32>
    %c0_20 = arith.constant 0 : index
    %c0_21 = arith.constant 0 : index
    %19 = vector.load %arg3[%c0_20, %c0_21] : memref<1x128xf32, #tpu.memory_space<vmem>>, vector<1x128xf32>
    %20 = vector.broadcast %19 : vector<1x128xf32> to vector<32x128xf32>
    %21 = arith.addf %18, %20 : vector<32x128xf32>
    %cst_22 = arith.constant 2.000000e-01 : f32
    %22 = vector.broadcast %cst_22 : f32 to vector<32x128xf32>
    %23 = arith.mulf %22, %21 : vector<32x128xf32>
    %24 = arith.maximumf %21, %23 : vector<32x128xf32>
    %25 = arith.truncf %24 : vector<32x128xf32> to vector<32x128xbf16>
    %c0_23 = arith.constant 0 : index
    %c0_24 = arith.constant 0 : index
    %c0_25 = arith.constant 0 : index
    %26 = vector.load %arg4[%c0_23, %c0_24, %c0_25] : memref<1x32x128xbf16, #tpu.memory_space<vmem>>, vector<1x32x128xbf16>
    %27 = vector.shape_cast %26 : vector<1x32x128xbf16> to vector<32x128xbf16>
    %28 = vector.shape_cast %25 : vector<32x128xbf16> to vector<1x32x128xbf16>
    tpu.vector_store %arg4[%c0_23, %c0_24, %c0_25], %28 {strides = array<i32>} : memref<1x32x128xbf16, #tpu.memory_space<vmem>>, vector<1x32x128xbf16>,
    return
  }
  func.func @transform_0(%arg0: i32) -> (i32, i32, i32, i32) {
    %c0_i32 = arith.constant 0 : i32
    %c0_i32_0 = arith.constant 0 : i32
    %c0_i32_1 = arith.constant 0 : i32
    %c0_i32_2 = arith.constant 0 : i32
    return %arg0, %c0_i32, %c0_i32_0, %c0_i32_1 : i32, i32, i32, i32
  }
  func.func @transform_1(%arg0: i32) -> (i32, i32, i32) {
    %c0_i32 = arith.constant 0 : i32
    %c0_i32_0 = arith.constant 0 : i32
    %c0_i32_1 = arith.constant 0 : i32
    %c0_i32_2 = arith.constant 0 : i32
    return %c0_i32, %c0_i32_0, %c0_i32_1 : i32, i32, i32
  }
  func.func @transform_2(%arg0: i32) -> (i32, i32) {
    %c0_i32 = arith.constant 0 : i32
    %c0_i32_0 = arith.constant 0 : i32
    %c0_i32_1 = arith.constant 0 : i32
    return %c0_i32, %c0_i32_0 : i32, i32
  }
  func.func @transform_3(%arg0: i32) -> (i32, i32, i32) {
    %c0_i32 = arith.constant 0 : i32
    %c0_i32_0 = arith.constant 0 : i32
    %c0_i32_1 = arith.constant 0 : i32
    return %arg0, %c0_i32, %c0_i32_0 : i32, i32, i32
  }
}

module attributes {stable_mosaic.version = 11 : i64} {
  func.func @_conv_head_kernel(%arg0: i32, %arg1: memref<1x1x64x384xbf16, #tpu.memory_space<vmem>>, %arg2: memref<3x384x128xbf16, #tpu.memory_space<vmem>>, %arg3: memref<1x128xf32, #tpu.memory_space<vmem>>, %arg4: memref<1x32xf32, #tpu.memory_space<vmem>>, %arg5: memref<1x128xf32, #tpu.memory_space<vmem>>, %arg6: memref<1x1xf32, #tpu.memory_space<vmem>>, %arg7: memref<1x1x1xf32, #tpu.memory_space<vmem>>) attributes {dimension_semantics = [#tpu.dimension_semantics<parallel>], iteration_bounds = array<i64: 2>, scalar_prefetch = 0 : i64, scratch_operands = 0 : i64, tpu.core_type = #tpu.core_type<tc>, window_params = [{transform_indices = @transform_0, window_bounds = array<i64: 1, 1, 64, 384>}, {pipeline_mode = #tpu.pipeline_mode<synchronous>, transform_indices = @transform_1, window_bounds = array<i64: 3, 384, 128>}, {pipeline_mode = #tpu.pipeline_mode<synchronous>, transform_indices = @transform_2, window_bounds = array<i64: 1, 128>}, {pipeline_mode = #tpu.pipeline_mode<synchronous>, transform_indices = @transform_3, window_bounds = array<i64: 1, 32>}, {pipeline_mode = #tpu.pipeline_mode<synchronous>, transform_indices = @transform_4, window_bounds = array<i64: 1, 128>}, {pipeline_mode = #tpu.pipeline_mode<synchronous>, transform_indices = @transform_5, window_bounds = array<i64: 1, 1>}, {transform_indices = @transform_6, window_bounds = array<i64: 1, 1, 1>}]} {
    %cst = arith.constant 0.000000e+00 : f32
    %0 = vector.broadcast %cst : f32 to vector<32x128xf32>
    %c0 = arith.constant 0 : index
    %c0_0 = arith.constant 0 : index
    %c0_1 = arith.constant 0 : index
    %c0_2 = arith.constant 0 : index
    %1 = vector.load %arg1[%c0, %c0_0, %c0_1, %c0_2] : memref<1x1x64x384xbf16, #tpu.memory_space<vmem>>, vector<1x1x32x384xbf16>
    %2 = vector.shape_cast %1 : vector<1x1x32x384xbf16> to vector<32x384xbf16>
    %c0_3 = arith.constant 0 : index
    %c0_4 = arith.constant 0 : index
    %c0_5 = arith.constant 0 : index
    %3 = vector.load %arg2[%c0_3, %c0_4, %c0_5] : memref<3x384x128xbf16, #tpu.memory_space<vmem>>, vector<1x384x128xbf16>
    %4 = vector.shape_cast %3 : vector<1x384x128xbf16> to vector<384x128xbf16>
    %cst_6 = arith.constant dense<0.000000e+00> : vector<32x128xf32>
    %5 = tpu.matmul %2, %4, %cst_6 {dimension_numbers = #tpu.dot_dimension_numbers<[1], [0], [0], [1], [0, 0, 1, 1], [], []>} : vector<32x384xbf16>, vector<384x128xbf16>, vector<32x128xf32> -> vector<32x128xf32>
    %6 = arith.addf %0, %5 : vector<32x128xf32>
    %c0_7 = arith.constant 0 : index
    %c0_8 = arith.constant 0 : index
    %c16 = arith.constant 16 : index
    %c0_9 = arith.constant 0 : index
    %7 = vector.load %arg1[%c0_7, %c0_8, %c16, %c0_9] : memref<1x1x64x384xbf16, #tpu.memory_space<vmem>>, vector<1x1x32x384xbf16>
    %8 = vector.shape_cast %7 : vector<1x1x32x384xbf16> to vector<32x384xbf16>
    %c1 = arith.constant 1 : index
    %c0_10 = arith.constant 0 : index
    %c0_11 = arith.constant 0 : index
    %9 = vector.load %arg2[%c1, %c0_10, %c0_11] : memref<3x384x128xbf16, #tpu.memory_space<vmem>>, vector<1x384x128xbf16>
    %10 = vector.shape_cast %9 : vector<1x384x128xbf16> to vector<384x128xbf16>
    %cst_12 = arith.constant dense<0.000000e+00> : vector<32x128xf32>
    %11 = tpu.matmul %8, %10, %cst_12 {dimension_numbers = #tpu.dot_dimension_numbers<[1], [0], [0], [1], [0, 0, 1, 1], [], []>} : vector<32x384xbf16>, vector<384x128xbf16>, vector<32x128xf32> -> vector<32x128xf32>
    %12 = arith.addf %6, %11 : vector<32x128xf32>
    %c0_13 = arith.constant 0 : index
    %c0_14 = arith.constant 0 : index
    %c32 = arith.constant 32 : index
    %c0_15 = arith.constant 0 : index
    %13 = vector.load %arg1[%c0_13, %c0_14, %c32, %c0_15] : memref<1x1x64x384xbf16, #tpu.memory_space<vmem>>, vector<1x1x32x384xbf16>
    %14 = vector.shape_cast %13 : vector<1x1x32x384xbf16> to vector<32x384xbf16>
    %c2 = arith.constant 2 : index
    %c0_16 = arith.constant 0 : index
    %c0_17 = arith.constant 0 : index
    %15 = vector.load %arg2[%c2, %c0_16, %c0_17] : memref<3x384x128xbf16, #tpu.memory_space<vmem>>, vector<1x384x128xbf16>
    %16 = vector.shape_cast %15 : vector<1x384x128xbf16> to vector<384x128xbf16>
    %cst_18 = arith.constant dense<0.000000e+00> : vector<32x128xf32>
    %17 = tpu.matmul %14, %16, %cst_18 {dimension_numbers = #tpu.dot_dimension_numbers<[1], [0], [0], [1], [0, 0, 1, 1], [], []>} : vector<32x384xbf16>, vector<384x128xbf16>, vector<32x128xf32> -> vector<32x128xf32>
    %18 = arith.addf %12, %17 : vector<32x128xf32>
    %c0_19 = arith.constant 0 : index
    %c0_20 = arith.constant 0 : index
    %19 = vector.load %arg3[%c0_19, %c0_20] : memref<1x128xf32, #tpu.memory_space<vmem>>, vector<1x128xf32>
    %20 = vector.broadcast %19 : vector<1x128xf32> to vector<32x128xf32>
    %21 = arith.addf %18, %20 : vector<32x128xf32>
    %cst_21 = arith.constant 2.000000e-01 : f32
    %22 = vector.broadcast %cst_21 : f32 to vector<32x128xf32>
    %23 = arith.mulf %22, %21 : vector<32x128xf32>
    %24 = arith.maximumf %21, %23 : vector<32x128xf32>
    %25 = arith.truncf %24 : vector<32x128xf32> to vector<32x128xbf16>
    %26 = arith.extf %25 : vector<32x128xbf16> to vector<32x128xf32>
    %c0_22 = arith.constant 0 : index
    %c0_23 = arith.constant 0 : index
    %27 = vector.load %arg4[%c0_22, %c0_23] : memref<1x32xf32, #tpu.memory_space<vmem>>, vector<1x32xf32>
    %cst_24 = arith.constant dense<0.000000e+00> : vector<1x128xf32>
    %28 = tpu.matmul %27, %26, %cst_24 {dimension_numbers = #tpu.dot_dimension_numbers<[1], [0], [0], [1], [0, 0, 1, 1], [], []>} : vector<1x32xf32>, vector<32x128xf32>, vector<1x128xf32> -> vector<1x128xf32>
    %c0_25 = arith.constant 0 : index
    %c0_26 = arith.constant 0 : index
    %29 = vector.load %arg5[%c0_25, %c0_26] : memref<1x128xf32, #tpu.memory_space<vmem>>, vector<1x128xf32>
    %30 = arith.mulf %28, %29 : vector<1x128xf32>
    %cst_27 = arith.constant dense<0.000000e+00> : vector<1xf32>
    %31 = vector.multi_reduction <add>, %30, %cst_27 [1] : vector<1x128xf32> to vector<1xf32>
    %32 = vector.shape_cast %31 : vector<1xf32> to vector<1x1xf32>
    %c0_28 = arith.constant 0 : index
    %c0_29 = arith.constant 0 : index
    %33 = vector.load %arg6[%c0_28, %c0_29] : memref<1x1xf32, #tpu.memory_space<vmem>>, vector<1x1xf32>
    %34 = arith.addf %32, %33 : vector<1x1xf32>
    %c0_30 = arith.constant 0 : index
    %c0_31 = arith.constant 0 : index
    %c0_32 = arith.constant 0 : index
    %35 = vector.load %arg7[%c0_30, %c0_31, %c0_32] : memref<1x1x1xf32, #tpu.memory_space<vmem>>, vector<1x1x1xf32>
    %36 = vector.shape_cast %35 : vector<1x1x1xf32> to vector<1x1xf32>
    %37 = vector.shape_cast %34 : vector<1x1xf32> to vector<1x1x1xf32>
    tpu.vector_store %arg7[%c0_30, %c0_31, %c0_32], %37 {strides = array<i32>} : memref<1x1x1xf32, #tpu.memory_space<vmem>>, vector<1x1x1xf32>,
    return
  }
  func.func @transform_0(%arg0: i32) -> (i32, i32, i32, i32) {
    %c0_i32 = arith.constant 0 : i32
    %c0_i32_0 = arith.constant 0 : i32
    %c0_i32_1 = arith.constant 0 : i32
    %c0_i32_2 = arith.constant 0 : i32
    return %arg0, %c0_i32, %c0_i32_0, %c0_i32_1 : i32, i32, i32, i32
  }
  func.func @transform_1(%arg0: i32) -> (i32, i32, i32) {
    %c0_i32 = arith.constant 0 : i32
    %c0_i32_0 = arith.constant 0 : i32
    %c0_i32_1 = arith.constant 0 : i32
    %c0_i32_2 = arith.constant 0 : i32
    return %c0_i32, %c0_i32_0, %c0_i32_1 : i32, i32, i32
  }
  func.func @transform_2(%arg0: i32) -> (i32, i32) {
    %c0_i32 = arith.constant 0 : i32
    %c0_i32_0 = arith.constant 0 : i32
    %c0_i32_1 = arith.constant 0 : i32
    return %c0_i32, %c0_i32_0 : i32, i32
  }
  func.func @transform_3(%arg0: i32) -> (i32, i32) {
    %c0_i32 = arith.constant 0 : i32
    %c0_i32_0 = arith.constant 0 : i32
    %c0_i32_1 = arith.constant 0 : i32
    return %c0_i32, %c0_i32_0 : i32, i32
  }
  func.func @transform_4(%arg0: i32) -> (i32, i32) {
    %c0_i32 = arith.constant 0 : i32
    %c0_i32_0 = arith.constant 0 : i32
    %c0_i32_1 = arith.constant 0 : i32
    return %c0_i32, %c0_i32_0 : i32, i32
  }
  func.func @transform_5(%arg0: i32) -> (i32, i32) {
    %c0_i32 = arith.constant 0 : i32
    %c0_i32_0 = arith.constant 0 : i32
    %c0_i32_1 = arith.constant 0 : i32
    return %c0_i32, %c0_i32_0 : i32, i32
  }
  func.func @transform_6(%arg0: i32) -> (i32, i32, i32) {
    %c0_i32 = arith.constant 0 : i32
    %c0_i32_0 = arith.constant 0 : i32
    %c0_i32_1 = arith.constant 0 : i32
    return %arg0, %c0_i32, %c0_i32_0 : i32, i32, i32
  }
}

</mosaic_0001>

<bundles_post_ra>
// kernel: _lambda_.8
= control target key start
LH: loop header
LB: loop body
LE: loop exit
PB: predicated region body
PF: predicated region fallthrough
CT: control target
= control target key end

     0   :  { %s1322_s12 = smov 0   ;;  %s1475_s0 = inlined_call_operand.vmem [shape: bf16[2,2,144,48], index: 0, kind: input, shape index: {}]   ;;  %s1476_s1 = inlined_call_operand.vmem [shape: bf16[3,48,32], index: 1, kind: input, shape index: {}]   ;;  %s1477_s2 = inlined_call_operand.vmem [shape: f32[1,32], index: 2, kind: input, shape index: {}]   ;;  %s1478_s3 = inlined_call_operand.vmem [shape: bf16[2,128,32], index: 3, kind: output, shape index: {}]  }
   0x1 LB: > { %s986_s13 = sadd.s32 4294967295, %s1300_s12   ;;  %p990_p0 = scmp.ge.s32.totalorder %s1300_s12, 1  ;;  %s1300_s12 = sphi %s1322_s12, %s13_s12  }
   0x2   : > { %p137_p1 = scmp.lt.s32.totalorder %s1300_s12, 3 }
   0x4   : > { %p138_p2 = pnand %p990_p0, %p137_p1 }
   0x5   : > { %v1261_v0 = vld [vmem:[%s1476_s1 + $0x18] sm:$0xff] (!%p138_p2)   ;;  %p161_p3 = scmp.lt.s32.totalorder (!%p138_p2), %s986_s13, 1  ;;  %v1262_v1 = vld [vmem:[%s1476_s1] sm:$0xff] (!%p138_p2)   ;;  %v1264_v3 = vld [vmem:[%s1476_s1 + $0x8] sm:$0xff] (!%p138_p2)   ;;  %vm276_vm0 = vcmask (!%p138_p2), 392192   ;;  %vm914_vm1 = vcmask (!%p138_p2), 257024  }
   0x6   : > { %141 = sbr.rel (%p138_p2) target bundleno = 285 (0x11d), region = 32  ;;  %1148 = vmatprep.subr.bf16.mxu1 (!%p138_p2), %v1261_v0  ;;  %v1263_v2 = vld [vmem:[%s1476_s1 + $0x20] sm:$0xff] (!%p138_p2)   ;;  %1170 = vmatprep.subr.bf16.mxu0 (!%p138_p2), %v1262_v1  ;;  %v1265_v4 = vld [vmem:[%s1476_s1 + $0x28] sm:$0xff] (!%p138_p2)   ;;  %v1266_v5 = vld [vmem:[%s1476_s1 + $0x10] sm:$0xff] (!%p138_p2)  }
   0x7   : > { %1149 = vmatpush3.bf16.msra.mxu1 (!%p138_p2), %v1261_v0  ;;  %1171 = vmatpush3.bf16.msra.mxu0 (!%p138_p2), %v1262_v1  ;;  %v1271_v7 = vld [vmem:[%s1476_s1 + $0x30] sm:$0xff] (!%p138_p2)   ;;  %v1272_v11 = vld [vmem:[%s1476_s1 + $0x38] sm:$0xff] (!%p138_p2)   ;;  %v1277_v15 = vld [vmem:[%s1476_s1 + $0x40] sm:$0xff] (!%p138_p2)  }
   0x8   : > { %1150 = vmatprep.subr.bf16.mxu1 (!%p138_p2), %v1263_v2  ;;  %1172 = vmatprep.subr.bf16.mxu0 (!%p138_p2), %v1264_v3  ;;  %v1416_v42 = vld [vmem:[%s1477_s2] ss:$0 sm:$0xff] (!%p138_p2) }
   0xb   : > { %1151 = vmatpush3.bf16.msra.mxu1 (!%p138_p2), %v1263_v2  ;;  %1173 = vmatpush3.bf16.msra.mxu0 (!%p138_p2), %v1264_v3 }
   0xc   : > { %1152 = vmatprep.subr.bf16.mxu1 (!%p138_p2), %v1265_v4  ;;  %1174 = vmatprep.subr.bf16.mxu0 (!%p138_p2), %v1266_v5 }
   0xd   : > { %s1480_s13 = smov (!%p161_p3, %s986_s13), 1 }
   0xe   : > { %s1252_s24 = smul.u32 144, %s1480_s13  ;;  %s1098_s11 = sshll.u32 %s1480_s13, 6 }
   0xf   : > { %1153 = vmatpush3.bf16.msra.mxu1 %v1265_v4  ;;  %1175 = vmatpush3.bf16.msra.mxu0 %v1266_v5  ;;  %s1426_s16 = scalar_lea.vmem %s1478_s3, %s1098_s11 }
  0x10   : > { %s1354_s29 = scalar_lea.vmem %s1475_s0, %s1252_s24  ;;  %1214 = vmatprep.subr.bf16.mxu1 %v1262_v1  ;;  %1192 = vmatprep.subr.bf16.mxu0 %v1271_v7 }
  0x11   : > { %v1267_v6 = vld [vmem:[%s1354_s29 + $0x48] sm:$0xff]   ;;  %v1268_v8 = vld [vmem:[%s1354_s29] sm:$0xff]   ;;  %v1269_v9 = vld [vmem:[%s1354_s29 + $0x50] sm:$0xff]  }
  0x12   : > { %1154 = vmatprep.mubr.msk.bf16.mxu1 %vm276_vm0, %v1267_v6  ;;  %1176 = vmatprep.mubr.msk.bf16.mxu0 %vm276_vm0, %v1268_v8  ;;  %v1270_v10 = vld [vmem:[%s1354_s29 + $0x8] sm:$0xff]   ;;  %v1273_v12 = vld [vmem:[%s1354_s29 + $0x58] sm:$0xff]   ;;  %v1274_v13 = vld [vmem:[%s1354_s29 + $0x10] sm:$0xff]  }
  0x13   : > { %1155 = vmatmul.mubr.msk.bf16.vlgmr.msra.gmra.mrb[0].mxu1 %vm276_vm0, %v1269_v9  ;;  %1177 = vmatmul.mubr.msk.bf16.vlgmr.msra.gmra.mrb[0].mxu0 %vm276_vm0, %v1270_v10  ;;  %v1275_v14 = vld [vmem:[%s1354_s29 + $0x60] sm:$0xff]   ;;  %v1276_v16 = vld [vmem:[%s1354_s29 + $0x18] sm:$0xff]   ;;  %v1278_v17 = vld [vmem:[%s1354_s29 + $0x68] sm:$0xff]  }
  0x14   : > { %1217 = vmatpush3.bf16.msra.mxu1 %v1262_v1  ;;  %1193 = vmatpush3.bf16.msra.mxu0 %v1271_v7  ;;  %v1279_v18 = vld [vmem:[%s1354_s29 + $0x8] sm:$0xff]   ;;  %v1280_v19 = vld [vmem:[%s1354_s29 + $0x70] sm:$0xff]   ;;  %v1282_v21 = vld [vmem:[%s1354_s29 + $0x78] sm:$0xff]  }
  0x15   : > { %1158 = vmatprep.mubr.msk.bf16.mxu1 %vm276_vm0, %v1273_v12  ;;  %1194 = vmatprep.subr.bf16.mxu0 %v1272_v11  ;;  %v1281_v20 = vld [vmem:[%s1354_s29 + $0x10] sm:$0xff]   ;;  %v1283_v22 = vld [vmem:[%s1354_s29 + $0x18] sm:$0xff]   ;;  %v1284_v23 = vld [vmem:[%s1354_s29 + $0x80] sm:$0xff]  }
  0x16   : > { %1180 = vmatprep.mubr.msk.bf16.mxu0 %vm276_vm0, %v1274_v13  ;;  %1215 = vmatprep.subr.bf16.mxu1 %v1264_v3  ;;  %v1285_v24 = vld [vmem:[%s1354_s29 + $0x20] sm:$0xff]   ;;  %v1287_v26 = vld [vmem:[%s1354_s29 + $0x28] sm:$0xff]   ;;  %v1289_v28 = vld [vmem:[%s1354_s29 + $0x30] sm:$0xff]  }
  0x17   : > { %v1286_v25 = vld [vmem:[%s1354_s29 + $0x20] sm:$0xff]   ;;  %v1288_v27 = vld [vmem:[%s1354_s29 + $0x28] sm:$0xff]   ;;  %v1290_v29 = vld [vmem:[%s1354_s29 + $0x30] sm:$0xff]  }
  0x18   : > { %1218 = vmatpush3.bf16.msra.mxu1 %v1264_v3  ;;  %1195 = vmatpush3.bf16.msra.mxu0 %v1272_v11  ;;  %v1291_v30 = vld [vmem:[%s1354_s29 + $0x38] sm:$0xff]   ;;  %v1293_v32 = vld [vmem:[%s1354_s29 + $0x40] sm:$0xff]  }
  0x19   : > { %1216 = vmatprep.subr.bf16.mxu1 %v1266_v5  ;;  %1196 = vmatprep.subr.bf16.mxu0 %v1277_v15  ;;  %v1292_v31 = vld [vmem:[%s1354_s29 + $0x38] sm:$0xff]  }
  0x1b   : > { %1159 = vmatmul.mubr.msk.bf16.gmra.mrb[4].mxu1 %vm276_vm0, %v1275_v14  ;;  %1181 = vmatmul.mubr.msk.bf16.gmra.mrb[4].mxu0 %vm276_vm0, %v1276_v16 }
  0x1c   : > { %1162 = vmatprep.mubr.msk.bf16.mxu1 %vm276_vm0, %v1278_v17  ;;  %1197 = vmatpush3.bf16.msra.mxu0 %v1277_v15 }
  0x1d   : > { %1198 = vmatprep.mubr.msk.bf16.mxu0 %vm276_vm0, %v1279_v18  ;;  %1219 = vmatpush3.bf16.msra.mxu1 %v1266_v5 }
  0x23   : > { %1163 = vmatmul.mubr.msk.bf16.gmra.mrb[8].mxu1 %vm276_vm0, %v1280_v19  ;;  %1199 = vmatmul.mubr.msk.bf16.vlgmr.msra.gmra.mrb[0].mxu0 %vm276_vm0, %v1281_v20 }
  0x24   : > { %1166 = vmatprep.mubr.msk.bf16.mxu1 %vm276_vm0, %v1282_v21  ;;  %1202 = vmatprep.mubr.msk.bf16.mxu0 %vm276_vm0, %v1283_v22 }
  0x2b   : > { %1167 = vmatmul.mubr.msk.bf16.gmra.mrb[12].mxu1 %vm276_vm0, %v1284_v23  ;;  %1203 = vmatmul.mubr.msk.bf16.gmra.mrb[4].mxu0 %vm276_vm0, %v1285_v24 }
  0x2c   : > { %1184 = vmatprep.mubr.msk.bf16.mxu1 %vm276_vm0, %v1286_v25  ;;  %1206 = vmatprep.mubr.msk.bf16.mxu0 %vm276_vm0, %v1287_v26 }
  0x33   : > { %1185 = vmatmul.mubr.msk.bf16.vlgmr.msra.gmra.mrb[8].mxu1 %vm276_vm0, %v1288_v27  ;;  %1207 = vmatmul.mubr.msk.bf16.gmra.mrb[8].mxu0 %vm276_vm0, %v1289_v28 }
  0x34   : > { %1188 = vmatprep.mubr.msk.bf16.mxu1 %vm276_vm0, %v1290_v29  ;;  %1210 = vmatprep.mubr.msk.bf16.mxu0 %vm276_vm0, %v1291_v30 }
  0x3b   : > { %1189 = vmatmul.mubr.msk.bf16.gmra.mrb[12].mxu1 %vm276_vm0, %v1292_v31  ;;  %1211 = vmatmul.mubr.msk.bf16.gmra.mrb[12].mxu0 %vm276_vm0, %v1293_v32 }
  0xe6   : > { %v1156_v33 = vpop.f32.mrb[0].mxu1 }
  0xe7   : > { %v335_v34 = vpop.f32.mrb[1].mxu1 }
  0xe8   : > { %v1157_v35 = vpop.f32.mrb[2].mxu1 }
  0xe9   : > { %v338_v36 = vpop.f32.mrb[3].mxu1 }
  0xee   : > { %v1160_v37 = vpop.f32.mrb[4].mxu1 }
  0xef   : > { %v351_v38 = vpop.f32.mrb[5].mxu1 }
  0xf0   : > { %v1161_v39 = vpop.f32.mrb[6].mxu1 }
  0xf1   : > { %v354_v40 = vpop.f32.mrb[7].mxu1 }
  0xf6   : > { %v1200_v41 = vpop.f32.mrb[0].mxu0 }
  0xf7   : > { %v1220_v43 = vadd.f32 %v1200_v41, %v1156_v33  ;;  %v716_v44 = vpop.f32.mrb[1].mxu0 }
  0xf8   : > { %v1221_v45 = vadd.f32 %v716_v44, %v335_v34  ;;  %v1201_v46 = vpop.f32.mrb[2].mxu0 }
  0xf9   : > { %v804_v47 = vadd.f32 %v1220_v43, %v1416_v42  ;;  %v1222_v48 = vadd.f32 %v1201_v46, %v1157_v35  ;;  %v719_v49 = vpop.f32.mrb[3].mxu0 }
  0xfa   : > { %v802_v50 = vadd.f32 %v1221_v45, %v1416_v42  ;;  %v1223_v51 = vadd.f32 %v719_v49, %v338_v36 }
  0xfb   : > { %v820_v52 = vmul.f32 0.2, %v804_v47  ;;  %v805_v53 = vadd.f32 %v1222_v48, %v1416_v42 }
  0xfc   : > { %v818_v54 = vmul.f32 0.2, %v802_v50  ;;  %v803_v55 = vadd.f32 %v1223_v51, %v1416_v42 }
  0xfd   : > { %v836_v56 = vmax.f32 %v804_v47, %v820_v52  ;;  %v821_v57 = vmul.f32 0.2, %v805_v53 }
  0xfe   : > { %v834_v58 = vmax.f32 %v802_v50, %v818_v54  ;;  %v819_v59 = vmul.f32 0.2, %v803_v55  ;;  %v1204_v60 = vpop.f32.mrb[4].mxu0 }
  0xff   : > { %v1101_v61 = vpack.c.bf16 %v836_v56, %v836_v56  ;;  %v837_v62 = vmax.f32 %v805_v53, %v821_v57  ;;  %v1224_v63 = vadd.f32 %v1204_v60, %v1160_v37  ;;  %v732_v0 = vpop.f32.mrb[5].mxu0 }
 0x100   : > { %v1099_v1 = vpack.c.bf16 %v834_v58, %v834_v58  ;;  %v835_v2 = vmax.f32 %v803_v55, %v819_v59  ;;  %v1225_v3 = vadd.f32 %v732_v0, %v351_v38  ;;  %v1205_v4 = vpop.f32.mrb[6].mxu0 }
 0x101   : > { %917 = vst.msk [vmem:[%s1426_s16 + $0x8] sm:$0xf] %vm914_vm1, %v1101_v61  ;;  %v1102_v5 = vpack.c.bf16 %v837_v62, %v837_v62  ;;  %v808_v6 = vadd.f32 %v1224_v63, %v1416_v42  ;;  %v1226_v7 = vadd.f32 %v1205_v4, %v1161_v39  ;;  %v735_v8 = vpop.f32.mrb[7].mxu0 }
 0x102   : > { %915 = vst.msk [vmem:[%s1426_s16] sm:$0xf] %vm914_vm1, %v1099_v1  ;;  %v1100_v9 = vpack.c.bf16 %v835_v2, %v835_v2  ;;  %v806_v10 = vadd.f32 %v1225_v3, %v1416_v42  ;;  %v1227_v11 = vadd.f32 %v735_v8, %v354_v40 }
 0x103   : > { %918 = vst.msk [vmem:[%s1426_s16 + $0xc] sm:$0xf] %vm914_vm1, %v1102_v5  ;;  %v824_v12 = vmul.f32 0.2, %v808_v6  ;;  %v809_v13 = vadd.f32 %v1226_v7, %v1416_v42 }
 0x104   : > { %916 = vst.msk [vmem:[%s1426_s16 + $0x4] sm:$0xf] %vm914_vm1, %v1100_v9  ;;  %v822_v14 = vmul.f32 0.2, %v806_v10  ;;  %v807_v15 = vadd.f32 %v1227_v11, %v1416_v42 }
 0x105   : > { %v840_v16 = vmax.f32 %v808_v6, %v824_v12  ;;  %v825_v17 = vmul.f32 0.2, %v809_v13 }
 0x106   : > { %v1186_v18 = vpop.f32.mrb[8].mxu1  ;;  %v838_v19 = vmax.f32 %v806_v10, %v822_v14  ;;  %v823_v20 = vmul.f32 0.2, %v807_v15  ;;  %v1208_v21 = vpop.f32.mrb[8].mxu0 }
 0x107   : > { %v546_v22 = vpop.f32.mrb[9].mxu1  ;;  %v1105_v23 = vpack.c.bf16 %v840_v16, %v840_v16  ;;  %v841_v24 = vmax.f32 %v809_v13, %v825_v17  ;;  %v1228_v25 = vadd.f32 %v1208_v21, %v1186_v18  ;;  %v748_v26 = vpop.f32.mrb[9].mxu0 }
 0x108   : > { %v1187_v27 = vpop.f32.mrb[10].mxu1  ;;  %v1103_v28 = vpack.c.bf16 %v838_v19, %v838_v19  ;;  %v839_v29 = vmax.f32 %v807_v15, %v823_v20  ;;  %v1229_v30 = vadd.f32 %v748_v26, %v546_v22  ;;  %v1209_v31 = vpop.f32.mrb[10].mxu0 }
 0x109   : > { %v549_v32 = vpop.f32.mrb[11].mxu1  ;;  %921 = vst.msk [vmem:[%s1426_s16 + $0x18] sm:$0xf] %vm914_vm1, %v1105_v23  ;;  %v1106_v33 = vpack.c.bf16 %v841_v24, %v841_v24  ;;  %v812_v34 = vadd.f32 %v1228_v25, %v1416_v42  ;;  %v1230_v35 = vadd.f32 %v1209_v31, %v1187_v27  ;;  %v751_v36 = vpop.f32.mrb[11].mxu0 }
 0x10a   : > { %919 = vst.msk [vmem:[%s1426_s16 + $0x10] sm:$0xf] %vm914_vm1, %v1103_v28  ;;  %v1104_v37 = vpack.c.bf16 %v839_v29, %v839_v29  ;;  %v810_v38 = vadd.f32 %v1229_v30, %v1416_v42  ;;  %v1231_v39 = vadd.f32 %v751_v36, %v549_v32 }
 0x10b   : > { %922 = vst.msk [vmem:[%s1426_s16 + $0x1c] sm:$0xf] %vm914_vm1, %v1106_v33  ;;  %v828_v40 = vmul.f32 0.2, %v812_v34  ;;  %v813_v41 = vadd.f32 %v1230_v35, %v1416_v42 }
 0x10c   : > { %920 = vst.msk [vmem:[%s1426_s16 + $0x14] sm:$0xf] %vm914_vm1, %v1104_v37  ;;  %v826_v43 = vmul.f32 0.2, %v810_v38  ;;  %v811_v44 = vadd.f32 %v1231_v39, %v1416_v42 }
 0x10d   : > { %v844_v45 = vmax.f32 %v812_v34, %v828_v40  ;;  %v829_v46 = vmul.f32 0.2, %v813_v41 }
 0x10e   : > { %v1190_v47 = vpop.f32.mrb[12].mxu1  ;;  %v842_v48 = vmax.f32 %v810_v38, %v826_v43  ;;  %v827_v49 = vmul.f32 0.2, %v811_v44  ;;  %v1212_v50 = vpop.f32.mrb[12].mxu0 }
 0x10f   : > { %v562_v51 = vpop.f32.mrb[13].mxu1  ;;  %v1109_v52 = vpack.c.bf16 %v844_v45, %v844_v45  ;;  %v845_v53 = vmax.f32 %v813_v41, %v829_v46  ;;  %v1232_v54 = vadd.f32 %v1212_v50, %v1190_v47  ;;  %v764_v55 = vpop.f32.mrb[13].mxu0 }
 0x110   : > { %v1191_v56 = vpop.f32.mrb[14].mxu1  ;;  %v1107_v57 = vpack.c.bf16 %v842_v48, %v842_v48  ;;  %v843_v58 = vmax.f32 %v811_v44, %v827_v49  ;;  %v1233_v59 = vadd.f32 %v764_v55, %v562_v51  ;;  %v1213_v60 = vpop.f32.mrb[14].mxu0 }
 0x111   : > { %v565_v61 = vpop.f32.mrb[15].mxu1  ;;  %925 = vst.msk [vmem:[%s1426_s16 + $0x28] sm:$0xf] %vm914_vm1, %v1109_v52  ;;  %v1110_v62 = vpack.c.bf16 %v845_v53, %v845_v53  ;;  %v816_v63 = vadd.f32 %v1232_v54, %v1416_v42  ;;  %v1234_v0 = vadd.f32 %v1213_v60, %v1191_v56  ;;  %v767_v1 = vpop.f32.mrb[15].mxu0 }
 0x112   : > { %923 = vst.msk [vmem:[%s1426_s16 + $0x20] sm:$0xf] %vm914_vm1, %v1107_v57  ;;  %v1108_v2 = vpack.c.bf16 %v843_v58, %v843_v58  ;;  %v814_v3 = vadd.f32 %v1233_v59, %v1416_v42  ;;  %v1235_v4 = vadd.f32 %v767_v1, %v565_v61 }
 0x113   : > { %926 = vst.msk [vmem:[%s1426_s16 + $0x2c] sm:$0xf] %vm914_vm1, %v1110_v62  ;;  %v832_v5 = vmul.f32 0.2, %v816_v63  ;;  %v817_v6 = vadd.f32 %v1234_v0, %v1416_v42 }
 0x114   : > { %924 = vst.msk [vmem:[%s1426_s16 + $0x24] sm:$0xf] %vm914_vm1, %v1108_v2  ;;  %v830_v7 = vmul.f32 0.2, %v814_v3  ;;  %v815_v8 = vadd.f32 %v1235_v4, %v1416_v42 }
 0x115   : > { %v848_v9 = vmax.f32 %v816_v63, %v832_v5  ;;  %v833_v10 = vmul.f32 0.2, %v817_v6 }
 0x116   : > { %v846_v11 = vmax.f32 %v814_v3, %v830_v7  ;;  %v831_v12 = vmul.f32 0.2, %v815_v8 }
 0x117   : > { %v1113_v13 = vpack.c.bf16 %v848_v9, %v848_v9  ;;  %v849_v14 = vmax.f32 %v817_v6, %v833_v10 }
 0x118   : > { %v1111_v15 = vpack.c.bf16 %v846_v11, %v846_v11  ;;  %v847_v16 = vmax.f32 %v815_v8, %v831_v12 }
 0x119   : > { %929 = vst.msk [vmem:[%s1426_s16 + $0x38] sm:$0xf] %vm914_vm1, %v1113_v13  ;;  %v1114_v17 = vpack.c.bf16 %v849_v14, %v849_v14 }
 0x11a   : > { %927 = vst.msk [vmem:[%s1426_s16 + $0x30] sm:$0xf] %vm914_vm1, %v1111_v15  ;;  %v1112_v18 = vpack.c.bf16 %v847_v16, %v847_v16 }
 0x11b   : > { %930 = vst.msk [vmem:[%s1426_s16 + $0x3c] sm:$0xf] %vm914_vm1, %v1114_v17 }
 0x11c   : > { %928 = vst.msk [vmem:[%s1426_s16 + $0x34] sm:$0xf] %vm914_vm1, %v1112_v18 }
 0x11d PF: > { %s13_s12 = sadd.s32 1, %s1300_s12  }
 0x11e   : > { %p10_p4 = scmp.ge.s32.totalorder %s13_s12, 4  }
 0x120   :  { %12 = sbr.rel (!%p10_p4) target bundleno = 1 (0x1), region = 65 }

// kernel: _lambda_.7
= control target key start
LH: loop header
LB: loop body
LE: loop exit
PB: predicated region body
PF: predicated region fallthrough
CT: control target
= control target key end

     0   :  { %s1864_s12 = smov 0   ;;  %s2117_s0 = inlined_call_operand.vmem [shape: bf16[2,1,288,24], index: 0, kind: input, shape index: {}]   ;;  %s2118_s1 = inlined_call_operand.vmem [shape: bf16[3,24,16], index: 1, kind: input, shape index: {}]   ;;  %s2119_s2 = inlined_call_operand.vmem [shape: f32[1,16], index: 2, kind: input, shape index: {}]   ;;  %s2120_s3 = inlined_call_operand.vmem [shape: bf16[2,256,16], index: 3, kind: output, shape index: {}]  }
   0x1 LB: > { %s1385_s13 = sadd.s32 4294967295, %s1842_s12   ;;  %p1389_p0 = scmp.ge.s32.totalorder %s1842_s12, 1  ;;  %s1842_s12 = sphi %s1864_s12, %s13_s12  }
   0x2   : > { %p137_p1 = scmp.lt.s32.totalorder %s1842_s12, 3 }
   0x4   : > { %p138_p2 = pnand %p1389_p0, %p137_p1 }
   0x5   : > { %v1797_v0 = vld [vmem:[%s2118_s1 + $0xc] sm:$0xff] (!%p138_p2)   ;;  %vm351_vm0 = vcmask (!%p138_p2), 1043456   ;;  %v1798_v1 = vld [vmem:[%s2118_s1] sm:$0xff] (!%p138_p2)   ;;  %p161_p3 = scmp.lt.s32.totalorder (!%p138_p2), %s1385_s13, 1  ;;  %v1799_v2 = vld [vmem:[%s2118_s1 + $0x14] ss:$0 sps:$4 sm:$0xff] (!%p138_p2)  }
   0x6   : > { %141 = sbr.rel (%p138_p2) target bundleno = 333 (0x14d), region = 32  ;;  %1608 = vmatprep.subr.bf16.mxu1 (!%p138_p2), %v1797_v0  ;;  %1644 = vmatprep.subr.bf16.mxu0 (!%p138_p2), %v1798_v1  ;;  %v1800_v3 = vld [vmem:[%s2118_s1 + $0x8] ss:$0 sps:$4 sm:$0xff] (!%p138_p2)   ;;  %v353_v4 = vsel (!%p138_p2), %vm351_vm0, %v1799_v2, 0  ;;  %v1804_v6 = vld [vmem:[%s2118_s1 + $0x18] sm:$0xff] (!%p138_p2)   ;;  %vm302_vm1 = vcmask (!%p138_p2), 195584  }
   0x7   : > { %1609 = vmatpush3.bf16.msra.mxu1 (!%p138_p2), %v1797_v0  ;;  %1645 = vmatpush3.bf16.msra.mxu0 (!%p138_p2), %v1798_v1  ;;  %v534_v5 = vsel (!%p138_p2), %vm351_vm0, %v1800_v3, 0  ;;  %v1809_v8 = vld [vmem:[%s2118_s1 + $0x20] ss:$0 sps:$4 sm:$0xff] (!%p138_p2)   ;;  %vm1297_vm2 = vcmask (!%p138_p2), 125952  }
   0x8   : > { %1784 = vmatprep.subr.msk.bf16.mxu1 (!%p138_p2), %vm351_vm0, %v1799_v2  ;;  %1785 = vmatprep.subr.msk.bf16.mxu0 (!%p138_p2), %vm351_vm0, %v1800_v3  ;;  %v871_v12 = vsel (!%p138_p2), %vm351_vm0, %v1809_v8, 0  ;;  %v2003_v59 = vld [vmem:[%s2119_s2] ss:$0 sm:$0xff] (!%p138_p2) }
   0xb   : > { %1611 = vmatpush3.bf16.msra.mxu1 (!%p138_p2), %v353_v4  ;;  %1647 = vmatpush3.bf16.msra.mxu0 (!%p138_p2), %v534_v5 }
   0xc   : > { %1716 = vmatprep.subr.bf16.mxu1 (!%p138_p2), %v1798_v1  ;;  %1680 = vmatprep.subr.bf16.mxu0 (!%p138_p2), %v1804_v6 }
   0xd   : > { %s2122_s13 = smov (!%p161_p3, %s1385_s13), 1 }
   0xe   : > { %s1788_s22 = smul.u32 144, %s2122_s13  ;;  %s1521_s5 = sshll.u32 %s2122_s13, 7 }
   0xf   : > { %s2013_s8 = scalar_lea.vmem %s2120_s3, %s1521_s5 }
  0x10   : > { %s1897_s27 = scalar_lea.vmem %s2117_s0, %s1788_s22 }
  0x11   : > { %v1801_v7 = vld [vmem:[%s1897_s27 + $0x8] sm:$0xff]   ;;  %v1802_v9 = vld [vmem:[%s1897_s27] sm:$0xff]   ;;  %v1803_v10 = vld [vmem:[%s1897_s27 + $0x10] sm:$0xff]  }
  0x12   : > { %1612 = vmatprep.mubr.msk.bf16.mxu1 %vm302_vm1, %v1801_v7  ;;  %1648 = vmatprep.mubr.msk.bf16.mxu0 %vm302_vm1, %v1802_v9  ;;  %v1805_v11 = vld [vmem:[%s1897_s27 + $0x18] sm:$0xff]   ;;  %v1806_v13 = vld [vmem:[%s1897_s27 + $0x20] sm:$0xff]   ;;  %v1807_v14 = vld [vmem:[%s1897_s27 + $0x28] sm:$0xff]  }
  0x13   : > { %1613 = vmatmul.mubr.msk.bf16.vlgmr.msra.gmra.mrb[0].mxu1 %vm302_vm1, %v1803_v10  ;;  %1649 = vmatmul.mubr.msk.bf16.vlgmr.msra.gmra.mrb[0].mxu0 %vm302_vm1, %v1801_v7  ;;  %v1808_v15 = vld [vmem:[%s1897_s27 + $0x30] sm:$0xff]   ;;  %v1810_v16 = vld [vmem:[%s1897_s27 + $0x38] sm:$0xff]   ;;  %v1811_v17 = vld [vmem:[%s1897_s27 + $0x40] sm:$0xff]  }
  0x14   : > { %1718 = vmatpush3.bf16.msra.mxu1 %v1798_v1  ;;  %1681 = vmatpush3.bf16.msra.mxu0 %v1804_v6  ;;  %v1812_v18 = vld [vmem:[%s1897_s27 + $0x48] sm:$0xff]   ;;  %v1813_v19 = vld [vmem:[%s1897_s27 + $0x10] sm:$0xff]   ;;  %v1815_v21 = vld [vmem:[%s1897_s27 + $0x18] sm:$0xff]  }
  0x15   : > { %1616 = vmatprep.mubr.msk.bf16.mxu1 %vm302_vm1, %v1805_v11  ;;  %1652 = vmatprep.mubr.msk.bf16.mxu0 %vm302_vm1, %v1803_v10  ;;  %v1814_v20 = vld [vmem:[%s1897_s27 + $0x50] sm:$0xff]   ;;  %v1816_v22 = vld [vmem:[%s1897_s27 + $0x58] sm:$0xff]   ;;  %v1817_v23 = vld [vmem:[%s1897_s27 + $0x20] sm:$0xff]  }
  0x16   : > { %1787 = vmatprep.subr.msk.bf16.mxu0 %vm351_vm0, %v1809_v8  ;;  %1786 = vmatprep.subr.msk.bf16.mxu1 %vm351_vm0, %v1800_v3  ;;  %v1818_v24 = vld [vmem:[%s1897_s27 + $0x60] sm:$0xff]   ;;  %v1819_v25 = vld [vmem:[%s1897_s27 + $0x28] sm:$0xff]   ;;  %v1821_v27 = vld [vmem:[%s1897_s27 + $0x30] sm:$0xff]  }
  0x17   : > { %v1820_v26 = vld [vmem:[%s1897_s27 + $0x68] sm:$0xff]   ;;  %v1822_v28 = vld [vmem:[%s1897_s27 + $0x70] sm:$0xff]   ;;  %v1823_v29 = vld [vmem:[%s1897_s27 + $0x38] sm:$0xff]  }
  0x18   : > { %1683 = vmatpush3.bf16.msra.mxu0 %v871_v12  ;;  %1719 = vmatpush3.bf16.msra.mxu1 %v534_v5  ;;  %v1824_v30 = vld [vmem:[%s1897_s27 + $0x78] sm:$0xff]   ;;  %v1825_v31 = vld [vmem:[%s1897_s27 + $0x40] sm:$0xff]   ;;  %v1827_v33 = vld [vmem:[%s1897_s27 + $0x48] sm:$0xff]  }
  0x19   : > { %v1826_v32 = vld [vmem:[%s1897_s27 + $0x80] sm:$0xff]   ;;  %v1828_v34 = vld [vmem:[%s1897_s27 + $0x50] sm:$0xff]   ;;  %v1829_v35 = vld [vmem:[%s1897_s27 + $0x58] sm:$0xff]  }
  0x1a   : > { %v1830_v36 = vld [vmem:[%s1897_s27 + $0x60] sm:$0xff]   ;;  %v1831_v37 = vld [vmem:[%s1897_s27 + $0x68] sm:$0xff]   ;;  %v1832_v38 = vld [vmem:[%s1897_s27 + $0x70] sm:$0xff]  }
  0x1b   : > { %1617 = vmatmul.mubr.msk.bf16.gmra.mrb[4].mxu1 %vm302_vm1, %v1806_v13  ;;  %1653 = vmatmul.mubr.msk.bf16.gmra.mrb[4].mxu0 %vm302_vm1, %v1805_v11  ;;  %v1833_v39 = vld [vmem:[%s1897_s27 + $0x78] sm:$0xff]   ;;  %v1834_v40 = vld [vmem:[%s1897_s27 + $0x80] sm:$0xff]   ;;  %v1835_v41 = vld [vmem:[%s1897_s27 + $0x88] sm:$0xff]  }
  0x1c   : > { %1620 = vmatprep.mubr.msk.bf16.mxu1 %vm302_vm1, %v1807_v14  ;;  %1656 = vmatprep.mubr.msk.bf16.mxu0 %vm302_vm1, %v1806_v13 }
  0x23   : > { %1621 = vmatmul.mubr.msk.bf16.gmra.mrb[8].mxu1 %vm302_vm1, %v1808_v15  ;;  %1657 = vmatmul.mubr.msk.bf16.gmra.mrb[8].mxu0 %vm302_vm1, %v1807_v14 }
  0x24   : > { %1624 = vmatprep.mubr.msk.bf16.mxu1 %vm302_vm1, %v1810_v16  ;;  %1660 = vmatprep.mubr.msk.bf16.mxu0 %vm302_vm1, %v1808_v15 }
  0x2b   : > { %1625 = vmatmul.mubr.msk.bf16.gmra.mrb[12].mxu1 %vm302_vm1, %v1811_v17  ;;  %1661 = vmatmul.mubr.msk.bf16.gmra.mrb[12].mxu0 %vm302_vm1, %v1810_v16 }
  0x2c   : > { %1628 = vmatprep.mubr.msk.bf16.mxu1 %vm302_vm1, %v1812_v18  ;;  %1684 = vmatprep.mubr.msk.bf16.mxu0 %vm302_vm1, %v1813_v19 }
  0x33   : > { %1629 = vmatmul.mubr.msk.bf16.gmra.mrb[16].mxu1 %vm302_vm1, %v1814_v20  ;;  %1685 = vmatmul.mubr.msk.bf16.vlgmr.msra.gmra.mrb[0].mxu0 %vm302_vm1, %v1815_v21 }
  0x34   : > { %1632 = vmatprep.mubr.msk.bf16.mxu1 %vm302_vm1, %v1816_v22  ;;  %1688 = vmatprep.mubr.msk.bf16.mxu0 %vm302_vm1, %v1817_v23 }
  0x3b   : > { %1633 = vmatmul.mubr.msk.bf16.gmra.mrb[20].mxu1 %vm302_vm1, %v1818_v24  ;;  %1689 = vmatmul.mubr.msk.bf16.gmra.mrb[4].mxu0 %vm302_vm1, %v1819_v25 }
  0x3c   : > { %1636 = vmatprep.mubr.msk.bf16.mxu1 %vm302_vm1, %v1820_v26  ;;  %1692 = vmatprep.mubr.msk.bf16.mxu0 %vm302_vm1, %v1821_v27 }
  0x43   : > { %1637 = vmatmul.mubr.msk.bf16.gmra.mrb[24].mxu1 %vm302_vm1, %v1822_v28  ;;  %1693 = vmatmul.mubr.msk.bf16.gmra.mrb[8].mxu0 %vm302_vm1, %v1823_v29 }
  0x44   : > { %1640 = vmatprep.mubr.msk.bf16.mxu1 %vm302_vm1, %v1824_v30  ;;  %1696 = vmatprep.mubr.msk.bf16.mxu0 %vm302_vm1, %v1825_v31 }
  0x4b   : > { %1641 = vmatmul.mubr.msk.bf16.gmra.mrb[28].mxu1 %vm302_vm1, %v1826_v32  ;;  %1697 = vmatmul.mubr.msk.bf16.gmra.mrb[12].mxu0 %vm302_vm1, %v1827_v33 }
  0x4c   : > { %1664 = vmatprep.mubr.msk.bf16.mxu1 %vm302_vm1, %v1811_v17  ;;  %1700 = vmatprep.mubr.msk.bf16.mxu0 %vm302_vm1, %v1828_v34 }
  0x53   : > { %1665 = vmatmul.mubr.msk.bf16.vlgmr.msra.gmra.mrb[16].mxu1 %vm302_vm1, %v1812_v18  ;;  %1701 = vmatmul.mubr.msk.bf16.gmra.mrb[16].mxu0 %vm302_vm1, %v1829_v35 }
  0x54   : > { %1668 = vmatprep.mubr.msk.bf16.mxu1 %vm302_vm1, %v1814_v20  ;;  %1704 = vmatprep.mubr.msk.bf16.mxu0 %vm302_vm1, %v1830_v36 }
  0x5b   : > { %1669 = vmatmul.mubr.msk.bf16.gmra.mrb[20].mxu1 %vm302_vm1, %v1816_v22  ;;  %1705 = vmatmul.mubr.msk.bf16.gmra.mrb[20].mxu0 %vm302_vm1, %v1831_v37 }
  0x5c   : > { %1672 = vmatprep.mubr.msk.bf16.mxu1 %vm302_vm1, %v1818_v24  ;;  %1708 = vmatprep.mubr.msk.bf16.mxu0 %vm302_vm1, %v1832_v38 }
  0x63   : > { %1673 = vmatmul.mubr.msk.bf16.gmra.mrb[24].mxu1 %vm302_vm1, %v1820_v26  ;;  %1709 = vmatmul.mubr.msk.bf16.gmra.mrb[24].mxu0 %vm302_vm1, %v1833_v39 }
  0x64   : > { %1676 = vmatprep.mubr.msk.bf16.mxu1 %vm302_vm1, %v1822_v28  ;;  %1712 = vmatprep.mubr.msk.bf16.mxu0 %vm302_vm1, %v1834_v40 }
  0x6b   : > { %1677 = vmatmul.mubr.msk.bf16.gmra.mrb[28].mxu1 %vm302_vm1, %v1824_v30  ;;  %1713 = vmatmul.mubr.msk.bf16.gmra.mrb[28].mxu0 %vm302_vm1, %v1835_v41 }
  0xe6   : > { %v1614_v42 = vpop.f32.mrb[0].mxu1 }
  0xe7   : > { %v389_v43 = vpop.f32.mrb[1].mxu1 }
  0xe8   : > { %v1615_v44 = vpop.f32.mrb[2].mxu1 }
  0xe9   : > { %v392_v45 = vpop.f32.mrb[3].mxu1 }
  0xee   : > { %v1618_v46 = vpop.f32.mrb[4].mxu1 }
  0xef   : > { %v405_v47 = vpop.f32.mrb[5].mxu1 }
  0xf0   : > { %v1619_v48 = vpop.f32.mrb[6].mxu1 }
  0xf1   : > { %v408_v49 = vpop.f32.mrb[7].mxu1 }
  0xf6   : > { %v1622_v50 = vpop.f32.mrb[8].mxu1 }
  0xf7   : > { %v1986_v51 = vpop.f32.mrb[9].mxu1 }
  0xf8   : > { %v1988_v52 = vpop.f32.mrb[10].mxu1 }
  0xf9   : > { %v1990_v53 = vpop.f32.mrb[11].mxu1 }
  0xfe   : > { %v1992_v54 = vpop.f32.mrb[12].mxu1 }
  0xff   : > { %v1994_v55 = vpop.f32.mrb[13].mxu1 }
 0x100   : > { %v1996_v56 = vpop.f32.mrb[14].mxu1 }
 0x101   : > { %v1998_v57 = vpop.f32.mrb[15].mxu1 }
 0x106   : > { %v1686_v58 = vpop.f32.mrb[0].mxu0 }
 0x107   : > { %v1720_v60 = vadd.f32 %v1686_v58, %v1614_v42  ;;  %v907_v61 = vpop.f32.mrb[1].mxu0 }
 0x108   : > { %v1721_v62 = vadd.f32 %v907_v61, %v389_v43  ;;  %v1687_v63 = vpop.f32.mrb[2].mxu0 }
 0x109   : > { %v1075_v0 = vadd.f32 %v1720_v60, %v2003_v59  ;;  %v1722_v1 = vadd.f32 %v1687_v63, %v1615_v44  ;;  %v910_v2 = vpop.f32.mrb[3].mxu0 }
 0x10a   : > { %v1073_v3 = vadd.f32 %v1721_v62, %v2003_v59  ;;  %v1723_v4 = vadd.f32 %v910_v2, %v392_v45 }
 0x10b   : > { %v1107_v5 = vmul.f32 0.2, %v1075_v0  ;;  %v1076_v6 = vadd.f32 %v1722_v1, %v2003_v59 }
 0x10c   : > { %v1105_v7 = vmul.f32 0.2, %v1073_v3  ;;  %v1074_v8 = vadd.f32 %v1723_v4, %v2003_v59 }
 0x10d   : > { %v1139_v9 = vmax.f32 %v1075_v0, %v1107_v5  ;;  %v1108_v10 = vmul.f32 0.2, %v1076_v6 }
 0x10e   : > { %v1137_v11 = vmax.f32 %v1073_v3, %v1105_v7  ;;  %v1106_v12 = vmul.f32 0.2, %v1074_v8  ;;  %v1690_v13 = vpop.f32.mrb[4].mxu0 }
 0x10f   : > { %v1524_v14 = vpack.c.bf16 %v1139_v9, %v1139_v9  ;;  %v1140_v15 = vmax.f32 %v1076_v6, %v1108_v10  ;;  %v1724_v16 = vadd.f32 %v1690_v13, %v1618_v46  ;;  %v923_v17 = vpop.f32.mrb[5].mxu0 }
 0x110   : > { %v1522_v18 = vpack.c.bf16 %v1137_v11, %v1137_v11  ;;  %v1138_v19 = vmax.f32 %v1074_v8, %v1106_v12  ;;  %v1725_v20 = vadd.f32 %v923_v17, %v405_v47  ;;  %v1691_v21 = vpop.f32.mrb[6].mxu0 }
 0x111   : > { %1300 = vst.msk [vmem:[%s2013_s8 + $0x8] sm:$0xf] %vm1297_vm2, %v1524_v14  ;;  %v1525_v22 = vpack.c.bf16 %v1140_v15, %v1140_v15  ;;  %v1079_v23 = vadd.f32 %v1724_v16, %v2003_v59  ;;  %v1726_v24 = vadd.f32 %v1691_v21, %v1619_v48  ;;  %v926_v25 = vpop.f32.mrb[7].mxu0 }
 0x112   : > { %1298 = vst.msk [vmem:[%s2013_s8] sm:$0xf] %vm1297_vm2, %v1522_v18  ;;  %v1523_v26 = vpack.c.bf16 %v1138_v19, %v1138_v19  ;;  %v1077_v27 = vadd.f32 %v1725_v20, %v2003_v59  ;;  %v1727_v28 = vadd.f32 %v926_v25, %v408_v49 }
 0x113   : > { %1301 = vst.msk [vmem:[%s2013_s8 + $0xc] sm:$0xf] %vm1297_vm2, %v1525_v22  ;;  %v1111_v29 = vmul.f32 0.2, %v1079_v23  ;;  %v1080_v30 = vadd.f32 %v1726_v24, %v2003_v59 }
 0x114   : > { %1299 = vst.msk [vmem:[%s2013_s8 + $0x4] sm:$0xf] %vm1297_vm2, %v1523_v26  ;;  %v1109_v31 = vmul.f32 0.2, %v1077_v27  ;;  %v1078_v32 = vadd.f32 %v1727_v28, %v2003_v59 }
 0x115   : > { %v1143_v33 = vmax.f32 %v1079_v23, %v1111_v29  ;;  %v1112_v34 = vmul.f32 0.2, %v1080_v30 }
 0x116   : > { %v1141_v35 = vmax.f32 %v1077_v27, %v1109_v31  ;;  %v1110_v36 = vmul.f32 0.2, %v1078_v32  ;;  %v1694_v37 = vpop.f32.mrb[8].mxu0 }
 0x117   : > { %v1528_v38 = vpack.c.bf16 %v1143_v33, %v1143_v33  ;;  %v1144_v39 = vmax.f32 %v1080_v30, %v1112_v34  ;;  %v1728_v40 = vadd.f32 %v1694_v37, %v1622_v50  ;;  %v939_v41 = vpop.f32.mrb[9].mxu0 }
 0x118   : > { %v1526_v42 = vpack.c.bf16 %v1141_v35, %v1141_v35  ;;  %v1142_v43 = vmax.f32 %v1078_v32, %v1110_v36  ;;  %v1729_v44 = vadd.f32 %v939_v41, %v1986_v51  ;;  %v1695_v45 = vpop.f32.mrb[10].mxu0 }
 0x119   : > { %1304 = vst.msk [vmem:[%s2013_s8 + $0x18] sm:$0xf] %vm1297_vm2, %v1528_v38  ;;  %v1529_v46 = vpack.c.bf16 %v1144_v39, %v1144_v39  ;;  %v1083_v47 = vadd.f32 %v1728_v40, %v2003_v59  ;;  %v1730_v48 = vadd.f32 %v1695_v45, %v1988_v52  ;;  %v942_v49 = vpop.f32.mrb[11].mxu0 }
 0x11a   : > { %1302 = vst.msk [vmem:[%s2013_s8 + $0x10] sm:$0xf] %vm1297_vm2, %v1526_v42  ;;  %v1527_v58 = vpack.c.bf16 %v1142_v43, %v1142_v43  ;;  %v1081_v50 = vadd.f32 %v1729_v44, %v2003_v59  ;;  %v1731_v60 = vadd.f32 %v942_v49, %v1990_v53 }
 0x11b   : > { %1305 = vst.msk [vmem:[%s2013_s8 + $0x1c] sm:$0xf] %vm1297_vm2, %v1529_v46  ;;  %v1115_v61 = vmul.f32 0.2, %v1083_v47  ;;  %v1084_v51 = vadd.f32 %v1730_v48, %v2003_v59 }
 0x11c   : > { %1303 = vst.msk [vmem:[%s2013_s8 + $0x14] sm:$0xf] %vm1297_vm2, %v1527_v58  ;;  %v1113_v62 = vmul.f32 0.2, %v1081_v50  ;;  %v1082_v63 = vadd.f32 %v1731_v60, %v2003_v59 }
 0x11d   : > { %v1147_v52 = vmax.f32 %v1083_v47, %v1115_v61  ;;  %v1116_v0 = vmul.f32 0.2, %v1084_v51 }
 0x11e   : > { %v1145_v1 = vmax.f32 %v1081_v50, %v1113_v62  ;;  %v1114_v2 = vmul.f32 0.2, %v1082_v63  ;;  %v1698_v3 = vpop.f32.mrb[12].mxu0 }
 0x11f   : > { %v1532_v4 = vpack.c.bf16 %v1147_v52, %v1147_v52  ;;  %v1148_v5 = vmax.f32 %v1084_v51, %v1116_v0  ;;  %v1732_v53 = vadd.f32 %v1698_v3, %v1992_v54  ;;  %v955_v6 = vpop.f32.mrb[13].mxu0 }
 0x120   : > { %v1530_v7 = vpack.c.bf16 %v1145_v1, %v1145_v1  ;;  %v1146_v8 = vmax.f32 %v1082_v63, %v1114_v2  ;;  %v1733_v9 = vadd.f32 %v955_v6, %v1994_v55  ;;  %v1699_v10 = vpop.f32.mrb[14].mxu0 }
 0x121   : > { %1308 = vst.msk [vmem:[%s2013_s8 + $0x28] sm:$0xf] %vm1297_vm2, %v1532_v4  ;;  %v1533_v11 = vpack.c.bf16 %v1148_v5, %v1148_v5  ;;  %v1087_v12 = vadd.f32 %v1732_v53, %v2003_v59  ;;  %v1734_v13 = vadd.f32 %v1699_v10, %v1996_v56  ;;  %v958_v14 = vpop.f32.mrb[15].mxu0 }
 0x122   : > { %1306 = vst.msk [vmem:[%s2013_s8 + $0x20] sm:$0xf] %vm1297_vm2, %v1530_v7  ;;  %v1531_v15 = vpack.c.bf16 %v1146_v8, %v1146_v8  ;;  %v1085_v54 = vadd.f32 %v1733_v9, %v2003_v59  ;;  %v1735_v16 = vadd.f32 %v958_v14, %v1998_v57 }
 0x123   : > { %1309 = vst.msk [vmem:[%s2013_s8 + $0x2c] sm:$0xf] %vm1297_vm2, %v1533_v11  ;;  %v1119_v17 = vmul.f32 0.2, %v1087_v12  ;;  %v1088_v55 = vadd.f32 %v1734_v13, %v2003_v59 }
 0x124   : > { %1307 = vst.msk [vmem:[%s2013_s8 + $0x24] sm:$0xf] %vm1297_vm2, %v1531_v15  ;;  %v1117_v18 = vmul.f32 0.2, %v1085_v54  ;;  %v1086_v19 = vadd.f32 %v1735_v16, %v2003_v59 }
 0x125   : > { %v1151_v20 = vmax.f32 %v1087_v12, %v1119_v17  ;;  %v1120_v56 = vmul.f32 0.2, %v1088_v55 }
 0x126   : > { %v1149_v21 = vmax.f32 %v1085_v54, %v1117_v18  ;;  %v1118_v22 = vmul.f32 0.2, %v1086_v19  ;;  %v1666_v23 = vpop.f32.mrb[16].mxu1  ;;  %v1702_v24 = vpop.f32.mrb[16].mxu0 }
 0x127   : > { %v1536_v25 = vpack.c.bf16 %v1151_v20, %v1151_v20  ;;  %v1152_v57 = vmax.f32 %v1088_v55, %v1120_v56  ;;  %v1736_v26 = vadd.f32 %v1702_v24, %v1666_v23  ;;  %v634_v27 = vpop.f32.mrb[17].mxu1  ;;  %v971_v28 = vpop.f32.mrb[17].mxu0 }
 0x128   : > { %v1534_v29 = vpack.c.bf16 %v1149_v21, %v1149_v21  ;;  %v1150_v30 = vmax.f32 %v1086_v19, %v1118_v22  ;;  %v1737_v31 = vadd.f32 %v971_v28, %v634_v27  ;;  %v1667_v32 = vpop.f32.mrb[18].mxu1  ;;  %v1703_v33 = vpop.f32.mrb[18].mxu0 }
 0x129   : > { %1312 = vst.msk [vmem:[%s2013_s8 + $0x38] sm:$0xf] %vm1297_vm2, %v1536_v25  ;;  %v1537_v34 = vpack.c.bf16 %v1152_v57, %v1152_v57  ;;  %v1091_v35 = vadd.f32 %v1736_v26, %v2003_v59  ;;  %v1738_v36 = vadd.f32 %v1703_v33, %v1667_v32  ;;  %v637_v37 = vpop.f32.mrb[19].mxu1  ;;  %v974_v38 = vpop.f32.mrb[19].mxu0 }
 0x12a   : > { %1310 = vst.msk [vmem:[%s2013_s8 + $0x30] sm:$0xf] %vm1297_vm2, %v1534_v29  ;;  %v1535_v39 = vpack.c.bf16 %v1150_v30, %v1150_v30  ;;  %v1089_v40 = vadd.f32 %v1737_v31, %v2003_v59  ;;  %v1739_v41 = vadd.f32 %v974_v38, %v637_v37 }
 0x12b   : > { %1313 = vst.msk [vmem:[%s2013_s8 + $0x3c] sm:$0xf] %vm1297_vm2, %v1537_v34  ;;  %v1123_v42 = vmul.f32 0.2, %v1091_v35  ;;  %v1092_v43 = vadd.f32 %v1738_v36, %v2003_v59 }
 0x12c   : > { %1311 = vst.msk [vmem:[%s2013_s8 + $0x34] sm:$0xf] %vm1297_vm2, %v1535_v39  ;;  %v1121_v44 = vmul.f32 0.2, %v1089_v40  ;;  %v1090_v45 = vadd.f32 %v1739_v41, %v2003_v59 }
 0x12d   : > { %v1155_v46 = vmax.f32 %v1091_v35, %v1123_v42  ;;  %v1124_v47 = vmul.f32 0.2, %v1092_v43 }
 0x12e   : > { %v1153_v48 = vmax.f32 %v1089_v40, %v1121_v44  ;;  %v1122_v49 = vmul.f32 0.2, %v1090_v45  ;;  %v1670_v58 = vpop.f32.mrb[20].mxu1  ;;  %v1706_v50 = vpop.f32.mrb[20].mxu0 }
 0x12f   : > { %v1540_v60 = vpack.c.bf16 %v1155_v46, %v1155_v46  ;;  %v1156_v61 = vmax.f32 %v1092_v43, %v1124_v47  ;;  %v1740_v51 = vadd.f32 %v1706_v50, %v1670_v58  ;;  %v650_v62 = vpop.f32.mrb[21].mxu1  ;;  %v987_v63 = vpop.f32.mrb[21].mxu0 }
 0x130   : > { %v1538_v52 = vpack.c.bf16 %v1153_v48, %v1153_v48  ;;  %v1154_v0 = vmax.f32 %v1090_v45, %v1122_v49  ;;  %v1741_v1 = vadd.f32 %v987_v63, %v650_v62  ;;  %v1671_v2 = vpop.f32.mrb[22].mxu1  ;;  %v1707_v3 = vpop.f32.mrb[22].mxu0 }
 0x131   : > { %1316 = vst.msk [vmem:[%s2013_s8 + $0x48] sm:$0xf] %vm1297_vm2, %v1540_v60  ;;  %v1541_v4 = vpack.c.bf16 %v1156_v61, %v1156_v61  ;;  %v1095_v5 = vadd.f32 %v1740_v51, %v2003_v59  ;;  %v1742_v53 = vadd.f32 %v1707_v3, %v1671_v2  ;;  %v653_v6 = vpop.f32.mrb[23].mxu1  ;;  %v990_v7 = vpop.f32.mrb[23].mxu0 }
 0x132   : > { %1314 = vst.msk [vmem:[%s2013_s8 + $0x40] sm:$0xf] %vm1297_vm2, %v1538_v52  ;;  %v1539_v8 = vpack.c.bf16 %v1154_v0, %v1154_v0  ;;  %v1093_v9 = vadd.f32 %v1741_v1, %v2003_v59  ;;  %v1743_v10 = vadd.f32 %v990_v7, %v653_v6 }
 0x133   : > { %1317 = vst.msk [vmem:[%s2013_s8 + $0x4c] sm:$0xf] %vm1297_vm2, %v1541_v4  ;;  %v1127_v11 = vmul.f32 0.2, %v1095_v5  ;;  %v1096_v12 = vadd.f32 %v1742_v53, %v2003_v59 }
 0x134   : > { %1315 = vst.msk [vmem:[%s2013_s8 + $0x44] sm:$0xf] %vm1297_vm2, %v1539_v8  ;;  %v1125_v13 = vmul.f32 0.2, %v1093_v9  ;;  %v1094_v14 = vadd.f32 %v1743_v10, %v2003_v59 }
 0x135   : > { %v1159_v15 = vmax.f32 %v1095_v5, %v1127_v11  ;;  %v1128_v54 = vmul.f32 0.2, %v1096_v12 }
 0x136   : > { %v1157_v16 = vmax.f32 %v1093_v9, %v1125_v13  ;;  %v1126_v17 = vmul.f32 0.2, %v1094_v14  ;;  %v1674_v55 = vpop.f32.mrb[24].mxu1  ;;  %v1710_v18 = vpop.f32.mrb[24].mxu0 }
 0x137   : > { %v1544_v19 = vpack.c.bf16 %v1159_v15, %v1159_v15  ;;  %v1160_v20 = vmax.f32 %v1096_v12, %v1128_v54  ;;  %v1744_v56 = vadd.f32 %v1710_v18, %v1674_v55  ;;  %v666_v21 = vpop.f32.mrb[25].mxu1  ;;  %v1003_v22 = vpop.f32.mrb[25].mxu0 }
 0x138   : > { %v1542_v23 = vpack.c.bf16 %v1157_v16, %v1157_v16  ;;  %v1158_v24 = vmax.f32 %v1094_v14, %v1126_v17  ;;  %v1745_v25 = vadd.f32 %v1003_v22, %v666_v21  ;;  %v1675_v57 = vpop.f32.mrb[26].mxu1  ;;  %v1711_v26 = vpop.f32.mrb[26].mxu0 }
 0x139   : > { %1320 = vst.msk [vmem:[%s2013_s8 + $0x58] sm:$0xf] %vm1297_vm2, %v1544_v19  ;;  %v1545_v27 = vpack.c.bf16 %v1160_v20, %v1160_v20  ;;  %v1099_v28 = vadd.f32 %v1744_v56, %v2003_v59  ;;  %v1746_v29 = vadd.f32 %v1711_v26, %v1675_v57  ;;  %v669_v30 = vpop.f32.mrb[27].mxu1  ;;  %v1006_v31 = vpop.f32.mrb[27].mxu0 }
 0x13a   : > { %1318 = vst.msk [vmem:[%s2013_s8 + $0x50] sm:$0xf] %vm1297_vm2, %v1542_v23  ;;  %v1543_v32 = vpack.c.bf16 %v1158_v24, %v1158_v24  ;;  %v1097_v33 = vadd.f32 %v1745_v25, %v2003_v59  ;;  %v1747_v34 = vadd.f32 %v1006_v31, %v669_v30 }
 0x13b   : > { %1321 = vst.msk [vmem:[%s2013_s8 + $0x5c] sm:$0xf] %vm1297_vm2, %v1545_v27  ;;  %v1131_v35 = vmul.f32 0.2, %v1099_v28  ;;  %v1100_v36 = vadd.f32 %v1746_v29, %v2003_v59 }
 0x13c   : > { %1319 = vst.msk [vmem:[%s2013_s8 + $0x54] sm:$0xf] %vm1297_vm2, %v1543_v32  ;;  %v1129_v37 = vmul.f32 0.2, %v1097_v33  ;;  %v1098_v38 = vadd.f32 %v1747_v34, %v2003_v59 }
 0x13d   : > { %v1163_v39 = vmax.f32 %v1099_v28, %v1131_v35  ;;  %v1132_v40 = vmul.f32 0.2, %v1100_v36 }
 0x13e   : > { %v1161_v41 = vmax.f32 %v1097_v33, %v1129_v37  ;;  %v1130_v42 = vmul.f32 0.2, %v1098_v38  ;;  %v1678_v43 = vpop.f32.mrb[28].mxu1  ;;  %v1714_v44 = vpop.f32.mrb[28].mxu0 }
 0x13f   : > { %v1548_v45 = vpack.c.bf16 %v1163_v39, %v1163_v39  ;;  %v1164_v46 = vmax.f32 %v1100_v36, %v1132_v40  ;;  %v1748_v47 = vadd.f32 %v1714_v44, %v1678_v43  ;;  %v682_v48 = vpop.f32.mrb[29].mxu1  ;;  %v1019_v49 = vpop.f32.mrb[29].mxu0 }
 0x140   : > { %v1546_v58 = vpack.c.bf16 %v1161_v41, %v1161_v41  ;;  %v1162_v50 = vmax.f32 %v1098_v38, %v1130_v42  ;;  %v1749_v60 = vadd.f32 %v1019_v49, %v682_v48  ;;  %v1679_v61 = vpop.f32.mrb[30].mxu1  ;;  %v1715_v51 = vpop.f32.mrb[30].mxu0 }
 0x141   : > { %1324 = vst.msk [vmem:[%s2013_s8 + $0x68] sm:$0xf] %vm1297_vm2, %v1548_v45  ;;  %v1549_v62 = vpack.c.bf16 %v1164_v46, %v1164_v46  ;;  %v1103_v63 = vadd.f32 %v1748_v47, %v2003_v59  ;;  %v1750_v52 = vadd.f32 %v1715_v51, %v1679_v61  ;;  %v685_v0 = vpop.f32.mrb[31].mxu1  ;;  %v1022_v1 = vpop.f32.mrb[31].mxu0 }
 0x142   : > { %1322 = vst.msk [vmem:[%s2013_s8 + $0x60] sm:$0xf] %vm1297_vm2, %v1546_v58  ;;  %v1547_v2 = vpack.c.bf16 %v1162_v50, %v1162_v50  ;;  %v1101_v3 = vadd.f32 %v1749_v60, %v2003_v59  ;;  %v1751_v4 = vadd.f32 %v1022_v1, %v685_v0 }
 0x143   : > { %1325 = vst.msk [vmem:[%s2013_s8 + $0x6c] sm:$0xf] %vm1297_vm2, %v1549_v62  ;;  %v1135_v5 = vmul.f32 0.2, %v1103_v63  ;;  %v1104_v53 = vadd.f32 %v1750_v52, %v2003_v59 }
 0x144   : > { %1323 = vst.msk [vmem:[%s2013_s8 + $0x64] sm:$0xf] %vm1297_vm2, %v1547_v2  ;;  %v1133_v6 = vmul.f32 0.2, %v1101_v3  ;;  %v1102_v7 = vadd.f32 %v1751_v4, %v2003_v59 }
 0x145   : > { %v1167_v8 = vmax.f32 %v1103_v63, %v1135_v5  ;;  %v1136_v9 = vmul.f32 0.2, %v1104_v53 }
 0x146   : > { %v1165_v10 = vmax.f32 %v1101_v3, %v1133_v6  ;;  %v1134_v11 = vmul.f32 0.2, %v1102_v7 }
 0x147   : > { %v1552_v12 = vpack.c.bf16 %v1167_v8, %v1167_v8  ;;  %v1168_v13 = vmax.f32 %v1104_v53, %v1136_v9 }
 0x148   : > { %v1550_v14 = vpack.c.bf16 %v1165_v10, %v1165_v10  ;;  %v1166_v15 = vmax.f32 %v1102_v7, %v1134_v11 }
 0x149   : > { %1328 = vst.msk [vmem:[%s2013_s8 + $0x78] sm:$0xf] %vm1297_vm2, %v1552_v12  ;;  %v1553_v54 = vpack.c.bf16 %v1168_v13, %v1168_v13 }
 0x14a   : > { %1326 = vst.msk [vmem:[%s2013_s8 + $0x70] sm:$0xf] %vm1297_vm2, %v1550_v14  ;;  %v1551_v16 = vpack.c.bf16 %v1166_v15, %v1166_v15 }
 0x14b   : > { %1329 = vst.msk [vmem:[%s2013_s8 + $0x7c] sm:$0xf] %vm1297_vm2, %v1553_v54 }
 0x14c   : > { %1327 = vst.msk [vmem:[%s2013_s8 + $0x74] sm:$0xf] %vm1297_vm2, %v1551_v16 }
 0x14d PF: > { %s13_s12 = sadd.s32 1, %s1842_s12  }
 0x14e   : > { %p10_p4 = scmp.ge.s32.totalorder %s13_s12, 4  }
 0x150   :  { %12 = sbr.rel (!%p10_p4) target bundleno = 1 (0x1), region = 64 }

// kernel: _lambda_.9
= control target key start
LH: loop header
LB: loop body
LE: loop exit
PB: predicated region body
PF: predicated region fallthrough
CT: control target
= control target key end

     0   :  { %s1356_s12 = smov 0   ;;  %s1553_s0 = inlined_call_operand.vmem [shape: bf16[2,1,160,96], index: 0, kind: input, shape index: {}]   ;;  %s1554_s1 = inlined_call_operand.vmem [shape: bf16[3,96,32], index: 1, kind: input, shape index: {}]   ;;  %s1555_s2 = inlined_call_operand.vmem [shape: f32[1,32], index: 2, kind: input, shape index: {}]   ;;  %s1556_s3 = inlined_call_operand.vmem [shape: bf16[2,128,32], index: 3, kind: output, shape index: {}]  }
   0x1 LB: > { %s987_s13 = sadd.s32 4294967295, %s1334_s12   ;;  %p991_p0 = scmp.ge.s32.totalorder %s1334_s12, 1  ;;  %s1334_s12 = sphi %s1356_s12, %s13_s12  }
   0x2   : > { %p137_p1 = scmp.lt.s32.totalorder %s1334_s12, 3 }
   0x4   : > { %p138_p2 = pnand %p991_p0, %p137_p1 }
   0x5   : > { %v1293_v0 = vld [vmem:[%s1554_s1 + $0x30] sm:$0xff] (!%p138_p2)   ;;  %p161_p3 = scmp.lt.s32.totalorder (!%p138_p2), %s987_s13, 1  ;;  %v1294_v1 = vld [vmem:[%s1554_s1] sm:$0xff] (!%p138_p2)   ;;  %v1295_v2 = vld [vmem:[%s1554_s1 + $0x38] sm:$0xff] (!%p138_p2)   ;;  %vm291_vm0 = vcmask (!%p138_p2), 785408   ;;  %vm915_vm1 = vcmask (!%p138_p2), 257024  }
   0x6   : > { %141 = sbr.rel (%p138_p2) target bundleno = 300 (0x12c), region = 32  ;;  %1156 = vmatprep.subr.bf16.mxu1 (!%p138_p2), %v1293_v0  ;;  %1184 = vmatprep.subr.bf16.mxu0 (!%p138_p2), %v1294_v1  ;;  %v1296_v3 = vld [vmem:[%s1554_s1 + $0x8] sm:$0xff] (!%p138_p2)   ;;  %v1297_v4 = vld [vmem:[%s1554_s1 + $0x40] sm:$0xff] (!%p138_p2)   ;;  %v1298_v5 = vld [vmem:[%s1554_s1 + $0x10] sm:$0xff] (!%p138_p2)  }
   0x7   : > { %1157 = vmatpush3.bf16.msra.mxu1 (!%p138_p2), %v1293_v0  ;;  %1185 = vmatpush3.bf16.msra.mxu0 (!%p138_p2), %v1294_v1  ;;  %v1299_v6 = vld [vmem:[%s1554_s1 + $0x48] sm:$0xff] (!%p138_p2)   ;;  %v1300_v7 = vld [vmem:[%s1554_s1 + $0x18] sm:$0xff] (!%p138_p2)   ;;  %v1301_v8 = vld [vmem:[%s1554_s1 + $0x50] sm:$0xff] (!%p138_p2)  }
   0x8   : > { %1158 = vmatprep.subr.bf16.mxu1 (!%p138_p2), %v1295_v2  ;;  %1186 = vmatprep.subr.bf16.mxu0 (!%p138_p2), %v1296_v3  ;;  %v1302_v9 = vld [vmem:[%s1554_s1 + $0x20] sm:$0xff] (!%p138_p2)   ;;  %v1303_v12 = vld [vmem:[%s1554_s1 + $0x58] sm:$0xff] (!%p138_p2)   ;;  %v1304_v13 = vld [vmem:[%s1554_s1 + $0x28] sm:$0xff] (!%p138_p2)  }
   0x9   : > { %v1308_v14 = vld [vmem:[%s1554_s1 + $0x60] sm:$0xff] (!%p138_p2)   ;;  %v1309_v16 = vld [vmem:[%s1554_s1 + $0x68] sm:$0xff] (!%p138_p2)   ;;  %v1312_v18 = vld [vmem:[%s1554_s1 + $0x70] sm:$0xff] (!%p138_p2)  }
   0xa   : > { %v1315_v21 = vld [vmem:[%s1554_s1 + $0x78] sm:$0xff] (!%p138_p2)   ;;  %v1316_v22 = vld [vmem:[%s1554_s1 + $0x80] sm:$0xff] (!%p138_p2)   ;;  %v1319_v25 = vld [vmem:[%s1554_s1 + $0x88] sm:$0xff] (!%p138_p2)  }
   0xb   : > { %1159 = vmatpush3.bf16.msra.mxu1 (!%p138_p2), %v1295_v2  ;;  %1187 = vmatpush3.bf16.msra.mxu0 (!%p138_p2), %v1296_v3  ;;  %v1486_v3 = vld [vmem:[%s1555_s2] ss:$0 sm:$0xff] (!%p138_p2) }
   0xc   : > { %1160 = vmatprep.subr.bf16.mxu1 (!%p138_p2), %v1297_v4  ;;  %1188 = vmatprep.subr.bf16.mxu0 (!%p138_p2), %v1298_v5 }
   0xd   : > { %s1558_s13 = smov (!%p161_p3, %s987_s13), 1 }
   0xe   : > { %s1284_s26 = smul.u32 80, %s1558_s13  ;;  %s1097_s4 = sshll.u32 %s1558_s13, 6 }
   0xf   : > { %1161 = vmatpush3.bf16.msra.mxu1 %v1297_v4  ;;  %1189 = vmatpush3.bf16.msra.mxu0 %v1298_v5  ;;  %s1500_s13 = scalar_lea.vmem %s1556_s3, %s1097_s4 }
  0x10   : > { %s1394_s6 = scalar_lea.vmem %s1553_s0, %s1284_s26  ;;  %1162 = vmatprep.subr.bf16.mxu1 %v1299_v6  ;;  %1190 = vmatprep.subr.bf16.mxu0 %v1300_v7 }
  0x11   : > { %v1305_v10 = vld [vmem:[%s1394_s6 + $0x8] sm:$0xff]   ;;  %v1306_v11 = vld [vmem:[%s1394_s6] sm:$0xff]   ;;  %v1307_v15 = vld [vmem:[%s1394_s6 + $0x10] sm:$0xff]  }
  0x12   : > { %1168 = vmatprep.mubr.msk.bf16.mxu1 %vm291_vm0, %v1305_v10  ;;  %1196 = vmatprep.mubr.msk.bf16.mxu0 %vm291_vm0, %v1306_v11  ;;  %v1310_v17 = vld [vmem:[%s1394_s6 + $0x18] sm:$0xff]   ;;  %v1311_v19 = vld [vmem:[%s1394_s6 + $0x20] sm:$0xff]   ;;  %v1313_v20 = vld [vmem:[%s1394_s6 + $0x28] sm:$0xff]  }
  0x13   : > { %1163 = vmatpush3.bf16.msra.mxu1 %v1299_v6  ;;  %1191 = vmatpush3.bf16.msra.mxu0 %v1300_v7  ;;  %v1314_v23 = vld [vmem:[%s1394_s6 + $0x30] sm:$0xff]   ;;  %v1317_v24 = vld [vmem:[%s1394_s6 + $0x38] sm:$0xff]   ;;  %v1318_v26 = vld [vmem:[%s1394_s6 + $0x40] sm:$0xff]  }
  0x14   : > { %1164 = vmatprep.subr.bf16.mxu1 %v1301_v8  ;;  %1192 = vmatprep.subr.bf16.mxu0 %v1302_v9  ;;  %v1321_v27 = vld [vmem:[%s1394_s6 + $0x30] sm:$0xff]   ;;  %v1323_v29 = vld [vmem:[%s1394_s6 + $0x38] sm:$0xff]   ;;  %v1325_v31 = vld [vmem:[%s1394_s6 + $0x40] sm:$0xff]  }
  0x15   : > { %v1320_v28 = vld [vmem:[%s1394_s6 + $0x10] sm:$0xff]   ;;  %v1322_v30 = vld [vmem:[%s1394_s6 + $0x18] sm:$0xff]   ;;  %v1324_v32 = vld [vmem:[%s1394_s6 + $0x20] sm:$0xff]  }
  0x16   : > { %v1327_v33 = vld [vmem:[%s1394_s6 + $0x48] sm:$0xff]  }
  0x17   : > { %1165 = vmatpush3.bf16.msra.mxu1 %v1301_v8  ;;  %1193 = vmatpush3.bf16.msra.mxu0 %v1302_v9  ;;  %v1326_v34 = vld [vmem:[%s1394_s6 + $0x28] sm:$0xff]  }
  0x18   : > { %1166 = vmatprep.subr.bf16.mxu1 %v1303_v12  ;;  %1194 = vmatprep.subr.bf16.mxu0 %v1304_v13 }
  0x1b   : > { %1167 = vmatpush3.bf16.msra.mxu1 %v1303_v12  ;;  %1195 = vmatpush3.bf16.msra.mxu0 %v1304_v13 }
  0x1c   : > { %1240 = vmatprep.subr.bf16.mxu1 %v1308_v14  ;;  %1212 = vmatprep.subr.bf16.mxu0 %v1308_v14 }
  0x1e   : > { %1169 = vmatmul.mubr.msk.bf16.vlgmr.msra.gmra.mrb[0].mxu1 %vm291_vm0, %v1307_v15  ;;  %1197 = vmatmul.mubr.msk.bf16.vlgmr.msra.gmra.mrb[0].mxu0 %vm291_vm0, %v1305_v10 }
  0x1f   : > { %1246 = vmatpush3.bf16.msra.mxu1 %v1308_v14  ;;  %1213 = vmatpush3.bf16.msra.mxu0 %v1308_v14 }
  0x20   : > { %1241 = vmatprep.subr.bf16.mxu1 %v1309_v16  ;;  %1214 = vmatprep.subr.bf16.mxu0 %v1309_v16 }
  0x21   : > { %1172 = vmatprep.mubr.msk.bf16.mxu1 %vm291_vm0, %v1310_v17  ;;  %1200 = vmatprep.mubr.msk.bf16.mxu0 %vm291_vm0, %v1307_v15 }
  0x23   : > { %1247 = vmatpush3.bf16.msra.mxu1 %v1309_v16  ;;  %1215 = vmatpush3.bf16.msra.mxu0 %v1309_v16 }
  0x24   : > { %1242 = vmatprep.subr.bf16.mxu1 %v1312_v18  ;;  %1216 = vmatprep.subr.bf16.mxu0 %v1312_v18 }
  0x26   : > { %1173 = vmatmul.mubr.msk.bf16.gmra.mrb[4].mxu1 %vm291_vm0, %v1311_v19  ;;  %1201 = vmatmul.mubr.msk.bf16.gmra.mrb[4].mxu0 %vm291_vm0, %v1310_v17 }
  0x27   : > { %1248 = vmatpush3.bf16.msra.mxu1 %v1312_v18  ;;  %1217 = vmatpush3.bf16.msra.mxu0 %v1312_v18 }
  0x28   : > { %1176 = vmatprep.mubr.msk.bf16.mxu1 %vm291_vm0, %v1313_v20  ;;  %1204 = vmatprep.mubr.msk.bf16.mxu0 %vm291_vm0, %v1311_v19 }
  0x29   : > { %1218 = vmatprep.subr.bf16.mxu0 %v1315_v21  ;;  %1243 = vmatprep.subr.bf16.mxu1 %v1315_v21 }
  0x2b   : > { %1249 = vmatpush3.bf16.msra.mxu1 %v1315_v21  ;;  %1219 = vmatpush3.bf16.msra.mxu0 %v1315_v21 }
  0x2c   : > { %1244 = vmatprep.subr.bf16.mxu1 %v1316_v22  ;;  %1220 = vmatprep.subr.bf16.mxu0 %v1316_v22 }
  0x2e   : > { %1177 = vmatmul.mubr.msk.bf16.gmra.mrb[8].mxu1 %vm291_vm0, %v1314_v23  ;;  %1205 = vmatmul.mubr.msk.bf16.gmra.mrb[8].mxu0 %vm291_vm0, %v1313_v20 }
  0x2f   : > { %1180 = vmatprep.mubr.msk.bf16.mxu1 %vm291_vm0, %v1317_v24  ;;  %1208 = vmatprep.mubr.msk.bf16.mxu0 %vm291_vm0, %v1314_v23 }
  0x30   : > { %1221 = vmatpush3.bf16.msra.mxu0 %v1316_v22  ;;  %1250 = vmatpush3.bf16.msra.mxu1 %v1316_v22 }
  0x31   : > { %1222 = vmatprep.subr.bf16.mxu0 %v1319_v25  ;;  %1245 = vmatprep.subr.bf16.mxu1 %v1319_v25 }
  0x34   : > { %1223 = vmatpush3.bf16.msra.mxu0 %v1319_v25  ;;  %1251 = vmatpush3.bf16.msra.mxu1 %v1319_v25 }
  0x36   : > { %1181 = vmatmul.mubr.msk.bf16.gmra.mrb[12].mxu1 %vm291_vm0, %v1318_v26  ;;  %1209 = vmatmul.mubr.msk.bf16.gmra.mrb[12].mxu0 %vm291_vm0, %v1317_v24 }
  0x37   : > { %1232 = vmatprep.mubr.msk.bf16.mxu1 %vm291_vm0, %v1321_v27  ;;  %1224 = vmatprep.mubr.msk.bf16.mxu0 %vm291_vm0, %v1320_v28 }
  0x3e   : > { %1233 = vmatmul.mubr.msk.bf16.vlgmr.msra.gmra.mrb[16].mxu1 %vm291_vm0, %v1323_v29  ;;  %1225 = vmatmul.mubr.msk.bf16.vlgmr.msra.gmra.mrb[0].mxu0 %vm291_vm0, %v1322_v30 }
  0x3f   : > { %1236 = vmatprep.mubr.msk.bf16.mxu1 %vm291_vm0, %v1325_v31  ;;  %1228 = vmatprep.mubr.msk.bf16.mxu0 %vm291_vm0, %v1324_v32 }
  0x46   : > { %1237 = vmatmul.mubr.msk.bf16.gmra.mrb[20].mxu1 %vm291_vm0, %v1327_v33  ;;  %1229 = vmatmul.mubr.msk.bf16.gmra.mrb[4].mxu0 %vm291_vm0, %v1326_v34 }
  0xf1   : > { %v1170_v35 = vpop.f32.mrb[0].mxu1 }
  0xf2   : > { %v350_v36 = vpop.f32.mrb[1].mxu1 }
  0xf3   : > { %v1171_v37 = vpop.f32.mrb[2].mxu1 }
  0xf4   : > { %v353_v38 = vpop.f32.mrb[3].mxu1 }
  0xf9   : > { %v1467_v39 = vpop.f32.mrb[4].mxu1 }
  0xfa   : > { %v1469_v40 = vpop.f32.mrb[5].mxu1 }
  0xfb   : > { %v1471_v41 = vpop.f32.mrb[6].mxu1 }
  0xfc   : > { %v1473_v42 = vpop.f32.mrb[7].mxu1 }
 0x101   : > { %v1178_v43 = vpop.f32.mrb[8].mxu1  ;;  %v1206_v44 = vpop.f32.mrb[8].mxu0 }
 0x102   : > { %v382_v45 = vpop.f32.mrb[9].mxu1  ;;  %v532_v46 = vadd.f32 %v1206_v44, %v1178_v43  ;;  %v523_v47 = vpop.f32.mrb[9].mxu0 }
 0x103   : > { %v1179_v48 = vpop.f32.mrb[10].mxu1  ;;  %v524_v49 = vadd.f32 %v523_v47, %v382_v45  ;;  %v1207_v50 = vpop.f32.mrb[10].mxu0 }
 0x104   : > { %v385_v51 = vpop.f32.mrb[11].mxu1  ;;  %v535_v52 = vadd.f32 %v1207_v50, %v1179_v48  ;;  %v526_v53 = vpop.f32.mrb[11].mxu0 }
 0x105   : > { %v527_v54 = vadd.f32 %v526_v53, %v385_v51 }
 0x109   : > { %v1182_v55 = vpop.f32.mrb[12].mxu1  ;;  %v1210_v56 = vpop.f32.mrb[12].mxu0 }
 0x10a   : > { %v398_v57 = vpop.f32.mrb[13].mxu1  ;;  %v1475_v58 = vadd.f32 %v1210_v56, %v1182_v55  ;;  %v539_v59 = vpop.f32.mrb[13].mxu0 }
 0x10b   : > { %v1183_v60 = vpop.f32.mrb[14].mxu1  ;;  %v1477_v61 = vadd.f32 %v539_v59, %v398_v57  ;;  %v1211_v62 = vpop.f32.mrb[14].mxu0 }
 0x10c   : > { %v401_v63 = vpop.f32.mrb[15].mxu1  ;;  %v1479_v0 = vadd.f32 %v1211_v62, %v1183_v60  ;;  %v542_v1 = vpop.f32.mrb[15].mxu0 }
 0x10d   : > { %v1481_v2 = vadd.f32 %v542_v1, %v401_v63 }
 0x111   : > { %v1234_v4 = vpop.f32.mrb[16].mxu1  ;;  %v1226_v5 = vpop.f32.mrb[0].mxu0 }
 0x112   : > { %v790_v6 = vadd.f32 %v1234_v4, %v532_v46  ;;  %v749_v7 = vpop.f32.mrb[17].mxu1  ;;  %v1252_v8 = vadd.f32 %v1226_v5, %v1170_v35  ;;  %v717_v9 = vpop.f32.mrb[1].mxu0 }
 0x113   : > { %v788_v10 = vadd.f32 %v749_v7, %v524_v49  ;;  %v1235_v11 = vpop.f32.mrb[18].mxu1  ;;  %v1253_v13 = vadd.f32 %v717_v9, %v350_v36  ;;  %v1227_v14 = vpop.f32.mrb[2].mxu0 }
 0x114   : > { %v813_v12 = vadd.f32 %v1486_v3, %v790_v6  ;;  %v791_v15 = vadd.f32 %v1235_v11, %v535_v52  ;;  %v752_v16 = vpop.f32.mrb[19].mxu1  ;;  %v805_v17 = vadd.f32 %v1252_v8, %v1486_v3  ;;  %v1254_v19 = vadd.f32 %v1227_v14, %v1171_v37  ;;  %v720_v20 = vpop.f32.mrb[3].mxu0 }
 0x115   : > { %v811_v18 = vadd.f32 %v1486_v3, %v788_v10  ;;  %v789_v21 = vadd.f32 %v752_v16, %v527_v54  ;;  %v803_v23 = vadd.f32 %v1253_v13, %v1486_v3  ;;  %v1255_v25 = vadd.f32 %v720_v20, %v353_v38 }
 0x116   : > { %v829_v22 = vmul.f32 0.2, %v813_v12  ;;  %v814_v24 = vadd.f32 %v1486_v3, %v791_v15  ;;  %v821_v26 = vmul.f32 0.2, %v805_v17  ;;  %v806_v28 = vadd.f32 %v1254_v19, %v1486_v3 }
 0x117   : > { %v827_v27 = vmul.f32 0.2, %v811_v18  ;;  %v812_v29 = vadd.f32 %v1486_v3, %v789_v21  ;;  %v819_v31 = vmul.f32 0.2, %v803_v23  ;;  %v804_v33 = vadd.f32 %v1255_v25, %v1486_v3 }
 0x118   : > { %v845_v30 = vmax.f32 %v813_v12, %v829_v22  ;;  %v830_v32 = vmul.f32 0.2, %v814_v24  ;;  %v837_v34 = vmax.f32 %v805_v17, %v821_v26  ;;  %v822_v36 = vmul.f32 0.2, %v806_v28 }
 0x119   : > { %v843_v35 = vmax.f32 %v811_v18, %v827_v27  ;;  %v828_v37 = vmul.f32 0.2, %v812_v29  ;;  %v1238_v38 = vpop.f32.mrb[20].mxu1  ;;  %v835_v44 = vmax.f32 %v803_v23, %v819_v31  ;;  %v820_v46 = vmul.f32 0.2, %v804_v33  ;;  %v1230_v47 = vpop.f32.mrb[4].mxu0 }
 0x11a   : > { %v1108_v43 = vpack.c.bf16 %v845_v30, %v845_v30  ;;  %v846_v45 = vmax.f32 %v814_v24, %v830_v32  ;;  %v765_v48 = vpop.f32.mrb[21].mxu1  ;;  %v1100_v49 = vpack.c.bf16 %v837_v34, %v837_v34  ;;  %v838_v51 = vmax.f32 %v806_v28, %v822_v36  ;;  %v733_v53 = vpop.f32.mrb[5].mxu0 }
 0x11b   : > { %v1106_v50 = vpack.c.bf16 %v843_v35, %v843_v35  ;;  %v844_v52 = vmax.f32 %v812_v29, %v828_v37  ;;  %v1239_v54 = vpop.f32.mrb[22].mxu1  ;;  %v1098_v55 = vpack.c.bf16 %v835_v44, %v835_v44  ;;  %v836_v57 = vmax.f32 %v804_v33, %v820_v46  ;;  %v1231_v60 = vpop.f32.mrb[6].mxu0 }
 0x11c   : > { %926 = vst.msk [vmem:[%s1500_s13 + $0x28] sm:$0xf] %vm915_vm1, %v1108_v43  ;;  %v1109_v56 = vpack.c.bf16 %v846_v45, %v846_v45  ;;  %v1256_v59 = vadd.f32 %v1230_v47, %v1467_v39  ;;  %v768_v62 = vpop.f32.mrb[23].mxu1  ;;  %918 = vst.msk [vmem:[%s1500_s13 + $0x8] sm:$0xf] %vm915_vm1, %v1100_v49  ;;  %v1101_v63 = vpack.c.bf16 %v838_v51, %v838_v51  ;;  %v736_v6 = vpop.f32.mrb[7].mxu0 }
 0x11d   : > { %924 = vst.msk [vmem:[%s1500_s13 + $0x20] sm:$0xf] %vm915_vm1, %v1106_v50  ;;  %v1107_v1 = vpack.c.bf16 %v844_v52, %v844_v52  ;;  %v794_v4 = vadd.f32 %v1238_v38, %v1475_v58  ;;  %v1257_v5 = vadd.f32 %v733_v53, %v1469_v40  ;;  %916 = vst.msk [vmem:[%s1500_s13] sm:$0xf] %vm915_vm1, %v1098_v55 }
 0x11e   : > { %927 = vst.msk [vmem:[%s1500_s13 + $0x2c] sm:$0xf] %vm915_vm1, %v1109_v56  ;;  %v1099_v39 = vpack.c.bf16 %v836_v57, %v836_v57  ;;  %v809_v7 = vadd.f32 %v1256_v59, %v1486_v3  ;;  %v792_v8 = vadd.f32 %v765_v48, %v1477_v61  ;;  %v1258_v9 = vadd.f32 %v1231_v60, %v1471_v41 }
 0x11f   : > { %919 = vst.msk [vmem:[%s1500_s13 + $0xc] sm:$0xf] %vm915_vm1, %v1101_v63  ;;  %925 = vst.msk [vmem:[%s1500_s13 + $0x24] sm:$0xf] %vm915_vm1, %v1107_v1  ;;  %v817_v58 = vadd.f32 %v1486_v3, %v794_v4  ;;  %v807_v40 = vadd.f32 %v1257_v5, %v1486_v3  ;;  %v795_v10 = vadd.f32 %v1239_v54, %v1479_v0 }
 0x120   : > { %v1259_v11 = vadd.f32 %v736_v6, %v1473_v42  ;;  %917 = vst.msk [vmem:[%s1500_s13 + $0x4] sm:$0xf] %vm915_vm1, %v1099_v39  ;;  %v825_v12 = vmul.f32 0.2, %v809_v7  ;;  %v815_v13 = vadd.f32 %v1486_v3, %v792_v8  ;;  %v810_v61 = vadd.f32 %v1258_v9, %v1486_v3 }
 0x121   : > { %v793_v41 = vadd.f32 %v768_v62, %v1481_v2  ;;  %v833_v14 = vmul.f32 0.2, %v817_v58  ;;  %v823_v15 = vmul.f32 0.2, %v807_v40  ;;  %v818_v16 = vadd.f32 %v1486_v3, %v795_v10 }
 0x122   : > { %v808_v17 = vadd.f32 %v1259_v11, %v1486_v3  ;;  %v841_v18 = vmax.f32 %v809_v7, %v825_v12  ;;  %v831_v0 = vmul.f32 0.2, %v815_v13  ;;  %v826_v19 = vmul.f32 0.2, %v810_v61 }
 0x123   : > { %v816_v42 = vadd.f32 %v1486_v3, %v793_v41  ;;  %v849_v20 = vmax.f32 %v817_v58, %v833_v14  ;;  %v839_v21 = vmax.f32 %v807_v40, %v823_v15  ;;  %v834_v22 = vmul.f32 0.2, %v818_v16 }
 0x124   : > { %v824_v23 = vmul.f32 0.2, %v808_v17  ;;  %v1104_v24 = vpack.c.bf16 %v841_v18, %v841_v18  ;;  %v847_v2 = vmax.f32 %v815_v13, %v831_v0  ;;  %v842_v25 = vmax.f32 %v810_v61, %v826_v19 }
 0x125   : > { %v832_v26 = vmul.f32 0.2, %v816_v42  ;;  %v1112_v27 = vpack.c.bf16 %v849_v20, %v849_v20  ;;  %v1102_v28 = vpack.c.bf16 %v839_v21, %v839_v21  ;;  %v850_v29 = vmax.f32 %v818_v16, %v834_v22 }
 0x126   : > { %v840_v30 = vmax.f32 %v808_v17, %v824_v23  ;;  %922 = vst.msk [vmem:[%s1500_s13 + $0x18] sm:$0xf] %vm915_vm1, %v1104_v24  ;;  %v1110_v3 = vpack.c.bf16 %v847_v2, %v847_v2  ;;  %v1105_v31 = vpack.c.bf16 %v842_v25, %v842_v25 }
 0x127   : > { %v848_v32 = vmax.f32 %v816_v42, %v832_v26  ;;  %930 = vst.msk [vmem:[%s1500_s13 + $0x38] sm:$0xf] %vm915_vm1, %v1112_v27  ;;  %920 = vst.msk [vmem:[%s1500_s13 + $0x10] sm:$0xf] %vm915_vm1, %v1102_v28  ;;  %v1113_v33 = vpack.c.bf16 %v850_v29, %v850_v29 }
 0x128   : > { %v1103_v34 = vpack.c.bf16 %v840_v30, %v840_v30  ;;  %928 = vst.msk [vmem:[%s1500_s13 + $0x30] sm:$0xf] %vm915_vm1, %v1110_v3  ;;  %923 = vst.msk [vmem:[%s1500_s13 + $0x1c] sm:$0xf] %vm915_vm1, %v1105_v31 }
 0x129   : > { %v1111_v35 = vpack.c.bf16 %v848_v32, %v848_v32  ;;  %931 = vst.msk [vmem:[%s1500_s13 + $0x3c] sm:$0xf] %vm915_vm1, %v1113_v33 }
 0x12a   : > { %921 = vst.msk [vmem:[%s1500_s13 + $0x14] sm:$0xf] %vm915_vm1, %v1103_v34 }
 0x12b   : > { %929 = vst.msk [vmem:[%s1500_s13 + $0x34] sm:$0xf] %vm915_vm1, %v1111_v35 }
 0x12c PF: > { %s13_s12 = sadd.s32 1, %s1334_s12  }
 0x12d   : > { %p10_p4 = scmp.ge.s32.totalorder %s13_s12, 4  }
 0x12f   :  { %12 = sbr.rel (!%p10_p4) target bundleno = 1 (0x1), region = 64 }

// kernel: _lambda_.10
= control target key start
LH: loop header
LB: loop body
LE: loop exit
PB: predicated region body
PF: predicated region fallthrough
CT: control target
= control target key end

     0   :  { %s1057_s12 = smov 0   ;;  %s1169_s0 = inlined_call_operand.vmem [shape: bf16[2,2,80,96], index: 0, kind: input, shape index: {}]   ;;  %s1170_s1 = inlined_call_operand.vmem [shape: bf16[3,96,64], index: 1, kind: input, shape index: {}]   ;;  %s1171_s2 = inlined_call_operand.vmem [shape: f32[1,64], index: 2, kind: input, shape index: {}]   ;;  %s1172_s3 = inlined_call_operand.vmem [shape: bf16[2,64,64], index: 3, kind: output, shape index: {}]  }
   0x1 LB: > { %s770_s13 = sadd.s32 4294967295, %s1035_s12   ;;  %p774_p0 = scmp.ge.s32.totalorder %s1035_s12, 1  ;;  %s1035_s12 = sphi %s1057_s12, %s13_s12  }
   0x2   : > { %p137_p1 = scmp.lt.s32.totalorder %s1035_s12, 3 }
   0x4   : > { %p138_p2 = pnand %p774_p0, %p137_p1 }
   0x5   : > { %v999_v0 = vld [vmem:[%s1170_s1 + $0x30] sm:$0xff] (!%p138_p2)   ;;  %p161_p3 = scmp.lt.s32.totalorder (!%p138_p2), %s770_s13, 1  ;;  %v1000_v1 = vld [vmem:[%s1170_s1] sm:$0xff] (!%p138_p2)   ;;  %v1001_v2 = vld [vmem:[%s1170_s1 + $0x38] sm:$0xff] (!%p138_p2)   ;;  %vm270_vm0 = vcmask (!%p138_p2), 785408   ;;  %vm706_vm1 = vcmask (!%p138_p2), 519168  }
   0x6   : > { %141 = sbr.rel (%p138_p2) target bundleno = 280 (0x118), region = 32  ;;  %902 = vmatprep.subr.bf16.mxu1 (!%p138_p2), %v999_v0  ;;  %922 = vmatprep.subr.bf16.mxu0 (!%p138_p2), %v1000_v1  ;;  %v1002_v3 = vld [vmem:[%s1170_s1 + $0x8] sm:$0xff] (!%p138_p2)   ;;  %v1003_v4 = vld [vmem:[%s1170_s1 + $0x40] sm:$0xff] (!%p138_p2)   ;;  %v1004_v5 = vld [vmem:[%s1170_s1 + $0x10] sm:$0xff] (!%p138_p2)  }
   0x7   : > { %903 = vmatpush3.bf16.msra.mxu1 (!%p138_p2), %v999_v0  ;;  %923 = vmatpush3.bf16.msra.mxu0 (!%p138_p2), %v1000_v1  ;;  %v1005_v6 = vld [vmem:[%s1170_s1 + $0x48] sm:$0xff] (!%p138_p2)   ;;  %v1006_v7 = vld [vmem:[%s1170_s1 + $0x18] sm:$0xff] (!%p138_p2)   ;;  %v1007_v8 = vld [vmem:[%s1170_s1 + $0x50] sm:$0xff] (!%p138_p2)  }
   0x8   : > { %904 = vmatprep.subr.bf16.mxu1 (!%p138_p2), %v1001_v2  ;;  %924 = vmatprep.subr.bf16.mxu0 (!%p138_p2), %v1002_v3  ;;  %v1008_v10 = vld [vmem:[%s1170_s1 + $0x20] sm:$0xff] (!%p138_p2)   ;;  %v1009_v12 = vld [vmem:[%s1170_s1 + $0x58] sm:$0xff] (!%p138_p2)   ;;  %v1010_v13 = vld [vmem:[%s1170_s1 + $0x28] sm:$0xff] (!%p138_p2)  }
   0x9   : > { %v1014_v14 = vld [vmem:[%s1170_s1 + $0x60] sm:$0xff] (!%p138_p2)   ;;  %v1016_v17 = vld [vmem:[%s1170_s1 + $0x68] sm:$0xff] (!%p138_p2)   ;;  %v1017_v20 = vld [vmem:[%s1170_s1 + $0x70] sm:$0xff] (!%p138_p2)  }
   0xa   : > { %v1020_v23 = vld [vmem:[%s1170_s1 + $0x78] sm:$0xff] (!%p138_p2)   ;;  %v1023_v26 = vld [vmem:[%s1170_s1 + $0x80] sm:$0xff] (!%p138_p2)   ;;  %v1024_v27 = vld [vmem:[%s1170_s1 + $0x88] sm:$0xff] (!%p138_p2)  }
   0xb   : > { %905 = vmatpush3.bf16.msra.mxu1 (!%p138_p2), %v1001_v2  ;;  %925 = vmatpush3.bf16.msra.mxu0 (!%p138_p2), %v1002_v3  ;;  %v852_v46 = vld [vmem:[%s1171_s2] ss:$0 sm:$0xff] (!%p138_p2) }
   0xc   : > { %906 = vmatprep.subr.bf16.mxu1 (!%p138_p2), %v1003_v4  ;;  %926 = vmatprep.subr.bf16.mxu0 (!%p138_p2), %v1004_v5 }
   0xd   : > { %s1174_s13 = smov (!%p161_p3, %s770_s13), 1 }
   0xe   : > { %s990_s26 = smul.u32 80, %s1174_s13  ;;  %s863_s4 = sshll.u32 %s1174_s13, 5 }
   0xf   : > { %907 = vmatpush3.bf16.msra.mxu1 %v1003_v4  ;;  %927 = vmatpush3.bf16.msra.mxu0 %v1004_v5  ;;  %s170_s7 = scalar_lea.vmem %s1172_s3, %s863_s4 }
  0x10   : > { %s1095_s6 = scalar_lea.vmem %s1169_s0, %s990_s26  ;;  %908 = vmatprep.subr.bf16.mxu1 %v1005_v6  ;;  %928 = vmatprep.subr.bf16.mxu0 %v1006_v7 }
  0x11   : > { %v1011_v9 = vld [vmem:[%s1095_s6 + $0x28] sm:$0xff]   ;;  %v1013_v11 = vld [vmem:[%s1095_s6] sm:$0xff]   ;;  %v1012_v15 = vld [vmem:[%s1095_s6 + $0x30] sm:$0xff]  }
  0x12   : > { %914 = vmatprep.mubr.msk.bf16.mxu1 %vm270_vm0, %v1011_v9  ;;  %934 = vmatprep.mubr.msk.bf16.mxu0 %vm270_vm0, %v1013_v11  ;;  %v1015_v16 = vld [vmem:[%s1095_s6 + $0x8] sm:$0xff]   ;;  %v1018_v18 = vld [vmem:[%s1095_s6 + $0x38] sm:$0xff]   ;;  %v1019_v19 = vld [vmem:[%s1095_s6 + $0x10] sm:$0xff]  }
  0x13   : > { %909 = vmatpush3.bf16.msra.mxu1 %v1005_v6  ;;  %929 = vmatpush3.bf16.msra.mxu0 %v1006_v7  ;;  %v1021_v21 = vld [vmem:[%s1095_s6 + $0x40] sm:$0xff]   ;;  %v1022_v22 = vld [vmem:[%s1095_s6 + $0x18] sm:$0xff]   ;;  %v1025_v24 = vld [vmem:[%s1095_s6 + $0x8] sm:$0xff]  }
  0x14   : > { %910 = vmatprep.subr.bf16.mxu1 %v1007_v8  ;;  %930 = vmatprep.subr.bf16.mxu0 %v1008_v10  ;;  %v1026_v25 = vld [vmem:[%s1095_s6 + $0x18] sm:$0xff]   ;;  %v1028_v28 = vld [vmem:[%s1095_s6 + $0x20] sm:$0xff]   ;;  %v1027_v29 = vld [vmem:[%s1095_s6 + $0x10] sm:$0xff]  }
  0x17   : > { %911 = vmatpush3.bf16.msra.mxu1 %v1007_v8  ;;  %931 = vmatpush3.bf16.msra.mxu0 %v1008_v10 }
  0x18   : > { %912 = vmatprep.subr.bf16.mxu1 %v1009_v12  ;;  %932 = vmatprep.subr.bf16.mxu0 %v1010_v13 }
  0x1b   : > { %913 = vmatpush3.bf16.msra.mxu1 %v1009_v12  ;;  %933 = vmatpush3.bf16.msra.mxu0 %v1010_v13 }
  0x1c   : > { %962 = vmatprep.subr.bf16.mxu1 %v1014_v14  ;;  %942 = vmatprep.subr.bf16.mxu0 %v1014_v14 }
  0x1e   : > { %915 = vmatmul.mubr.msk.bf16.vlgmr.msra.gmra.mrb[0].mxu1 %vm270_vm0, %v1012_v15  ;;  %935 = vmatmul.mubr.msk.bf16.vlgmr.msra.gmra.mrb[0].mxu0 %vm270_vm0, %v1015_v16 }
  0x1f   : > { %968 = vmatpush3.bf16.msra.mxu1 %v1014_v14  ;;  %943 = vmatpush3.bf16.msra.mxu0 %v1014_v14 }
  0x20   : > { %963 = vmatprep.subr.bf16.mxu1 %v1016_v17  ;;  %944 = vmatprep.subr.bf16.mxu0 %v1016_v17 }
  0x21   : > { %918 = vmatprep.mubr.msk.bf16.mxu1 %vm270_vm0, %v1018_v18  ;;  %938 = vmatprep.mubr.msk.bf16.mxu0 %vm270_vm0, %v1019_v19 }
  0x23   : > { %969 = vmatpush3.bf16.msra.mxu1 %v1016_v17  ;;  %945 = vmatpush3.bf16.msra.mxu0 %v1016_v17 }
  0x24   : > { %964 = vmatprep.subr.bf16.mxu1 %v1017_v20  ;;  %946 = vmatprep.subr.bf16.mxu0 %v1017_v20 }
  0x26   : > { %919 = vmatmul.mubr.msk.bf16.gmra.mrb[4].mxu1 %vm270_vm0, %v1021_v21  ;;  %939 = vmatmul.mubr.msk.bf16.gmra.mrb[4].mxu0 %vm270_vm0, %v1022_v22 }
  0x27   : > { %970 = vmatpush3.bf16.msra.mxu1 %v1017_v20  ;;  %947 = vmatpush3.bf16.msra.mxu0 %v1017_v20 }
  0x28   : > { %965 = vmatprep.subr.bf16.mxu1 %v1020_v23  ;;  %948 = vmatprep.subr.bf16.mxu0 %v1020_v23 }
  0x29   : > { %954 = vmatprep.mubr.msk.bf16.mxu0 %vm270_vm0, %v1025_v24  ;;  %958 = vmatprep.mubr.msk.bf16.mxu1 %vm270_vm0, %v1026_v25 }
  0x2b   : > { %971 = vmatpush3.bf16.msra.mxu1 %v1020_v23  ;;  %949 = vmatpush3.bf16.msra.mxu0 %v1020_v23 }
  0x2c   : > { %966 = vmatprep.subr.bf16.mxu1 %v1023_v26  ;;  %950 = vmatprep.subr.bf16.mxu0 %v1023_v26 }
  0x2f   : > { %972 = vmatpush3.bf16.msra.mxu1 %v1023_v26  ;;  %951 = vmatpush3.bf16.msra.mxu0 %v1023_v26 }
  0x30   : > { %967 = vmatprep.subr.bf16.mxu1 %v1024_v27  ;;  %952 = vmatprep.subr.bf16.mxu0 %v1024_v27 }
  0x33   : > { %973 = vmatpush3.bf16.msra.mxu1 %v1024_v27  ;;  %953 = vmatpush3.bf16.msra.mxu0 %v1024_v27 }
  0x36   : > { %959 = vmatmul.mubr.msk.bf16.vlgmr.msra.gmra.mrb[8].mxu1 %vm270_vm0, %v1028_v28  ;;  %955 = vmatmul.mubr.msk.bf16.vlgmr.msra.gmra.mrb[0].mxu0 %vm270_vm0, %v1027_v29 }
  0xf1   : > { %v916_v30 = vpop.f32.mrb[0].mxu1 }
  0xf2   : > { %v317_v31 = vpop.f32.mrb[1].mxu1 }
  0xf3   : > { %v917_v32 = vpop.f32.mrb[2].mxu1 }
  0xf4   : > { %v320_v33 = vpop.f32.mrb[3].mxu1 }
  0xf9   : > { %v920_v34 = vpop.f32.mrb[4].mxu1  ;;  %v940_v35 = vpop.f32.mrb[4].mxu0 }
  0xfa   : > { %v333_v36 = vpop.f32.mrb[5].mxu1  ;;  %v475_v37 = vadd.f32 %v940_v35, %v920_v34  ;;  %v466_v38 = vpop.f32.mrb[5].mxu0 }
  0xfb   : > { %v921_v39 = vpop.f32.mrb[6].mxu1  ;;  %v467_v40 = vadd.f32 %v466_v38, %v333_v36  ;;  %v941_v41 = vpop.f32.mrb[6].mxu0 }
  0xfc   : > { %v336_v42 = vpop.f32.mrb[7].mxu1  ;;  %v478_v43 = vadd.f32 %v941_v41, %v921_v39  ;;  %v469_v44 = vpop.f32.mrb[7].mxu0 }
  0xfd   : > { %v470_v45 = vadd.f32 %v469_v44, %v336_v42 }
 0x109   : > { %v960_v47 = vpop.f32.mrb[8].mxu1  ;;  %v956_v48 = vpop.f32.mrb[0].mxu0 }
 0x10a   : > { %v641_v49 = vadd.f32 %v960_v47, %v475_v37  ;;  %v620_v50 = vpop.f32.mrb[9].mxu1  ;;  %v974_v51 = vadd.f32 %v956_v48, %v916_v30  ;;  %v604_v52 = vpop.f32.mrb[1].mxu0 }
 0x10b   : > { %v639_v53 = vadd.f32 %v620_v50, %v467_v40  ;;  %v961_v54 = vpop.f32.mrb[10].mxu1  ;;  %v975_v56 = vadd.f32 %v604_v52, %v317_v31  ;;  %v957_v57 = vpop.f32.mrb[2].mxu0 }
 0x10c   : > { %v656_v55 = vadd.f32 %v852_v46, %v641_v49  ;;  %v642_v58 = vadd.f32 %v961_v54, %v478_v43  ;;  %v623_v59 = vpop.f32.mrb[11].mxu1  ;;  %v652_v60 = vadd.f32 %v974_v51, %v852_v46  ;;  %v976_v62 = vadd.f32 %v957_v57, %v917_v32  ;;  %v607_v63 = vpop.f32.mrb[3].mxu0 }
 0x10d   : > { %v654_v61 = vadd.f32 %v852_v46, %v639_v53  ;;  %v640_v0 = vadd.f32 %v623_v59, %v470_v45  ;;  %v650_v2 = vadd.f32 %v975_v56, %v852_v46  ;;  %v977_v4 = vadd.f32 %v607_v63, %v320_v33 }
 0x10e   : > { %v664_v1 = vmul.f32 0.2, %v656_v55  ;;  %v657_v3 = vadd.f32 %v852_v46, %v642_v58  ;;  %v660_v5 = vmul.f32 0.2, %v652_v60  ;;  %v653_v7 = vadd.f32 %v976_v62, %v852_v46 }
 0x10f   : > { %v662_v6 = vmul.f32 0.2, %v654_v61  ;;  %v655_v8 = vadd.f32 %v852_v46, %v640_v0  ;;  %v658_v10 = vmul.f32 0.2, %v650_v2  ;;  %v651_v12 = vadd.f32 %v977_v4, %v852_v46 }
 0x110   : > { %v672_v9 = vmax.f32 %v656_v55, %v664_v1  ;;  %v665_v11 = vmul.f32 0.2, %v657_v3  ;;  %v668_v13 = vmax.f32 %v652_v60, %v660_v5  ;;  %v661_v15 = vmul.f32 0.2, %v653_v7 }
 0x111   : > { %v670_v14 = vmax.f32 %v654_v61, %v662_v6  ;;  %v663_v16 = vmul.f32 0.2, %v655_v8  ;;  %v666_v18 = vmax.f32 %v650_v2, %v658_v10  ;;  %v659_v20 = vmul.f32 0.2, %v651_v12 }
 0x112   : > { %v870_v17 = vpack.c.bf16 %v672_v9, %v672_v9  ;;  %v673_v19 = vmax.f32 %v657_v3, %v665_v11  ;;  %v866_v21 = vpack.c.bf16 %v668_v13, %v668_v13  ;;  %v669_v23 = vmax.f32 %v653_v7, %v661_v15 }
 0x113   : > { %v868_v22 = vpack.c.bf16 %v670_v14, %v670_v14  ;;  %v671_v24 = vmax.f32 %v655_v8, %v663_v16  ;;  %v864_v25 = vpack.c.bf16 %v666_v18, %v666_v18  ;;  %v667_v27 = vmax.f32 %v651_v12, %v659_v20 }
 0x114   : > { %713 = vst.msk [vmem:[%s170_s7 + $0x18] sm:$0xf] %vm706_vm1, %v870_v17  ;;  %v871_v26 = vpack.c.bf16 %v673_v19, %v673_v19  ;;  %709 = vst.msk [vmem:[%s170_s7 + $0x8] sm:$0xf] %vm706_vm1, %v866_v21  ;;  %v867_v28 = vpack.c.bf16 %v669_v23, %v669_v23 }
 0x115   : > { %711 = vst.msk [vmem:[%s170_s7 + $0x10] sm:$0xf] %vm706_vm1, %v868_v22  ;;  %v869_v29 = vpack.c.bf16 %v671_v24, %v671_v24  ;;  %707 = vst.msk [vmem:[%s170_s7] sm:$0xf] %vm706_vm1, %v864_v25  ;;  %v865_v30 = vpack.c.bf16 %v667_v27, %v667_v27 }
 0x116   : > { %714 = vst.msk [vmem:[%s170_s7 + $0x1c] sm:$0xf] %vm706_vm1, %v871_v26  ;;  %710 = vst.msk [vmem:[%s170_s7 + $0xc] sm:$0xf] %vm706_vm1, %v867_v28 }
 0x117   : > { %712 = vst.msk [vmem:[%s170_s7 + $0x14] sm:$0xf] %vm706_vm1, %v869_v29  ;;  %708 = vst.msk [vmem:[%s170_s7 + $0x4] sm:$0xf] %vm706_vm1, %v865_v30 }
 0x118 PF: > { %s13_s12 = sadd.s32 1, %s1035_s12  }
 0x119   : > { %p10_p4 = scmp.ge.s32.totalorder %s13_s12, 4  }
 0x11b   :  { %12 = sbr.rel (!%p10_p4) target bundleno = 1 (0x1), region = 65 }

// kernel: _lambda_.11
= control target key start
LH: loop header
LB: loop body
LE: loop exit
PB: predicated region body
PF: predicated region fallthrough
CT: control target
= control target key end

     0   :  { %s1178_s12 = smov 0   ;;  %s1416_s0 = inlined_call_operand.vmem [shape: bf16[2,1,96,192], index: 0, kind: input, shape index: {}]   ;;  %s1417_s1 = inlined_call_operand.vmem [shape: bf16[3,192,64], index: 1, kind: input, shape index: {}]   ;;  %s1418_s2 = inlined_call_operand.vmem [shape: f32[1,64], index: 2, kind: input, shape index: {}]   ;;  %s1419_s3 = inlined_call_operand.vmem [shape: bf16[2,64,64], index: 3, kind: output, shape index: {}]  }
   0x1 LB: > { %s919_s13 = sadd.s32 4294967295, %s1155_s12   ;;  %p923_p0 = scmp.ge.s32.totalorder %s1155_s12, 1  ;;  %s1155_s12 = sphi %s1178_s12, %s13_s12  }
   0x2   : > { %p137_p1 = scmp.lt.s32.totalorder %s1155_s12, 3 }
   0x4   : > { %p138_p2 = pnand %p923_p0, %p137_p1 }
   0x5   : > { %v1095_v0 = vld [vmem:[%s1417_s1 + $0x60] sm:$0xff] (!%p138_p2)   ;;  %v1157_v1 = vmov (!%p138_p2), 0   ;;  %v1097_v3 = vld [vmem:[%s1417_s1 + $0x68] sm:$0xff] (!%p138_p2)   ;;  %v1099_v5 = vld [vmem:[%s1417_s1 + $0x70] sm:$0xff] (!%p138_p2)   ;;  %p161_p3 = scmp.lt.s32.totalorder (!%p138_p2), %s919_s13, 1  ;;  %vm339_vm0 = vcmask (!%p138_p2), 523264  }
   0x6   : > { %141 = sbr.rel (%p138_p2) target bundleno = 336 (0x150), region = 32  ;;  %352 = vmatprep.subr.bf16.mxu0 (!%p138_p2), %v1157_v1  ;;  %501 = vmatprep.subr.bf16.mxu1 (!%p138_p2), %v1157_v1  ;;  %v1096_v2 = vld [vmem:[%s1417_s1] sm:$0xff] (!%p138_p2)   ;;  %v1098_v4 = vld [vmem:[%s1417_s1 + $0x8] sm:$0xff] (!%p138_p2)   ;;  %v1100_v6 = vld [vmem:[%s1417_s1 + $0x10] sm:$0xff] (!%p138_p2)   ;;  %vm855_vm1 = vcmask (!%p138_p2), 519168  }
   0x7   : > { %353 = vmatpush1.bf16.msra.mxu0 (!%p138_p2), %v1095_v0  ;;  %502 = vmatpush1.bf16.msra.mxu1 (!%p138_p2), %v1096_v2  ;;  %v1101_v7 = vld [vmem:[%s1417_s1 + $0x78] sm:$0xff] (!%p138_p2)   ;;  %v1103_v9 = vld [vmem:[%s1417_s1 + $0x80] sm:$0xff] (!%p138_p2)   ;;  %v1105_v11 = vld [vmem:[%s1417_s1 + $0x88] sm:$0xff] (!%p138_p2)  }
   0x8   : > { %354 = vmatprep.subr.bf16.mxu0 (!%p138_p2), %v1157_v1  ;;  %503 = vmatprep.subr.bf16.mxu1 (!%p138_p2), %v1157_v1  ;;  %v1102_v8 = vld [vmem:[%s1417_s1 + $0x18] sm:$0xff] (!%p138_p2)   ;;  %v1104_v10 = vld [vmem:[%s1417_s1 + $0x20] sm:$0xff] (!%p138_p2)   ;;  %v1106_v12 = vld [vmem:[%s1417_s1 + $0x28] sm:$0xff] (!%p138_p2)  }
   0x9   : > { %v1107_v13 = vld [vmem:[%s1417_s1 + $0x90] sm:$0xff] (!%p138_p2)   ;;  %v1109_v16 = vld [vmem:[%s1417_s1 + $0x98] sm:$0xff] (!%p138_p2)   ;;  %v1111_v19 = vld [vmem:[%s1417_s1 + $0xa0] sm:$0xff] (!%p138_p2)  }
   0xa   : > { %v1108_v14 = vld [vmem:[%s1417_s1 + $0x30] sm:$0xff] (!%p138_p2)   ;;  %v1110_v18 = vld [vmem:[%s1417_s1 + $0x38] sm:$0xff] (!%p138_p2)   ;;  %v1112_v20 = vld [vmem:[%s1417_s1 + $0x40] sm:$0xff] (!%p138_p2)  }
   0xb   : > { %355 = vmatpush1.bf16.msra.mxu0 (!%p138_p2), %v1097_v3  ;;  %504 = vmatpush1.bf16.msra.mxu1 (!%p138_p2), %v1098_v4  ;;  %v1113_v21 = vld [vmem:[%s1417_s1 + $0xa8] sm:$0xff] (!%p138_p2)   ;;  %v1115_v23 = vld [vmem:[%s1417_s1 + $0xb0] sm:$0xff] (!%p138_p2)   ;;  %v1117_v25 = vld [vmem:[%s1417_s1 + $0xb8] sm:$0xff] (!%p138_p2)  }
   0xc   : > { %356 = vmatprep.subr.bf16.mxu0 (!%p138_p2), %v1157_v1  ;;  %505 = vmatprep.subr.bf16.mxu1 (!%p138_p2), %v1157_v1  ;;  %v1114_v22 = vld [vmem:[%s1417_s1 + $0x48] sm:$0xff] (!%p138_p2)   ;;  %v1116_v24 = vld [vmem:[%s1417_s1 + $0x50] sm:$0xff] (!%p138_p2)   ;;  %v1118_v26 = vld [vmem:[%s1417_s1 + $0x58] sm:$0xff] (!%p138_p2)  }
   0xd   : > { %s1421_s13 = smov (!%p161_p3, %s919_s13), 1  ;;  %v1125_v29 = vld [vmem:[%s1417_s1 + $0xc0] sm:$0xff]   ;;  %v1126_v31 = vld [vmem:[%s1417_s1 + $0xc8] sm:$0xff]   ;;  %v1127_v33 = vld [vmem:[%s1417_s1 + $0xd0] sm:$0xff]  }
   0xe   : > { %s1085_s9 = smul.u32 96, %s1421_s13  ;;  %v1128_v35 = vld [vmem:[%s1417_s1 + $0xd8] sm:$0xff]   ;;  %v1129_v37 = vld [vmem:[%s1417_s1 + $0xe0] sm:$0xff]   ;;  %v1133_v39 = vld [vmem:[%s1417_s1 + $0xe8] sm:$0xff]   ;;  %s1052_s17 = sshll.u32 %s1421_s13, 5 }
   0xf   : > { %357 = vmatpush1.bf16.msra.mxu0 %v1099_v5  ;;  %506 = vmatpush1.bf16.msra.mxu1 %v1100_v6  ;;  %v1134_v41 = vld [vmem:[%s1417_s1 + $0xf0] sm:$0xff]   ;;  %v1138_v42 = vld [vmem:[%s1417_s1 + $0xf8] sm:$0xff]   ;;  %v1139_v43 = vld [vmem:[%s1417_s1 + $0x100] sm:$0xff]   ;;  %s1395_s21 = scalar_lea.vmem %s1419_s3, %s1052_s17 }
  0x10   : > { %358 = vmatprep.subr.bf16.mxu0 %v1157_v1  ;;  %507 = vmatprep.subr.bf16.mxu1 %v1157_v1  ;;  %s1247_s18 = scalar_lea.vmem %s1416_s0, %s1085_s9  ;;  %v1143_v44 = vld [vmem:[%s1417_s1 + $0x108] sm:$0xff]   ;;  %v1144_v45 = vld [vmem:[%s1417_s1 + $0x110] sm:$0xff]   ;;  %v1145_v46 = vld [vmem:[%s1417_s1 + $0x118] sm:$0xff]  }
  0x11   : > { %v1121_v15 = vld [vmem:[%s1247_s18 + $0x14] ss:$8 sps:$4 sm:$0xff]   ;;  %v1124_v17 = vld [vmem:[%s1247_s18 + $0x4] ss:$8 sps:$4 sm:$0xff]   ;;  %v1119_v27 = vld [vmem:[%s1247_s18 + $0x10] ss:$8 sps:$4 sm:$0xff]  }
  0x12   : > { %971 = vmatprep.mubr.msk.bf16.mxu0 %vm339_vm0, %v1121_v15  ;;  %989 = vmatprep.mubr.msk.bf16.mxu1 %vm339_vm0, %v1124_v17  ;;  %v1122_v28 = vld [vmem:[%s1247_s18] ss:$8 sps:$4 sm:$0xff]   ;;  %v1130_v30 = vld [vmem:[%s1247_s18 + $0x24] ss:$8 sps:$4 sm:$0xff]   ;;  %v1322_v34 = vld [vmem:[%s1247_s18 + $0x34] ss:$8 sps:$4 sm:$0xff]  }
  0x13   : > { %359 = vmatpush1.bf16.msra.mxu0 %v1101_v7  ;;  %508 = vmatpush1.bf16.msra.mxu1 %v1102_v8  ;;  %v1314_v32 = vld [vmem:[%s1247_s18 + $0x20] ss:$8 sps:$4 sm:$0xff]   ;;  %v1137_v36 = vld [vmem:[%s1247_s18 + $0x30] ss:$8 sps:$4 sm:$0xff]   ;;  %v1140_v38 = vld [vmem:[%s1247_s18 + $0x44] ss:$8 sps:$4 sm:$0xff]  }
  0x14   : > { %360 = vmatprep.subr.bf16.mxu0 %v1157_v1  ;;  %509 = vmatprep.subr.bf16.mxu1 %v1157_v1  ;;  %v1142_v40 = vld [vmem:[%s1247_s18 + $0x40] ss:$8 sps:$4 sm:$0xff]   ;;  %v1146_v47 = vld [vmem:[%s1247_s18 + $0x54] ss:$8 sps:$4 sm:$0xff]   ;;  %v1148_v48 = vld [vmem:[%s1247_s18 + $0x50] ss:$8 sps:$4 sm:$0xff]  }
  0x17   : > { %361 = vmatpush1.bf16.msra.mxu0 %v1103_v9  ;;  %510 = vmatpush1.bf16.msra.mxu1 %v1104_v10 }
  0x18   : > { %362 = vmatprep.subr.bf16.mxu0 %v1157_v1  ;;  %511 = vmatprep.subr.bf16.mxu1 %v1157_v1 }
  0x1b   : > { %363 = vmatpush1.bf16.msra.mxu0 %v1105_v11  ;;  %512 = vmatpush1.bf16.msra.mxu1 %v1106_v12 }
  0x1c   : > { %364 = vmatprep.subr.bf16.mxu0 %v1157_v1  ;;  %513 = vmatprep.subr.bf16.mxu1 %v1157_v1 }
  0x1f   : > { %365 = vmatpush1.bf16.msra.mxu0 %v1107_v13  ;;  %514 = vmatpush1.bf16.msra.mxu1 %v1108_v14 }
  0x20   : > { %366 = vmatprep.subr.bf16.mxu0 %v1157_v1  ;;  %515 = vmatprep.subr.bf16.mxu1 %v1157_v1 }
  0x23   : > { %367 = vmatpush1.bf16.msra.mxu0 %v1109_v16  ;;  %516 = vmatpush1.bf16.msra.mxu1 %v1110_v18 }
  0x24   : > { %368 = vmatprep.subr.bf16.mxu0 %v1157_v1  ;;  %517 = vmatprep.subr.bf16.mxu1 %v1157_v1 }
  0x27   : > { %369 = vmatpush1.bf16.msra.mxu0 %v1111_v19  ;;  %518 = vmatpush1.bf16.msra.mxu1 %v1112_v20 }
  0x28   : > { %370 = vmatprep.subr.bf16.mxu0 %v1157_v1  ;;  %519 = vmatprep.subr.bf16.mxu1 %v1157_v1 }
  0x2b   : > { %371 = vmatpush1.bf16.msra.mxu0 %v1113_v21  ;;  %520 = vmatpush1.bf16.msra.mxu1 %v1114_v22 }
  0x2c   : > { %372 = vmatprep.subr.bf16.mxu0 %v1157_v1  ;;  %521 = vmatprep.subr.bf16.mxu1 %v1157_v1 }
  0x2f   : > { %373 = vmatpush1.bf16.msra.mxu0 %v1115_v23  ;;  %522 = vmatpush1.bf16.msra.mxu1 %v1116_v24 }
  0x30   : > { %374 = vmatprep.subr.bf16.mxu0 %v1157_v1  ;;  %523 = vmatprep.subr.bf16.mxu1 %v1157_v1 }
  0x33   : > { %375 = vmatpush1.bf16.msra.mxu0 %v1117_v25  ;;  %524 = vmatpush1.bf16.msra.mxu1 %v1118_v26  ;;  %v1041_v26 = vld [vmem:[%s1418_s2] ss:$0 sm:$0xff] }
  0x34   : > { %719 = vmatprep.subr.bf16.mxu0 %v1157_v1  ;;  %1061 = vmatprep.subr.bf16.mxu1 %v1157_v1 }
  0x36   : > { %385 = vmatmul.mubr.bf16.vlgmr.msra.gmra.mrb[0].mxu0 %v1119_v27  ;;  %534 = vmatmul.mubr.bf16.vlgmr.msra.gmra.mrb[0].mxu1 %v1122_v28 }
  0x37   : > { %720 = vmatpush1.bf16.msra.mxu0 %v1125_v29  ;;  %1073 = vmatpush1.bf16.msra.mxu1 %v1125_v29 }
  0x38   : > { %721 = vmatprep.subr.bf16.mxu0 %v1157_v1  ;;  %1062 = vmatprep.subr.bf16.mxu1 %v1157_v1 }
  0x39   : > { %972 = vmatprep.mubr.msk.bf16.mxu0 %vm339_vm0, %v1130_v30  ;;  %990 = vmatprep.mubr.msk.bf16.mxu1 %vm339_vm0, %v1121_v15 }
  0x3b   : > { %722 = vmatpush1.bf16.msra.mxu0 %v1126_v31  ;;  %1074 = vmatpush1.bf16.msra.mxu1 %v1126_v31 }
  0x3c   : > { %723 = vmatprep.subr.bf16.mxu0 %v1157_v1  ;;  %1063 = vmatprep.subr.bf16.mxu1 %v1157_v1 }
  0x3e   : > { %393 = vmatmul.mubr.bf16.gmra.mrb[4].mxu0 %v1314_v32  ;;  %542 = vmatmul.mubr.bf16.gmra.mrb[4].mxu1 %v1119_v27 }
  0x3f   : > { %724 = vmatpush1.bf16.msra.mxu0 %v1127_v33  ;;  %1075 = vmatpush1.bf16.msra.mxu1 %v1127_v33 }
  0x40   : > { %725 = vmatprep.subr.bf16.mxu0 %v1157_v1  ;;  %1064 = vmatprep.subr.bf16.mxu1 %v1157_v1 }
  0x41   : > { %973 = vmatprep.mubr.msk.bf16.mxu0 %vm339_vm0, %v1322_v34  ;;  %991 = vmatprep.mubr.msk.bf16.mxu1 %vm339_vm0, %v1130_v30 }
  0x43   : > { %726 = vmatpush1.bf16.msra.mxu0 %v1128_v35  ;;  %1076 = vmatpush1.bf16.msra.mxu1 %v1128_v35 }
  0x44   : > { %727 = vmatprep.subr.bf16.mxu0 %v1157_v1  ;;  %1065 = vmatprep.subr.bf16.mxu1 %v1157_v1 }
  0x46   : > { %401 = vmatmul.mubr.bf16.gmra.mrb[8].mxu0 %v1137_v36  ;;  %550 = vmatmul.mubr.bf16.gmra.mrb[8].mxu1 %v1314_v32 }
  0x47   : > { %728 = vmatpush1.bf16.msra.mxu0 %v1129_v37  ;;  %1077 = vmatpush1.bf16.msra.mxu1 %v1129_v37 }
  0x48   : > { %729 = vmatprep.subr.bf16.mxu0 %v1157_v1  ;;  %1066 = vmatprep.subr.bf16.mxu1 %v1157_v1 }
  0x49   : > { %974 = vmatprep.mubr.msk.bf16.mxu0 %vm339_vm0, %v1140_v38  ;;  %992 = vmatprep.mubr.msk.bf16.mxu1 %vm339_vm0, %v1322_v34 }
  0x4b   : > { %730 = vmatpush1.bf16.msra.mxu0 %v1133_v39  ;;  %1078 = vmatpush1.bf16.msra.mxu1 %v1133_v39 }
  0x4c   : > { %731 = vmatprep.subr.bf16.mxu0 %v1157_v1  ;;  %1067 = vmatprep.subr.bf16.mxu1 %v1157_v1 }
  0x4e   : > { %409 = vmatmul.mubr.bf16.gmra.mrb[12].mxu0 %v1142_v40  ;;  %558 = vmatmul.mubr.bf16.gmra.mrb[12].mxu1 %v1137_v36 }
  0x4f   : > { %732 = vmatpush1.bf16.msra.mxu0 %v1134_v41  ;;  %1079 = vmatpush1.bf16.msra.mxu1 %v1134_v41 }
  0x50   : > { %733 = vmatprep.subr.bf16.mxu0 %v1157_v1  ;;  %1068 = vmatprep.subr.bf16.mxu1 %v1157_v1 }
  0x51   : > { %1037 = vmatprep.mubr.msk.bf16.mxu0 %vm339_vm0, %v1130_v30  ;;  %1039 = vmatprep.mubr.msk.bf16.mxu1 %vm339_vm0, %v1140_v38 }
  0x53   : > { %734 = vmatpush1.bf16.msra.mxu0 %v1138_v42  ;;  %1080 = vmatpush1.bf16.msra.mxu1 %v1138_v42 }
  0x54   : > { %735 = vmatprep.subr.bf16.mxu0 %v1157_v1  ;;  %1069 = vmatprep.subr.bf16.mxu1 %v1157_v1 }
  0x57   : > { %736 = vmatpush1.bf16.msra.mxu0 %v1139_v43  ;;  %1081 = vmatpush1.bf16.msra.mxu1 %v1139_v43 }
  0x58   : > { %737 = vmatprep.subr.bf16.mxu0 %v1157_v1  ;;  %1070 = vmatprep.subr.bf16.mxu1 %v1157_v1 }
  0x5b   : > { %738 = vmatpush1.bf16.msra.mxu0 %v1143_v44  ;;  %1082 = vmatpush1.bf16.msra.mxu1 %v1143_v44 }
  0x5c   : > { %739 = vmatprep.subr.bf16.mxu0 %v1157_v1  ;;  %1071 = vmatprep.subr.bf16.mxu1 %v1157_v1 }
  0x5f   : > { %740 = vmatpush1.bf16.msra.mxu0 %v1144_v45  ;;  %1083 = vmatpush1.bf16.msra.mxu1 %v1144_v45 }
  0x60   : > { %741 = vmatprep.subr.bf16.mxu0 %v1157_v1  ;;  %1072 = vmatprep.subr.bf16.mxu1 %v1157_v1 }
  0x63   : > { %742 = vmatpush1.bf16.msra.mxu0 %v1145_v46  ;;  %1084 = vmatpush1.bf16.msra.mxu1 %v1145_v46 }
  0x66   : > { %752 = vmatmul.mubr.bf16.vlgmr.msra.gmra.mrb[16].mxu0 %v1314_v32  ;;  %768 = vmatmul.mubr.bf16.vlgmr.msra.gmra.mrb[16].mxu1 %v1142_v40 }
  0x67   : > { %1038 = vmatprep.mubr.msk.bf16.mxu0 %vm339_vm0, %v1322_v34  ;;  %1040 = vmatprep.mubr.msk.bf16.mxu1 %vm339_vm0, %v1146_v47 }
  0x6e   : > { %760 = vmatmul.mubr.bf16.gmra.mrb[20].mxu0 %v1137_v36  ;;  %776 = vmatmul.mubr.bf16.gmra.mrb[20].mxu1 %v1148_v48 }
 0x109   : > { %v386_v49 = vpop.f32.mrb[0].mxu0  ;;  %v535_v50 = vpop.f32.mrb[0].mxu1 }
 0x10a   : > { %v388_v51 = vpop.f32.mrb[1].mxu0  ;;  %v536_v52 = vadd.f32 %v535_v50, %v386_v49  ;;  %v537_v53 = vpop.f32.mrb[1].mxu1 }
 0x10b   : > { %v389_v54 = vpop.f32.mrb[2].mxu0  ;;  %v538_v55 = vpop.f32.mrb[2].mxu1 }
 0x10c   : > { %v391_v56 = vpop.f32.mrb[3].mxu0  ;;  %v539_v57 = vadd.f32 %v538_v55, %v389_v54  ;;  %v540_v58 = vpop.f32.mrb[3].mxu1 }
 0x111   : > { %v394_v59 = vpop.f32.mrb[4].mxu0  ;;  %v543_v60 = vpop.f32.mrb[4].mxu1 }
 0x112   : > { %v396_v61 = vpop.f32.mrb[5].mxu0  ;;  %v544_v62 = vadd.f32 %v543_v60, %v394_v59  ;;  %v545_v63 = vpop.f32.mrb[5].mxu1 }
 0x113   : > { %v397_v0 = vpop.f32.mrb[6].mxu0  ;;  %v546_v1 = vpop.f32.mrb[6].mxu1 }
 0x114   : > { %v399_v2 = vpop.f32.mrb[7].mxu0  ;;  %v547_v3 = vadd.f32 %v546_v1, %v397_v0  ;;  %v548_v4 = vpop.f32.mrb[7].mxu1 }
 0x119   : > { %v402_v5 = vpop.f32.mrb[8].mxu0  ;;  %v551_v6 = vpop.f32.mrb[8].mxu1 }
 0x11a   : > { %v404_v7 = vpop.f32.mrb[9].mxu0  ;;  %v552_v8 = vadd.f32 %v551_v6, %v402_v5  ;;  %v553_v9 = vpop.f32.mrb[9].mxu1 }
 0x11b   : > { %v405_v10 = vpop.f32.mrb[10].mxu0  ;;  %v554_v11 = vpop.f32.mrb[10].mxu1 }
 0x11c   : > { %v407_v12 = vpop.f32.mrb[11].mxu0  ;;  %v555_v13 = vadd.f32 %v554_v11, %v405_v10  ;;  %v556_v14 = vpop.f32.mrb[11].mxu1 }
 0x121   : > { %v410_v15 = vpop.f32.mrb[12].mxu0  ;;  %v559_v16 = vpop.f32.mrb[12].mxu1 }
 0x122   : > { %v412_v17 = vpop.f32.mrb[13].mxu0  ;;  %v560_v18 = vadd.f32 %v559_v16, %v410_v15  ;;  %v561_v19 = vpop.f32.mrb[13].mxu1 }
 0x123   : > { %v413_v20 = vpop.f32.mrb[14].mxu0  ;;  %v562_v21 = vpop.f32.mrb[14].mxu1 }
 0x124   : > { %v415_v22 = vpop.f32.mrb[15].mxu0  ;;  %v563_v23 = vadd.f32 %v562_v21, %v413_v20  ;;  %v564_v24 = vpop.f32.mrb[15].mxu1 }
 0x139   : > { %v753_v25 = vpop.f32.mrb[16].mxu0  ;;  %v769_v28 = vpop.f32.mrb[16].mxu1 }
 0x13a   : > { %v784_v27 = vadd.f32 %v753_v25, %v536_v52  ;;  %v755_v29 = vpop.f32.mrb[17].mxu0  ;;  %v788_v30 = vadd.f32 %v769_v28, %v552_v8  ;;  %v771_v31 = vpop.f32.mrb[17].mxu1 }
 0x13b   : > { %v756_v32 = vpop.f32.mrb[18].mxu0  ;;  %v772_v35 = vpop.f32.mrb[18].mxu1 }
 0x13c   : > { %v799_v33 = vadd.f32 %v1041_v26, %v784_v27  ;;  %v785_v34 = vadd.f32 %v756_v32, %v539_v57  ;;  %v758_v36 = vpop.f32.mrb[19].mxu0  ;;  %v803_v37 = vadd.f32 %v1041_v26, %v788_v30  ;;  %v789_v38 = vadd.f32 %v772_v35, %v555_v13  ;;  %v774_v39 = vpop.f32.mrb[19].mxu1 }
 0x13e   : > { %v807_v40 = vmul.f32 0.2, %v799_v33  ;;  %v800_v41 = vadd.f32 %v1041_v26, %v785_v34  ;;  %v811_v42 = vmul.f32 0.2, %v803_v37  ;;  %v804_v43 = vadd.f32 %v1041_v26, %v789_v38 }
 0x140   : > { %v815_v44 = vmax.f32 %v799_v33, %v807_v40  ;;  %v808_v45 = vmul.f32 0.2, %v800_v41  ;;  %v819_v46 = vmax.f32 %v803_v37, %v811_v42  ;;  %v812_v47 = vmul.f32 0.2, %v804_v43 }
 0x141   : > { %v761_v48 = vpop.f32.mrb[20].mxu0  ;;  %v777_v52 = vpop.f32.mrb[20].mxu1 }
 0x142   : > { %v1053_v49 = vpack.c.bf16 %v815_v44, %v815_v44  ;;  %v816_v50 = vmax.f32 %v800_v41, %v808_v45  ;;  %v786_v51 = vadd.f32 %v761_v48, %v544_v62  ;;  %v763_v53 = vpop.f32.mrb[21].mxu0  ;;  %v1057_v54 = vpack.c.bf16 %v819_v46, %v819_v46  ;;  %v779_v57 = vpop.f32.mrb[21].mxu1 }
 0x143   : > { %v820_v55 = vmax.f32 %v804_v43, %v812_v47  ;;  %v790_v56 = vadd.f32 %v777_v52, %v560_v18  ;;  %v764_v58 = vpop.f32.mrb[22].mxu0  ;;  %v780_v63 = vpop.f32.mrb[22].mxu1 }
 0x144   : > { %856 = vst.msk [vmem:[%s1395_s21] sm:$0xf] %vm855_vm1, %v1053_v49  ;;  %v1054_v59 = vpack.c.bf16 %v816_v50, %v816_v50  ;;  %v801_v60 = vadd.f32 %v1041_v26, %v786_v51  ;;  %v787_v61 = vadd.f32 %v764_v58, %v547_v3  ;;  %v766_v0 = vpop.f32.mrb[23].mxu0  ;;  %860 = vst.msk [vmem:[%s1395_s21 + $0x10] sm:$0xf] %vm855_vm1, %v1057_v54  ;;  %v782_v4 = vpop.f32.mrb[23].mxu1 }
 0x145   : > { %v1058_v1 = vpack.c.bf16 %v820_v55, %v820_v55  ;;  %v805_v62 = vadd.f32 %v1041_v26, %v790_v56  ;;  %v791_v2 = vadd.f32 %v780_v63, %v563_v23 }
 0x146   : > { %857 = vst.msk [vmem:[%s1395_s21 + $0x4] sm:$0xf] %vm855_vm1, %v1054_v59  ;;  %v809_v5 = vmul.f32 0.2, %v801_v60  ;;  %v802_v6 = vadd.f32 %v1041_v26, %v787_v61 }
 0x147   : > { %861 = vst.msk [vmem:[%s1395_s21 + $0x14] sm:$0xf] %vm855_vm1, %v1058_v1  ;;  %v813_v7 = vmul.f32 0.2, %v805_v62  ;;  %v806_v3 = vadd.f32 %v1041_v26, %v791_v2 }
 0x148   : > { %v817_v8 = vmax.f32 %v801_v60, %v809_v5  ;;  %v810_v9 = vmul.f32 0.2, %v802_v6 }
 0x149   : > { %v821_v10 = vmax.f32 %v805_v62, %v813_v7  ;;  %v814_v11 = vmul.f32 0.2, %v806_v3 }
 0x14a   : > { %v1055_v12 = vpack.c.bf16 %v817_v8, %v817_v8  ;;  %v818_v13 = vmax.f32 %v802_v6, %v810_v9 }
 0x14b   : > { %v1059_v14 = vpack.c.bf16 %v821_v10, %v821_v10  ;;  %v822_v15 = vmax.f32 %v806_v3, %v814_v11 }
 0x14c   : > { %858 = vst.msk [vmem:[%s1395_s21 + $0x8] sm:$0xf] %vm855_vm1, %v1055_v12  ;;  %v1056_v16 = vpack.c.bf16 %v818_v13, %v818_v13 }
 0x14d   : > { %862 = vst.msk [vmem:[%s1395_s21 + $0x18] sm:$0xf] %vm855_vm1, %v1059_v14  ;;  %v1060_v17 = vpack.c.bf16 %v822_v15, %v822_v15 }
 0x14e   : > { %859 = vst.msk [vmem:[%s1395_s21 + $0xc] sm:$0xf] %vm855_vm1, %v1056_v16 }
 0x14f   : > { %863 = vst.msk [vmem:[%s1395_s21 + $0x1c] sm:$0xf] %vm855_vm1, %v1060_v17 }
 0x150 PF: > { %s13_s12 = sadd.s32 1, %s1155_s12  }
 0x151   : > { %p10_p4 = scmp.ge.s32.totalorder %s13_s12, 4  }
 0x153   :  { %12 = sbr.rel (!%p10_p4) target bundleno = 1 (0x1), region = 64 }

// kernel: _lambda_.12
= control target key start
LH: loop header
LB: loop body
LE: loop exit
PB: predicated region body
PF: predicated region fallthrough
CT: control target
= control target key end

     0   :  { %s1044_s12 = smov 0   ;;  %s1246_s0 = inlined_call_operand.vmem [shape: bf16[2,2,48,192], index: 0, kind: input, shape index: {}]   ;;  %s1247_s1 = inlined_call_operand.vmem [shape: bf16[3,192,128], index: 1, kind: input, shape index: {}]   ;;  %s1248_s2 = inlined_call_operand.vmem [shape: f32[1,128], index: 2, kind: input, shape index: {}]   ;;  %s1249_s3 = inlined_call_operand.vmem [shape: bf16[2,32,128], index: 3, kind: output, shape index: {}]  }
   0x1 LB: > { %s793_s13 = sadd.s32 4294967295, %s1021_s12   ;;  %p797_p0 = scmp.ge.s32.totalorder %s1021_s12, 1  ;;  %s1021_s12 = sphi %s1044_s12, %s13_s12  }
   0x2   : > { %p137_p1 = scmp.lt.s32.totalorder %s1021_s12, 3 }
   0x4   : > { %p138_p2 = pnand %p797_p0, %p137_p1 }
   0x5   : > { %v964_v0 = vld [vmem:[%s1247_s1 + $0x60] sm:$0xff] (!%p138_p2)   ;;  %v1023_v1 = vmov (!%p138_p2), 0   ;;  %v966_v3 = vld [vmem:[%s1247_s1 + $0x68] sm:$0xff] (!%p138_p2)   ;;  %v968_v5 = vld [vmem:[%s1247_s1 + $0x70] sm:$0xff] (!%p138_p2)   ;;  %p161_p3 = scmp.lt.s32.totalorder (!%p138_p2), %s793_s13, 1  ;;  %vm320_vm0 = vcmask (!%p138_p2), 523264  }
   0x6   : > { %141 = sbr.rel (%p138_p2) target bundleno = 327 (0x147), region = 32  ;;  %327 = vmatprep.subr.bf16.mxu0 (!%p138_p2), %v1023_v1  ;;  %472 = vmatprep.subr.bf16.mxu1 (!%p138_p2), %v1023_v1  ;;  %v965_v2 = vld [vmem:[%s1247_s1] sm:$0xff] (!%p138_p2)   ;;  %v967_v4 = vld [vmem:[%s1247_s1 + $0x8] sm:$0xff] (!%p138_p2)   ;;  %v969_v6 = vld [vmem:[%s1247_s1 + $0x10] sm:$0xff] (!%p138_p2)  }
   0x7   : > { %328 = vmatpush1.bf16.msra.mxu0 (!%p138_p2), %v964_v0  ;;  %473 = vmatpush1.bf16.msra.mxu1 (!%p138_p2), %v965_v2  ;;  %v970_v7 = vld [vmem:[%s1247_s1 + $0x78] sm:$0xff] (!%p138_p2)   ;;  %v972_v9 = vld [vmem:[%s1247_s1 + $0x80] sm:$0xff] (!%p138_p2)   ;;  %v974_v11 = vld [vmem:[%s1247_s1 + $0x88] sm:$0xff] (!%p138_p2)  }
   0x8   : > { %329 = vmatprep.subr.bf16.mxu0 (!%p138_p2), %v1023_v1  ;;  %474 = vmatprep.subr.bf16.mxu1 (!%p138_p2), %v1023_v1  ;;  %v971_v8 = vld [vmem:[%s1247_s1 + $0x18] sm:$0xff] (!%p138_p2)   ;;  %v973_v10 = vld [vmem:[%s1247_s1 + $0x20] sm:$0xff] (!%p138_p2)   ;;  %v975_v12 = vld [vmem:[%s1247_s1 + $0x28] sm:$0xff] (!%p138_p2)  }
   0x9   : > { %v976_v13 = vld [vmem:[%s1247_s1 + $0x90] sm:$0xff] (!%p138_p2)   ;;  %v978_v16 = vld [vmem:[%s1247_s1 + $0x98] sm:$0xff] (!%p138_p2)   ;;  %v980_v19 = vld [vmem:[%s1247_s1 + $0xa0] sm:$0xff] (!%p138_p2)  }
   0xa   : > { %v977_v14 = vld [vmem:[%s1247_s1 + $0x30] sm:$0xff] (!%p138_p2)   ;;  %v979_v18 = vld [vmem:[%s1247_s1 + $0x38] sm:$0xff] (!%p138_p2)   ;;  %v981_v20 = vld [vmem:[%s1247_s1 + $0x40] sm:$0xff] (!%p138_p2)  }
   0xb   : > { %330 = vmatpush1.bf16.msra.mxu0 (!%p138_p2), %v966_v3  ;;  %475 = vmatpush1.bf16.msra.mxu1 (!%p138_p2), %v967_v4  ;;  %v982_v21 = vld [vmem:[%s1247_s1 + $0xa8] sm:$0xff] (!%p138_p2)   ;;  %v984_v23 = vld [vmem:[%s1247_s1 + $0xb0] sm:$0xff] (!%p138_p2)   ;;  %v986_v25 = vld [vmem:[%s1247_s1 + $0xb8] sm:$0xff] (!%p138_p2)  }
   0xc   : > { %331 = vmatprep.subr.bf16.mxu0 (!%p138_p2), %v1023_v1  ;;  %476 = vmatprep.subr.bf16.mxu1 (!%p138_p2), %v1023_v1  ;;  %v983_v22 = vld [vmem:[%s1247_s1 + $0x48] sm:$0xff] (!%p138_p2)   ;;  %v985_v24 = vld [vmem:[%s1247_s1 + $0x50] sm:$0xff] (!%p138_p2)   ;;  %v987_v26 = vld [vmem:[%s1247_s1 + $0x58] sm:$0xff] (!%p138_p2)  }
   0xd   : > { %s1251_s13 = smov (!%p161_p3, %s793_s13), 1  ;;  %v994_v29 = vld [vmem:[%s1247_s1 + $0xc0] sm:$0xff]   ;;  %v995_v32 = vld [vmem:[%s1247_s1 + $0xc8] sm:$0xff]   ;;  %v996_v34 = vld [vmem:[%s1247_s1 + $0xd0] sm:$0xff]  }
   0xe   : > { %s954_s9 = smul.u32 96, %s1251_s13  ;;  %v997_v37 = vld [vmem:[%s1247_s1 + $0xd8] sm:$0xff]   ;;  %v998_v38 = vld [vmem:[%s1247_s1 + $0xe0] sm:$0xff]   ;;  %v999_v39 = vld [vmem:[%s1247_s1 + $0xe8] sm:$0xff]   ;;  %s914_s17 = sshll.u32 %s1251_s13, 4 }
   0xf   : > { %332 = vmatpush1.bf16.msra.mxu0 %v968_v5  ;;  %477 = vmatpush1.bf16.msra.mxu1 %v969_v6  ;;  %v1000_v40 = vld [vmem:[%s1247_s1 + $0xf0] sm:$0xff]   ;;  %v1001_v41 = vld [vmem:[%s1247_s1 + $0xf8] sm:$0xff]   ;;  %v1002_v42 = vld [vmem:[%s1247_s1 + $0x100] sm:$0xff]   ;;  %s170_s21 = scalar_lea.vmem %s1249_s3, %s914_s17 }
  0x10   : > { %333 = vmatprep.subr.bf16.mxu0 %v1023_v1  ;;  %478 = vmatprep.subr.bf16.mxu1 %v1023_v1  ;;  %s1113_s18 = scalar_lea.vmem %s1246_s0, %s954_s9  ;;  %v1009_v43 = vld [vmem:[%s1247_s1 + $0x108] sm:$0xff]   ;;  %v1010_v44 = vld [vmem:[%s1247_s1 + $0x110] sm:$0xff]   ;;  %v1011_v45 = vld [vmem:[%s1247_s1 + $0x118] sm:$0xff]  }
  0x11   : > { %v990_v15 = vld [vmem:[%s1113_s18 + $0x34] ss:$8 sps:$4 sm:$0xff]   ;;  %v993_v17 = vld [vmem:[%s1113_s18 + $0x4] ss:$8 sps:$4 sm:$0xff]   ;;  %v988_v27 = vld [vmem:[%s1113_s18 + $0x30] ss:$8 sps:$4 sm:$0xff]  }
  0x12   : > { %845 = vmatprep.mubr.msk.bf16.mxu0 %vm320_vm0, %v990_v15  ;;  %863 = vmatprep.mubr.msk.bf16.mxu1 %vm320_vm0, %v993_v17  ;;  %v991_v28 = vld [vmem:[%s1113_s18] ss:$8 sps:$4 sm:$0xff]   ;;  %v1003_v30 = vld [vmem:[%s1113_s18 + $0x44] ss:$8 sps:$4 sm:$0xff]   ;;  %v1005_v31 = vld [vmem:[%s1113_s18 + $0x14] ss:$8 sps:$4 sm:$0xff]  }
  0x13   : > { %334 = vmatpush1.bf16.msra.mxu0 %v970_v7  ;;  %479 = vmatpush1.bf16.msra.mxu1 %v971_v8  ;;  %v1007_v33 = vld [vmem:[%s1113_s18 + $0x40] ss:$8 sps:$4 sm:$0xff]   ;;  %v1008_v35 = vld [vmem:[%s1113_s18 + $0x10] ss:$8 sps:$4 sm:$0xff]   ;;  %v1014_v36 = vld [vmem:[%s1113_s18 + $0x24] ss:$8 sps:$4 sm:$0xff]  }
  0x14   : > { %335 = vmatprep.subr.bf16.mxu0 %v1023_v1  ;;  %480 = vmatprep.subr.bf16.mxu1 %v1023_v1  ;;  %v1012_v46 = vld [vmem:[%s1113_s18 + $0x20] ss:$8 sps:$4 sm:$0xff]  }
  0x15   : > { %v907_v4 = vld [vmem:[%s1248_s2] ss:$0 sm:$0xff] }
  0x17   : > { %336 = vmatpush1.bf16.msra.mxu0 %v972_v9  ;;  %481 = vmatpush1.bf16.msra.mxu1 %v973_v10 }
  0x18   : > { %337 = vmatprep.subr.bf16.mxu0 %v1023_v1  ;;  %482 = vmatprep.subr.bf16.mxu1 %v1023_v1 }
  0x1b   : > { %338 = vmatpush1.bf16.msra.mxu0 %v974_v11  ;;  %483 = vmatpush1.bf16.msra.mxu1 %v975_v12 }
  0x1c   : > { %339 = vmatprep.subr.bf16.mxu0 %v1023_v1  ;;  %484 = vmatprep.subr.bf16.mxu1 %v1023_v1 }
  0x1f   : > { %340 = vmatpush1.bf16.msra.mxu0 %v976_v13  ;;  %485 = vmatpush1.bf16.msra.mxu1 %v977_v14 }
  0x20   : > { %341 = vmatprep.subr.bf16.mxu0 %v1023_v1  ;;  %486 = vmatprep.subr.bf16.mxu1 %v1023_v1 }
  0x23   : > { %342 = vmatpush1.bf16.msra.mxu0 %v978_v16  ;;  %487 = vmatpush1.bf16.msra.mxu1 %v979_v18 }
  0x24   : > { %343 = vmatprep.subr.bf16.mxu0 %v1023_v1  ;;  %488 = vmatprep.subr.bf16.mxu1 %v1023_v1 }
  0x27   : > { %344 = vmatpush1.bf16.msra.mxu0 %v980_v19  ;;  %489 = vmatpush1.bf16.msra.mxu1 %v981_v20 }
  0x28   : > { %345 = vmatprep.subr.bf16.mxu0 %v1023_v1  ;;  %490 = vmatprep.subr.bf16.mxu1 %v1023_v1 }
  0x2b   : > { %346 = vmatpush1.bf16.msra.mxu0 %v982_v21  ;;  %491 = vmatpush1.bf16.msra.mxu1 %v983_v22 }
  0x2c   : > { %347 = vmatprep.subr.bf16.mxu0 %v1023_v1  ;;  %492 = vmatprep.subr.bf16.mxu1 %v1023_v1 }
  0x2f   : > { %348 = vmatpush1.bf16.msra.mxu0 %v984_v23  ;;  %493 = vmatpush1.bf16.msra.mxu1 %v985_v24 }
  0x30   : > { %349 = vmatprep.subr.bf16.mxu0 %v1023_v1  ;;  %494 = vmatprep.subr.bf16.mxu1 %v1023_v1 }
  0x33   : > { %350 = vmatpush1.bf16.msra.mxu0 %v986_v25  ;;  %495 = vmatpush1.bf16.msra.mxu1 %v987_v26 }
  0x34   : > { %646 = vmatprep.subr.bf16.mxu0 %v1023_v1  ;;  %930 = vmatprep.subr.bf16.mxu1 %v1023_v1 }
  0x36   : > { %360 = vmatmul.mubr.bf16.vlgmr.msra.gmra.mrb[0].mxu0 %v988_v27  ;;  %505 = vmatmul.mubr.bf16.vlgmr.msra.gmra.mrb[0].mxu1 %v991_v28 }
  0x37   : > { %647 = vmatpush1.bf16.msra.mxu0 %v994_v29  ;;  %942 = vmatpush1.bf16.msra.mxu1 %v994_v29 }
  0x38   : > { %648 = vmatprep.subr.bf16.mxu0 %v1023_v1  ;;  %931 = vmatprep.subr.bf16.mxu1 %v1023_v1 }
  0x39   : > { %846 = vmatprep.mubr.msk.bf16.mxu0 %vm320_vm0, %v1003_v30  ;;  %864 = vmatprep.mubr.msk.bf16.mxu1 %vm320_vm0, %v1005_v31 }
  0x3b   : > { %649 = vmatpush1.bf16.msra.mxu0 %v995_v32  ;;  %943 = vmatpush1.bf16.msra.mxu1 %v995_v32 }
  0x3c   : > { %650 = vmatprep.subr.bf16.mxu0 %v1023_v1  ;;  %932 = vmatprep.subr.bf16.mxu1 %v1023_v1 }
  0x3e   : > { %368 = vmatmul.mubr.bf16.gmra.mrb[4].mxu0 %v1007_v33  ;;  %513 = vmatmul.mubr.bf16.gmra.mrb[4].mxu1 %v1008_v35 }
  0x3f   : > { %651 = vmatpush1.bf16.msra.mxu0 %v996_v34  ;;  %944 = vmatpush1.bf16.msra.mxu1 %v996_v34 }
  0x40   : > { %652 = vmatprep.subr.bf16.mxu0 %v1023_v1  ;;  %933 = vmatprep.subr.bf16.mxu1 %v1023_v1 }
  0x41   : > { %905 = vmatprep.mubr.msk.bf16.mxu0 %vm320_vm0, %v1005_v31  ;;  %906 = vmatprep.mubr.msk.bf16.mxu1 %vm320_vm0, %v1014_v36 }
  0x43   : > { %653 = vmatpush1.bf16.msra.mxu0 %v997_v37  ;;  %945 = vmatpush1.bf16.msra.mxu1 %v997_v37 }
  0x44   : > { %654 = vmatprep.subr.bf16.mxu0 %v1023_v1  ;;  %934 = vmatprep.subr.bf16.mxu1 %v1023_v1 }
  0x47   : > { %655 = vmatpush1.bf16.msra.mxu0 %v998_v38  ;;  %946 = vmatpush1.bf16.msra.mxu1 %v998_v38 }
  0x48   : > { %656 = vmatprep.subr.bf16.mxu0 %v1023_v1  ;;  %935 = vmatprep.subr.bf16.mxu1 %v1023_v1 }
  0x4b   : > { %657 = vmatpush1.bf16.msra.mxu0 %v999_v39  ;;  %947 = vmatpush1.bf16.msra.mxu1 %v999_v39 }
  0x4c   : > { %658 = vmatprep.subr.bf16.mxu0 %v1023_v1  ;;  %936 = vmatprep.subr.bf16.mxu1 %v1023_v1 }
  0x4f   : > { %659 = vmatpush1.bf16.msra.mxu0 %v1000_v40  ;;  %948 = vmatpush1.bf16.msra.mxu1 %v1000_v40 }
  0x50   : > { %660 = vmatprep.subr.bf16.mxu0 %v1023_v1  ;;  %937 = vmatprep.subr.bf16.mxu1 %v1023_v1 }
  0x53   : > { %661 = vmatpush1.bf16.msra.mxu0 %v1001_v41  ;;  %949 = vmatpush1.bf16.msra.mxu1 %v1001_v41 }
  0x54   : > { %662 = vmatprep.subr.bf16.mxu0 %v1023_v1  ;;  %938 = vmatprep.subr.bf16.mxu1 %v1023_v1 }
  0x57   : > { %663 = vmatpush1.bf16.msra.mxu0 %v1002_v42  ;;  %950 = vmatpush1.bf16.msra.mxu1 %v1002_v42 }
  0x58   : > { %664 = vmatprep.subr.bf16.mxu0 %v1023_v1  ;;  %939 = vmatprep.subr.bf16.mxu1 %v1023_v1 }
  0x5b   : > { %665 = vmatpush1.bf16.msra.mxu0 %v1009_v43  ;;  %951 = vmatpush1.bf16.msra.mxu1 %v1009_v43 }
  0x5c   : > { %666 = vmatprep.subr.bf16.mxu0 %v1023_v1  ;;  %940 = vmatprep.subr.bf16.mxu1 %v1023_v1 }
  0x5f   : > { %667 = vmatpush1.bf16.msra.mxu0 %v1010_v44  ;;  %952 = vmatpush1.bf16.msra.mxu1 %v1010_v44 }
  0x60   : > { %668 = vmatprep.subr.bf16.mxu0 %v1023_v1  ;;  %941 = vmatprep.subr.bf16.mxu1 %v1023_v1 }
  0x63   : > { %669 = vmatpush1.bf16.msra.mxu0 %v1011_v45  ;;  %953 = vmatpush1.bf16.msra.mxu1 %v1011_v45 }
  0x66   : > { %679 = vmatmul.mubr.bf16.vlgmr.msra.gmra.mrb[8].mxu0 %v1008_v35  ;;  %687 = vmatmul.mubr.bf16.vlgmr.msra.gmra.mrb[8].mxu1 %v1012_v46 }
 0x109   : > { %v361_v47 = vpop.f32.mrb[0].mxu0  ;;  %v506_v48 = vpop.f32.mrb[0].mxu1 }
 0x10a   : > { %v363_v49 = vpop.f32.mrb[1].mxu0  ;;  %v507_v50 = vadd.f32 %v506_v48, %v361_v47  ;;  %v508_v51 = vpop.f32.mrb[1].mxu1 }
 0x10b   : > { %v364_v52 = vpop.f32.mrb[2].mxu0  ;;  %v509_v53 = vpop.f32.mrb[2].mxu1 }
 0x10c   : > { %v366_v54 = vpop.f32.mrb[3].mxu0  ;;  %v510_v55 = vadd.f32 %v509_v53, %v364_v52  ;;  %v511_v56 = vpop.f32.mrb[3].mxu1 }
 0x111   : > { %v369_v57 = vpop.f32.mrb[4].mxu0  ;;  %v514_v58 = vpop.f32.mrb[4].mxu1 }
 0x112   : > { %v371_v59 = vpop.f32.mrb[5].mxu0  ;;  %v515_v60 = vadd.f32 %v514_v58, %v369_v57  ;;  %v516_v61 = vpop.f32.mrb[5].mxu1 }
 0x113   : > { %v372_v62 = vpop.f32.mrb[6].mxu0  ;;  %v517_v63 = vpop.f32.mrb[6].mxu1 }
 0x114   : > { %v374_v0 = vpop.f32.mrb[7].mxu0  ;;  %v518_v1 = vadd.f32 %v517_v63, %v372_v62  ;;  %v519_v2 = vpop.f32.mrb[7].mxu1 }
 0x139   : > { %v680_v3 = vpop.f32.mrb[8].mxu0  ;;  %v688_v6 = vpop.f32.mrb[8].mxu1 }
 0x13a   : > { %v695_v5 = vadd.f32 %v680_v3, %v507_v50  ;;  %v682_v7 = vpop.f32.mrb[9].mxu0  ;;  %v697_v8 = vadd.f32 %v688_v6, %v515_v60  ;;  %v690_v9 = vpop.f32.mrb[9].mxu1 }
 0x13b   : > { %v683_v10 = vpop.f32.mrb[10].mxu0  ;;  %v691_v13 = vpop.f32.mrb[10].mxu1 }
 0x13c   : > { %v706_v11 = vadd.f32 %v907_v4, %v695_v5  ;;  %v696_v12 = vadd.f32 %v683_v10, %v510_v55  ;;  %v685_v14 = vpop.f32.mrb[11].mxu0  ;;  %v708_v15 = vadd.f32 %v907_v4, %v697_v8  ;;  %v698_v16 = vadd.f32 %v691_v13, %v518_v1  ;;  %v693_v17 = vpop.f32.mrb[11].mxu1 }
 0x13e   : > { %v710_v18 = vmul.f32 0.2, %v706_v11  ;;  %v707_v19 = vadd.f32 %v907_v4, %v696_v12  ;;  %v712_v20 = vmul.f32 0.2, %v708_v15  ;;  %v709_v21 = vadd.f32 %v907_v4, %v698_v16 }
 0x140   : > { %v711_v22 = vmul.f32 0.2, %v707_v19  ;;  %v713_v23 = vmul.f32 0.2, %v709_v21  ;;  %v714_v24 = vmax.f32 %v706_v11, %v710_v18  ;;  %v716_v26 = vmax.f32 %v708_v15, %v712_v20 }
 0x142   : > { %v715_v25 = vmax.f32 %v707_v19, %v711_v22  ;;  %v717_v27 = vmax.f32 %v709_v21, %v713_v23 }
 0x144   : > { %v922_v28 = vpack.c.bf16 %v715_v25, %v714_v24  ;;  %v927_v29 = vpack.c.bf16 %v717_v27, %v716_v26 }
 0x146   : > { %923 = vst [vmem:[%s170_s21] sm:$0xff] %v922_v28   ;;  %929 = vst [vmem:[%s170_s21 + $0x8] sm:$0xff] %v927_v29  }
 0x147 PF: > { %s13_s12 = sadd.s32 1, %s1021_s12  }
 0x148   : > { %p10_p4 = scmp.ge.s32.totalorder %s13_s12, 4  }
 0x14a   :  { %12 = sbr.rel (!%p10_p4) target bundleno = 1 (0x1), region = 65 }

// kernel: _lambda_.13
= control target key start
LH: loop header
LB: loop body
LE: loop exit
PB: predicated region body
PF: predicated region fallthrough
CT: control target
= control target key end

     0   :  { %s1943_s23 = smov 0   ;;  %s2230_s0 = inlined_call_operand.vmem [shape: bf16[2,1,64,384], index: 0, kind: input, shape index: {}]   ;;  %s2231_s1 = inlined_call_operand.vmem [shape: bf16[3,384,128], index: 1, kind: input, shape index: {}]   ;;  %s2232_s2 = inlined_call_operand.vmem [shape: f32[1,128], index: 2, kind: input, shape index: {}]   ;;  %s2233_s3 = inlined_call_operand.vmem [shape: f32[1,32], index: 3, kind: input, shape index: {}]   ;;  %s2234_s4 = inlined_call_operand.vmem [shape: f32[1,128], index: 4, kind: input, shape index: {}]   ;;  %s2235_s5 = inlined_call_operand.<no memory space> [shape: f32[1,1], index: 5, kind: input, shape index: {}]   ;;  %s2236_s6 = inlined_call_operand.vmem [shape: f32[2,1,1], index: 6, kind: output, shape index: {}]  }
   0x1   :  { %v11_v0 = vstv %s2235_s5 }
   0x2   :  { %12 = vst [vmem:[#allocation2] sm:$0x1] %v11_v0 }
   0x3 LB: > { %s1384_s24 = sadd.s32 4294967295, %s1900_s23   ;;  %p1388_p0 = scmp.ge.s32.totalorder %s1900_s23, 1  ;;  %s1900_s23 = sphi %s1943_s23, %s18_s23  }
   0x4   : > { %p214_p1 = scmp.lt.s32.totalorder %s1900_s23, 3 }
   0x6   : > { %p215_p2 = pnand %p1388_p0, %p214_p1 }
   0x7   : > { %v1805_v1 = vld [vmem:[%s2231_s1 + $0x100] sm:$0xff] (!%p215_p2)   ;;  %v1808_v4 = vld [vmem:[%s2231_s1 + $0x108] sm:$0xff] (!%p215_p2)   ;;  %v1811_v7 = vld [vmem:[%s2231_s1 + $0x110] sm:$0xff] (!%p215_p2)   ;;  %p242_p3 = scmp.lt.s32.totalorder (!%p215_p2), %s1384_s24, 1  ;;  %vm1903_vm0 = vmmov (!%p215_p2), 0   ;;  %vm1253_vm1 = vcmask (!%p215_p2), 261120  }
   0x8   : > { %218 = sbr.rel (%p215_p2) target bundleno = 705 (0x2c1), region = 44  ;;  %v1806_v2 = vld [vmem:[%s2231_s1 + $0x140] sm:$0xff] (!%p215_p2)   ;;  %1577 = vmatprep.subr.bf16.mxu0 (!%p215_p2), %v1805_v1  ;;  %v1809_v5 = vld [vmem:[%s2231_s1 + $0x148] sm:$0xff] (!%p215_p2)   ;;  %v1812_v8 = vld [vmem:[%s2231_s1 + $0x150] sm:$0xff] (!%p215_p2)   ;;  %vm1329_vm2 = vcmask (!%p215_p2), 1040384   ;;  %vm1335_vm3 = vcmask (!%p215_p2), 0  }
   0x9   : > { %v1807_v3 = vld [vmem:[%s2231_s1 + $0xc0] sm:$0xff] (!%p215_p2)   ;;  %1696 = vmatprep.subr.bf16.mxu1 (!%p215_p2), %v1806_v2  ;;  %v1810_v6 = vld [vmem:[%s2231_s1 + $0xc8] sm:$0xff] (!%p215_p2)   ;;  %v1813_v9 = vld [vmem:[%s2231_s1 + $0xd0] sm:$0xff] (!%p215_p2)  }
   0xa   : > { %1578 = vmatpush3.bf16.msra.mxu0 (!%p215_p2), %v1807_v3  ;;  %1697 = vmatpush3.bf16.msra.mxu1 (!%p215_p2), %v1806_v2  ;;  %v1814_v10 = vld [vmem:[%s2231_s1 + $0x118] sm:$0xff] (!%p215_p2)   ;;  %v1817_v13 = vld [vmem:[%s2231_s1 + $0x120] sm:$0xff] (!%p215_p2)   ;;  %v1820_v16 = vld [vmem:[%s2231_s1 + $0x128] sm:$0xff] (!%p215_p2)  }
   0xb   : > { %1579 = vmatprep.subr.bf16.mxu0 (!%p215_p2), %v1808_v4  ;;  %1698 = vmatprep.subr.bf16.mxu1 (!%p215_p2), %v1809_v5  ;;  %v1815_v11 = vld [vmem:[%s2231_s1 + $0x158] sm:$0xff] (!%p215_p2)   ;;  %v1818_v14 = vld [vmem:[%s2231_s1 + $0x160] sm:$0xff] (!%p215_p2)   ;;  %v1821_v17 = vld [vmem:[%s2231_s1 + $0x168] sm:$0xff] (!%p215_p2)  }
   0xc   : > { %v1816_v12 = vld [vmem:[%s2231_s1 + $0xd8] sm:$0xff] (!%p215_p2)   ;;  %v1819_v15 = vld [vmem:[%s2231_s1 + $0xe0] sm:$0xff] (!%p215_p2)   ;;  %v1822_v18 = vld [vmem:[%s2231_s1 + $0xe8] sm:$0xff] (!%p215_p2)  }
   0xd   : > { %v1823_v19 = vld [vmem:[%s2231_s1 + $0x130] sm:$0xff] (!%p215_p2)   ;;  %v1826_v22 = vld [vmem:[%s2231_s1 + $0x138] sm:$0xff] (!%p215_p2)   ;;  %v1833_v27 = vld [vmem:[%s2231_s1 + $0x40] sm:$0xff] (!%p215_p2)  }
   0xe   : > { %1580 = vmatpush3.bf16.msra.mxu0 (!%p215_p2), %v1810_v6  ;;  %1699 = vmatpush3.bf16.msra.mxu1 (!%p215_p2), %v1809_v5  ;;  %v1824_v20 = vld [vmem:[%s2231_s1 + $0x170] sm:$0xff] (!%p215_p2)   ;;  %v1827_v23 = vld [vmem:[%s2231_s1 + $0x178] sm:$0xff] (!%p215_p2)   ;;  %v1834_v29 = vld [vmem:[%s2231_s1 + $0x80] sm:$0xff] (!%p215_p2)  }
   0xf   : > { %1581 = vmatprep.subr.bf16.mxu0 %v1811_v7  ;;  %1700 = vmatprep.subr.bf16.mxu1 %v1812_v8  ;;  %s2238_s24 = smov (!%p242_p3, %s1384_s24), 1  ;;  %v1825_v21 = vld [vmem:[%s2231_s1 + $0xf0] sm:$0xff]   ;;  %v1828_v26 = vld [vmem:[%s2231_s1 + $0xf8] sm:$0xff]   ;;  %v1836_v31 = vld [vmem:[%s2231_s1] sm:$0xff]  }
  0x10   : > { %s1793_s11 = smul.u32 96, %s2238_s24  ;;  %v1837_v32 = vld [vmem:[%s2231_s1 + $0x48] sm:$0xff]   ;;  %v1840_v35 = vld [vmem:[%s2231_s1 + $0x50] sm:$0xff]   ;;  %v1843_v38 = vld [vmem:[%s2231_s1 + $0x58] sm:$0xff]   ;;  %s249_s21 = scalar_lea.vmem %s2236_s6, %s2238_s24 }
  0x11   : > { %v1838_v33 = vld [vmem:[%s2231_s1 + $0x88] sm:$0xff]   ;;  %v1841_v36 = vld [vmem:[%s2231_s1 + $0x90] sm:$0xff]   ;;  %v1844_v39 = vld [vmem:[%s2231_s1 + $0x98] sm:$0xff]  }
  0x12   : > { %1582 = vmatpush3.bf16.msra.mxu0 %v1813_v9  ;;  %1701 = vmatpush3.bf16.msra.mxu1 %v1812_v8  ;;  %s2024_s22 = scalar_lea.vmem %s2230_s0, %s1793_s11  ;;  %v1839_v34 = vld [vmem:[%s2231_s1 + $0x8] sm:$0xff]   ;;  %v1842_v37 = vld [vmem:[%s2231_s1 + $0x10] sm:$0xff]   ;;  %v1845_v40 = vld [vmem:[%s2231_s1 + $0x18] sm:$0xff]  }
  0x13   : > { %1583 = vmatprep.subr.bf16.mxu0 %v1814_v10  ;;  %1702 = vmatprep.subr.bf16.mxu1 %v1815_v11  ;;  %v2033_v24 = vld [vmem:[%s2024_s22 + $0x1c] ss:$12 sps:$4 sm:$0xff]   ;;  %v2036_v25 = vld [vmem:[%s2024_s22 + $0x20] ss:$12 sps:$4 sm:$0xff]   ;;  %v2046_v28 = vld [vmem:[%s2024_s22 + $0x18] ss:$12 sps:$4 sm:$0xff]  }
  0x14   : > { %568 = vmatprep.mubr.bf16.mxu0 %v2033_v24  ;;  %1712 = vmatprep.mubr.bf16.mxu1 %v2036_v25  ;;  %v1835_v30 = vld [vmem:[%s2024_s22 + $0x38] ss:$12 sps:$4 sm:$0xff]   ;;  %v2091_v43 = vld [vmem:[%s2024_s22 + $0x34] ss:$12 sps:$4 sm:$0xff]   ;;  %v2094_v44 = vld [vmem:[%s2024_s22 + $0x30] ss:$12 sps:$4 sm:$0xff]  }
  0x15   : > { %v1846_v41 = vld [vmem:[%s2231_s1 + $0x60] sm:$0xff]   ;;  %v1849_v46 = vld [vmem:[%s2231_s1 + $0x68] sm:$0xff]   ;;  %v1855_v49 = vld [vmem:[%s2231_s1 + $0x70] sm:$0xff]  }
  0x16   : > { %1584 = vmatpush3.bf16.msra.mxu0 %v1816_v12  ;;  %1703 = vmatpush3.bf16.msra.mxu1 %v1815_v11  ;;  %v1847_v42 = vld [vmem:[%s2231_s1 + $0xa0] sm:$0xff]   ;;  %v1850_v47 = vld [vmem:[%s2231_s1 + $0xa8] sm:$0xff]   ;;  %v1856_v50 = vld [vmem:[%s2231_s1 + $0xb0] sm:$0xff]  }
  0x17   : > { %1585 = vmatprep.subr.bf16.mxu0 %v1817_v13  ;;  %1704 = vmatprep.subr.bf16.mxu1 %v1818_v14  ;;  %v1848_v45 = vld [vmem:[%s2231_s1 + $0x20] sm:$0xff]   ;;  %v1853_v48 = vld [vmem:[%s2231_s1 + $0x28] sm:$0xff]   ;;  %v1857_v53 = vld [vmem:[%s2231_s1 + $0x30] sm:$0xff]  }
  0x18   : > { %v1863_v51 = vld [vmem:[%s2024_s22 + $0x4] ss:$12 sps:$4 sm:$0xff]   ;;  %v1864_v52 = vld [vmem:[%s2024_s22 + $0x8] ss:$12 sps:$4 sm:$0xff]   ;;  %v1858_v54 = vld [vmem:[%s2231_s1 + $0x78] sm:$0xff]  }
  0x19   : > { %v1859_v55 = vld [vmem:[%s2231_s1 + $0xb8] sm:$0xff]   ;;  %v1865_v57 = vld [vmem:[%s2231_s1 + $0x1c0] sm:$0xff]   ;;  %v1868_v61 = vld [vmem:[%s2231_s1 + $0x1c8] sm:$0xff]  }
  0x1a   : > { %1586 = vmatpush3.bf16.msra.mxu0 %v1819_v15  ;;  %1705 = vmatpush3.bf16.msra.mxu1 %v1818_v14  ;;  %v1860_v56 = vld [vmem:[%s2231_s1 + $0x38] sm:$0xff]   ;;  %v1866_v58 = vld [vmem:[%s2231_s1 + $0x200] sm:$0xff]   ;;  %v1869_v62 = vld [vmem:[%s2231_s1 + $0x208] sm:$0xff]  }
  0x1b   : > { %1587 = vmatprep.subr.bf16.mxu0 %v1820_v16  ;;  %1706 = vmatprep.subr.bf16.mxu1 %v1821_v17  ;;  %v1861_v59 = vld [vmem:[%s2024_s22] ss:$12 sps:$4 sm:$0xff]   ;;  %v1871_v0 = vld [vmem:[%s2231_s1 + $0x1d0] sm:$0xff]   ;;  %v1874_v3 = vld [vmem:[%s2231_s1 + $0x1d8] sm:$0xff]  }
  0x1c   : > { %v1867_v60 = vld [vmem:[%s2231_s1 + $0x180] sm:$0xff]   ;;  %v1870_v63 = vld [vmem:[%s2231_s1 + $0x188] sm:$0xff]   ;;  %v1872_v1 = vld [vmem:[%s2231_s1 + $0x210] sm:$0xff]  }
  0x1d   : > { %v1873_v2 = vld [vmem:[%s2231_s1 + $0x190] sm:$0xff]   ;;  %v1875_v4 = vld [vmem:[%s2231_s1 + $0x218] sm:$0xff]   ;;  %v1877_v6 = vld [vmem:[%s2231_s1 + $0x1e0] sm:$0xff]  }
  0x1e   : > { %1588 = vmatpush3.bf16.msra.mxu0 %v1822_v18  ;;  %1707 = vmatpush3.bf16.msra.mxu1 %v1821_v17  ;;  %v1876_v5 = vld [vmem:[%s2231_s1 + $0x198] sm:$0xff]   ;;  %v1878_v7 = vld [vmem:[%s2231_s1 + $0x220] sm:$0xff]   ;;  %v1880_v10 = vld [vmem:[%s2231_s1 + $0x1e8] sm:$0xff]  }
  0x1f   : > { %1589 = vmatprep.subr.bf16.mxu0 %v1823_v19  ;;  %1708 = vmatprep.subr.bf16.mxu1 %v1824_v20  ;;  %v1879_v8 = vld [vmem:[%s2231_s1 + $0x1a0] sm:$0xff]   ;;  %v1881_v11 = vld [vmem:[%s2231_s1 + $0x228] sm:$0xff]   ;;  %v1883_v13 = vld [vmem:[%s2231_s1 + $0x1f0] sm:$0xff]  }
  0x20   : > { %v1889_v9 = vld [vmem:[%s2024_s22 + $0x38] ss:$12 sps:$4 sm:$0xff]   ;;  %v1882_v12 = vld [vmem:[%s2231_s1 + $0x1a8] sm:$0xff]   ;;  %v1884_v14 = vld [vmem:[%s2231_s1 + $0x230] sm:$0xff]  }
  0x21   : > { %v1885_v15 = vld [vmem:[%s2231_s1 + $0x1b0] sm:$0xff]   ;;  %v1886_v16 = vld [vmem:[%s2231_s1 + $0x1f8] sm:$0xff]  }
  0x22   : > { %1590 = vmatpush3.bf16.msra.mxu0 %v1825_v21  ;;  %1709 = vmatpush3.bf16.msra.mxu1 %v1824_v20  ;;  %v1887_v17 = vld [vmem:[%s2231_s1 + $0x238] sm:$0xff]   ;;  %v1893_v21 = vld [vmem:[%s2024_s22 + $0x48] ss:$12 sps:$4 sm:$0xff]  }
  0x23   : > { %1591 = vmatprep.subr.bf16.mxu0 %v1826_v22  ;;  %1710 = vmatprep.subr.bf16.mxu1 %v1827_v23  ;;  %v1888_v18 = vld [vmem:[%s2231_s1 + $0x1b8] sm:$0xff]   ;;  %v1902_v22 = vmov 0.0|0.0  }
  0x24   : > { %v1890_v19 = vld [vmem:[%s2024_s22 + $0x50] ss:$12 sps:$4 sm:$0xff]   ;;  %v1891_v20 = vld [vmem:[%s2024_s22 + $0x4c] ss:$12 sps:$4 sm:$0xff]  }
  0x26   : > { %1592 = vmatpush3.bf16.msra.mxu0 %v1828_v26  ;;  %1711 = vmatpush3.bf16.msra.mxu1 %v1827_v23  ;;  %v1904_v23 = vmov 0.0  }
  0x27   : > { %1615 = vmatprep.subr.bf16.mxu0 %v1833_v27  ;;  %1716 = vmatprep.subr.bf16.mxu1 %v1834_v29 }
  0x29   : > { %569 = vmatmul.mubr.bf16.vlgmr.msra.gmra.mrb[0].mxu0 %v2046_v28  ;;  %1713 = vmatmul.mubr.bf16.vlgmr.msra.gmra.mrb[0].mxu1 %v1835_v30 }
  0x2a   : > { %1616 = vmatpush3.bf16.msra.mxu0 %v1836_v31  ;;  %1717 = vmatpush3.bf16.msra.mxu1 %v1834_v29 }
  0x2b   : > { %1617 = vmatprep.subr.bf16.mxu0 %v1837_v32  ;;  %1718 = vmatprep.subr.bf16.mxu1 %v1838_v33 }
  0x2c   : > { %576 = vmatprep.mubr.bf16.mxu0 %v2091_v43  ;;  %1732 = vmatprep.mubr.bf16.mxu1 %v1864_v52 }
  0x2e   : > { %1618 = vmatpush3.bf16.msra.mxu0 %v1839_v34  ;;  %1719 = vmatpush3.bf16.msra.mxu1 %v1838_v33 }
  0x2f   : > { %1619 = vmatprep.subr.bf16.mxu0 %v1840_v35  ;;  %1720 = vmatprep.subr.bf16.mxu1 %v1841_v36 }
  0x31   : > { %577 = vmatmul.mubr.bf16.gmra.mrb[4].mxu0 %v2094_v44 }
  0x32   : > { %1620 = vmatpush3.bf16.msra.mxu0 %v1842_v37  ;;  %1721 = vmatpush3.bf16.msra.mxu1 %v1841_v36 }
  0x33   : > { %1621 = vmatprep.subr.bf16.mxu0 %v1843_v38  ;;  %1722 = vmatprep.subr.bf16.mxu1 %v1844_v39 }
  0x34   : > { %826 = vmatprep.mubr.bf16.mxu0 %v1863_v51 }
  0x36   : > { %1622 = vmatpush3.bf16.msra.mxu0 %v1845_v40  ;;  %1723 = vmatpush3.bf16.msra.mxu1 %v1844_v39 }
  0x37   : > { %1623 = vmatprep.subr.bf16.mxu0 %v1846_v41  ;;  %1724 = vmatprep.subr.bf16.mxu1 %v1847_v42 }
  0x3a   : > { %1624 = vmatpush3.bf16.msra.mxu0 %v1848_v45  ;;  %1725 = vmatpush3.bf16.msra.mxu1 %v1847_v42 }
  0x3b   : > { %1625 = vmatprep.subr.bf16.mxu0 %v1849_v46  ;;  %1726 = vmatprep.subr.bf16.mxu1 %v1850_v47 }
  0x3e   : > { %1626 = vmatpush3.bf16.msra.mxu0 %v1853_v48  ;;  %1727 = vmatpush3.bf16.msra.mxu1 %v1850_v47 }
  0x3f   : > { %1627 = vmatprep.subr.bf16.mxu0 %v1855_v49  ;;  %1728 = vmatprep.subr.bf16.mxu1 %v1856_v50 }
  0x42   : > { %1628 = vmatpush3.bf16.msra.mxu0 %v1857_v53  ;;  %1729 = vmatpush3.bf16.msra.mxu1 %v1856_v50 }
  0x43   : > { %1629 = vmatprep.subr.bf16.mxu0 %v1858_v54  ;;  %1730 = vmatprep.subr.bf16.mxu1 %v1859_v55 }
  0x46   : > { %1630 = vmatpush3.bf16.msra.mxu0 %v1860_v56  ;;  %1731 = vmatpush3.bf16.msra.mxu1 %v1859_v55 }
  0x47   : > { %1653 = vmatprep.subr.bf16.mxu0 %v1865_v57  ;;  %1736 = vmatprep.subr.bf16.mxu1 %v1866_v58 }
  0x49   : > { %827 = vmatmul.mubr.bf16.vlgmr.msra.gmra.mrb[8].mxu0 %v1861_v59  ;;  %1733 = vmatmul.mubr.bf16.vlgmr.msra.gmra.mrb[0].mxu1 %v2036_v25 }
  0x4a   : > { %1654 = vmatpush3.bf16.msra.mxu0 %v1867_v60  ;;  %1737 = vmatpush3.bf16.msra.mxu1 %v1866_v58 }
  0x4b   : > { %1655 = vmatprep.subr.bf16.mxu0 %v1868_v61  ;;  %1738 = vmatprep.subr.bf16.mxu1 %v1869_v62 }
  0x4c   : > { %834 = vmatprep.mubr.bf16.mxu0 %v2033_v24  ;;  %1752 = vmatprep.mubr.bf16.mxu1 %v1889_v9 }
  0x4e   : > { %1656 = vmatpush3.bf16.msra.mxu0 %v1870_v63  ;;  %1739 = vmatpush3.bf16.msra.mxu1 %v1869_v62  ;;  %v1573_v63 = vld [vmem:[%s2232_s2] ss:$0 sm:$0xff] }
  0x4f   : > { %1657 = vmatprep.subr.bf16.mxu0 %v1871_v0  ;;  %1740 = vmatprep.subr.bf16.mxu1 %v1872_v1 }
  0x51   : > { %835 = vmatmul.mubr.bf16.gmra.mrb[12].mxu0 %v2046_v28 }
  0x52   : > { %1658 = vmatpush3.bf16.msra.mxu0 %v1873_v2  ;;  %1741 = vmatpush3.bf16.msra.mxu1 %v1872_v1 }
  0x53   : > { %1659 = vmatprep.subr.bf16.mxu0 %v1874_v3  ;;  %1742 = vmatprep.subr.bf16.mxu1 %v1875_v4 }
  0x54   : > { %1157 = vmatprep.mubr.bf16.mxu0 %v2091_v43 }
  0x56   : > { %1660 = vmatpush3.bf16.msra.mxu0 %v1876_v5  ;;  %1743 = vmatpush3.bf16.msra.mxu1 %v1875_v4 }
  0x57   : > { %1661 = vmatprep.subr.bf16.mxu0 %v1877_v6  ;;  %1744 = vmatprep.subr.bf16.mxu1 %v1878_v7 }
  0x5a   : > { %1662 = vmatpush3.bf16.msra.mxu0 %v1879_v8  ;;  %1745 = vmatpush3.bf16.msra.mxu1 %v1878_v7 }
  0x5b   : > { %1663 = vmatprep.subr.bf16.mxu0 %v1880_v10  ;;  %1746 = vmatprep.subr.bf16.mxu1 %v1881_v11 }
  0x5e   : > { %1664 = vmatpush3.bf16.msra.mxu0 %v1882_v12  ;;  %1747 = vmatpush3.bf16.msra.mxu1 %v1881_v11 }
  0x5f   : > { %1665 = vmatprep.subr.bf16.mxu0 %v1883_v13  ;;  %1748 = vmatprep.subr.bf16.mxu1 %v1884_v14 }
  0x62   : > { %1666 = vmatpush3.bf16.msra.mxu0 %v1885_v15  ;;  %1749 = vmatpush3.bf16.msra.mxu1 %v1884_v14 }
  0x63   : > { %1667 = vmatprep.subr.bf16.mxu0 %v1886_v16  ;;  %1750 = vmatprep.subr.bf16.mxu1 %v1887_v17 }
  0x66   : > { %1668 = vmatpush3.bf16.msra.mxu0 %v1888_v18  ;;  %1751 = vmatpush3.bf16.msra.mxu1 %v1887_v17 }
  0x67   : > { %1767 = vmatprep.subr.bf16.mxu1 %v1902_v22 }
  0x69   : > { %1158 = vmatmul.mubr.bf16.vlgmr.msra.gmra.mrb[16].mxu0 %v2094_v44  ;;  %1753 = vmatmul.mubr.bf16.vlgmr.msra.gmra.mrb[0].mxu1 %v1890_v19 }
  0x6a   : > { %1165 = vmatprep.mubr.bf16.mxu0 %v1891_v20  ;;  %1764 = vmatprep.mubr.msk.f32.mxu1 %vm1903_vm0, %v1904_v23 }
  0x71   : > { %1166 = vmatmul.mubr.bf16.gmra.mrb[20].mxu0 %v1893_v21 }
  0xfc   : > { %v1593_v24 = vpop.f32.mrb[0].mxu0 }
  0xfd   : > { %v1594_v25 = vpop.f32.mrb[1].mxu0 }
  0xfe   : > { %v1595_v26 = vadd.f32 %v1594_v25, %v1593_v24  ;;  %v1596_v27 = vpop.f32.mrb[2].mxu0 }
  0xff   : > { %v1597_v28 = vpop.f32.mrb[3].mxu0 }
 0x100   : > { %v1598_v29 = vadd.f32 %v1597_v28, %v1596_v27  ;;  %v1252_v28 = vld [vmem:[%s2233_s3] sm:$0x1] }
 0x104   : > { %v1599_v30 = vpop.f32.mrb[4].mxu0 }
 0x105   : > { %v1600_v31 = vpop.f32.mrb[5].mxu0 }
 0x106   : > { %v1601_v32 = vadd.f32 %v1600_v31, %v1599_v30  ;;  %v1602_v33 = vpop.f32.mrb[6].mxu0 }
 0x107   : > { %v1603_v34 = vpop.f32.mrb[7].mxu0 }
 0x108   : > { %v1604_v35 = vadd.f32 %v1603_v34, %v1602_v33  ;;  %v1333_v33 = vld [vmem:[#allocation2] sm:$0x1] }
 0x11c   : > { %v1631_v36 = vpop.f32.mrb[8].mxu0 }
 0x11d   : > { %v1632_v37 = vpop.f32.mrb[9].mxu0 }
 0x11e   : > { %v1633_v38 = vadd.f32 %v1632_v37, %v1631_v36  ;;  %v1634_v39 = vpop.f32.mrb[10].mxu0 }
 0x11f   : > { %v1635_v40 = vpop.f32.mrb[11].mxu0 }
 0x120   : > { %v1776_v41 = vadd.f32 %v1633_v38, %v1595_v26  ;;  %v1636_v42 = vadd.f32 %v1635_v40, %v1634_v39 }
 0x122   : > { %v1782_v43 = vadd.f32 %v1636_v42, %v1598_v29  ;;  %v1327_v29 = vld [vmem:[%s2234_s4] sm:$0x1] }
 0x124   : > { %v1637_v44 = vpop.f32.mrb[12].mxu0 }
 0x125   : > { %v1638_v45 = vpop.f32.mrb[13].mxu0 }
 0x126   : > { %v1639_v46 = vadd.f32 %v1638_v45, %v1637_v44  ;;  %v1640_v47 = vpop.f32.mrb[14].mxu0 }
 0x127   : > { %v1641_v48 = vpop.f32.mrb[15].mxu0 }
 0x128   : > { %v1773_v49 = vadd.f32 %v1639_v46, %v1601_v32  ;;  %v1642_v50 = vadd.f32 %v1641_v48, %v1640_v47 }
 0x12a   : > { %v1779_v51 = vadd.f32 %v1642_v50, %v1604_v35 }
 0x13c   : > { %v1669_v52 = vpop.f32.mrb[16].mxu0  ;;  %v1754_v53 = vpop.f32.mrb[0].mxu1 }
 0x13d   : > { %v1670_v54 = vpop.f32.mrb[17].mxu0  ;;  %v1208_v55 = vpop.f32.mrb[1].mxu1 }
 0x13e   : > { %v1671_v56 = vadd.f32 %v1670_v54, %v1669_v52  ;;  %v1672_v57 = vpop.f32.mrb[18].mxu0  ;;  %v1755_v58 = vpop.f32.mrb[2].mxu1 }
 0x13f   : > { %v1673_v59 = vpop.f32.mrb[19].mxu0  ;;  %v1211_v60 = vpop.f32.mrb[3].mxu1 }
 0x140   : > { %v1777_v61 = vadd.f32 %v1776_v41, %v1671_v56  ;;  %v1674_v62 = vadd.f32 %v1673_v59, %v1672_v57 }
 0x142   : > { %v1778_v0 = vadd.f32 %v1777_v61, %v1208_v55  ;;  %v1783_v1 = vadd.f32 %v1782_v43, %v1674_v62 }
 0x144   : > { %v1234_v2 = vadd.f32 %v1778_v0, %v1573_v63  ;;  %v1784_v3 = vadd.f32 %v1783_v1, %v1211_v60  ;;  %v1675_v4 = vpop.f32.mrb[20].mxu0 }
 0x145   : > { %v1676_v5 = vpop.f32.mrb[21].mxu0 }
 0x146   : > { %v1238_v6 = vmul.f32 0.2, %v1234_v2  ;;  %v1235_v7 = vadd.f32 %v1784_v3, %v1573_v63  ;;  %v1677_v8 = vadd.f32 %v1676_v5, %v1675_v4  ;;  %v1678_v9 = vpop.f32.mrb[22].mxu0 }
 0x147   : > { %v1679_v10 = vpop.f32.mrb[23].mxu0 }
 0x148   : > { %v1239_v11 = vmul.f32 0.2, %v1235_v7  ;;  %v1774_v12 = vadd.f32 %v1773_v49, %v1677_v8  ;;  %v1680_v13 = vadd.f32 %v1679_v10, %v1678_v9  ;;  %v1242_v14 = vmax.f32 %v1234_v2, %v1238_v6 }
 0x14a   : > { %v1243_v15 = vmax.f32 %v1235_v7, %v1239_v11  ;;  %v1775_v16 = vadd.f32 %v1774_v12, %v1754_v53  ;;  %v1780_v17 = vadd.f32 %v1779_v51, %v1680_v13 }
 0x14c   : > { %v1246_v18 = vpack.c.bf16 %v1243_v15, %v1242_v14  ;;  %v1236_v19 = vadd.f32 %v1775_v16, %v1573_v63  ;;  %v1781_v20 = vadd.f32 %v1780_v17, %v1755_v58 }
 0x14e   : > { %v1240_v21 = vmul.f32 0.2, %v1236_v19  ;;  %v1237_v23 = vadd.f32 %v1781_v20, %v1573_v63  ;;  %1769 = vmatpush3.bf16.msra.mxu1 %v1246_v18 }
 0x14f   : > { %1770 = vmatprep.subr.bf16.mxu1 %v1902_v22 }
 0x150   : > { %v1241_v24 = vmul.f32 0.2, %v1237_v23  ;;  %v1244_v25 = vmax.f32 %v1236_v19, %v1240_v21 }
 0x152   : > { %v1245_v26 = vmax.f32 %v1237_v23, %v1241_v24 }
 0x154   : > { %v1247_v27 = vpack.c.bf16 %v1245_v26, %v1244_v25 }
 0x156   : > { %1772 = vmatpush3.bf16.msra.mxu1 %v1247_v27 }
 0x159   : > { %1765 = vmatmul.mubr.msk.f32.vlgmr.msra.gmra.mrb[4].mxu1 %vm1253_vm1, %v1252_v28 }
 0x22c   : > { %v1323_v30 = vpop.f32.mrb[4].mxu1 }
 0x22d   : > { %v1328_v31 = vmul.f32 %v1327_v29, %v1323_v30  ;;  %v1766_v22 = vpop.f32.mrb[5].mxu1 }
 0x22f   : > { %v1330_v32 = vsel %vm1329_vm2, %v1328_v31, 0.0 }
 0x230   : > { %1331 = vadd.xlane.f32.xlu0 %v1330_v32 }
 0x2bd   : > { %v1332_v34 = vpop.xlane.xlu0 %1331 }
 0x2be   : > { %v1334_v35 = vadd.f32 %v1333_v33, %v1332_v34 }
 0x2c0   : > { %1336 = vst.msk [vmem:[%s249_s21] sm:$0x1] %vm1335_vm3, %v1334_v35 }
 0x2c1 PF: > { %s18_s23 = sadd.s32 1, %s1900_s23  }
 0x2c2   : > { %p15_p4 = scmp.ge.s32.totalorder %s18_s23, 4  }
 0x2c4   :  { %17 = sbr.rel (!%p15_p4) target bundleno = 3 (0x3), region = 76 }

</bundles_post_ra>
